<compile_context>
chip_gen: v7x
topology: tpu7x:2x2x1
jax: 0.10.0
libtpu: 0.0.40
codegen_flags: <defaults>
</compile_context>

<pallas_src>
import math

import jax
import jax.numpy as jnp
from jax.experimental import pallas as pl
from jax.experimental.pallas import tpu as pltpu

# ----------------------------- config (small ViT) -----------------------------
B = 2                       # batch
C = 3                       # image channels
IMG = 16                    # image height/width
PATCH = 8                   # patch size -> 2x2 = 4 patches
NP = (IMG // PATCH) ** 2
S = NP + 1                  # tokens incl. [cls]
D = 32                      # embed dim
HEADS = 2
DH = D // HEADS
MLP = 64                    # mlp hidden dim
DEPTH = 2                   # number of transformer blocks
N_LAST_BLOCKS = 1
LN_EPS = 1e-6
CPP = C * PATCH * PATCH     # flattened patch vector length
NVEC = 4 + S                # rows of the small-vector slab: pb, cls, norm_g, norm_b, pos


# ----------------------------- in-kernel helpers -------------------------------
def _ln_normalize(x):
    """LayerNorm normalization only (affine folded into the following matmul)."""
    x = x.astype(jnp.float32)
    mu = jnp.mean(x, axis=-1, keepdims=True)
    var = jnp.mean(jnp.square(x - mu), axis=-1, keepdims=True)
    return (x - mu) * jax.lax.rsqrt(var + LN_EPS)


def _gelu(x):
    """Exact (erf) GELU, matches torch.nn.GELU default."""
    return 0.5 * x * (1.0 + jax.lax.erf(x * (1.0 / math.sqrt(2.0))))


# ----------------------------- fused ViT kernel --------------------------------
def vit_fused_kernel(
    patches_ref,       # [B, NP, CPP]
    pw_ref,            # [CPP, D]
    vecs_ref,          # [NVEC, D]   rows: patch_b, cls, norm_g, norm_b, pos[0..S-1]
    wqkv_ref,          # [3*DEPTH*HEADS, D, DH]   (LN1 gamma + 1/sqrt(DH) folded)
    bqkv_ref,          # [3*DEPTH*HEADS, 1, DH]   (LN1 beta + qkv bias folded)
    wproj_ref,         # [DEPTH*HEADS, DH, D]     (LayerScale-1 folded)
    w1_ref,            # [DEPTH, D, MLP]          (LN2 gamma folded)
    b1_ref,            # [DEPTH, 1, MLP]          (LN2 beta folded)
    w2_ref,            # [DEPTH, MLP, D]          (LayerScale-2 folded)
    bd_ref,            # [DEPTH, 2, D]            row0: proj bias, row1: fc2 bias (folded)
    out_ref,           # [N_LAST_BLOCKS, B, S, D]
):
    # small constants, loaded once (stay in vregs)
    vecs = vecs_ref[...]
    pb = vecs[0:1, :]
    cls = vecs[1:2, :]
    ng = vecs[2:3, :]
    nb = vecs[3:4, :]
    pos = vecs[4:4 + S, :]
    pw = pw_ref[...]

    collected = [[None] * B for _ in range(N_LAST_BLOCKS)]

    for b in range(B):                              # static unroll over batch
        # ---- patch embed: Conv2d(kernel=stride=PATCH) == per-patch matmul ----
        patches = patches_ref[b]                    # [NP, CPP]
        xp = jnp.dot(patches, pw, preferred_element_type=jnp.float32) + pb

        # ---- token stream assembled in vregs (no scratch round-trip) ----
        x = jnp.concatenate([cls, xp], axis=0) + pos          # [S, D]

        for li in range(DEPTH):                     # statically unrolled blocks
            # ---------------- attention branch ----------------
            h = _ln_normalize(x)                    # affine folded into W/b below
            bd_li = bd_ref[li]                      # [2, D]
            o = bd_li[0:1, :]                       # start from folded proj bias

            for hd in range(HEADS):                 # weight-side head split
                qi = (0 * DEPTH + li) * HEADS + hd
                ki = (1 * DEPTH + li) * HEADS + hd
                vi = (2 * DEPTH + li) * HEADS + hd
                q = jnp.dot(h, wqkv_ref[qi], preferred_element_type=jnp.float32) + bqkv_ref[qi]
                k = jnp.dot(h, wqkv_ref[ki], preferred_element_type=jnp.float32) + bqkv_ref[ki]
                v = jnp.dot(h, wqkv_ref[vi], preferred_element_type=jnp.float32) + bqkv_ref[vi]
                # q @ k^T without an explicit transpose (contract the DH axis)
                s = jax.lax.dot_general(q, k, (((1,), (1,)), ((), ())),
                                        preferred_element_type=jnp.float32)   # [S, S]
                m = jnp.max(s, axis=-1, keepdims=True)
                p = jnp.exp(s - m)
                p = p / jnp.sum(p, axis=-1, keepdims=True)                     # exact softmax
                ov = jnp.dot(p, v, preferred_element_type=jnp.float32)         # [S, DH]
                # per-head slice of the (LayerScale-folded) output projection
                o = o + jnp.dot(ov, wproj_ref[li * HEADS + hd],
                                preferred_element_type=jnp.float32)            # [S, D]

            x = x + o                               # residual (LayerScale already in W/b)

            # ---------------- MLP branch ----------------
            h2 = _ln_normalize(x)
            h2 = jnp.dot(h2, w1_ref[li], preferred_element_type=jnp.float32) + b1_ref[li]
            h2 = _gelu(h2)
            h2 = jnp.dot(h2, w2_ref[li], preferred_element_type=jnp.float32) + bd_li[1:2, :]
            x = x + h2

            # ---- collect last n blocks with final LayerNorm applied (norm=True) ----
            if li >= DEPTH - N_LAST_BLOCKS:
                collected[li - (DEPTH - N_LAST_BLOCKS)][b] = _ln_normalize(x) * ng + nb

    # single one-time output store per collected block
    for n in range(N_LAST_BLOCKS):
        out_ref[n] = jnp.stack(collected[n], axis=0).astype(out_ref.dtype)


# ----------------------------- parameter packing (once, outside jit) ------------
def pack_params(params):
    """Fold LN affine, LayerScale and 1/sqrt(DH) into matmul weights/biases and pack
    everything into a few stacked slabs.  Called ONCE (cached), not per forward."""
    scale = 1.0 / math.sqrt(DH)

    pw = params["patch_w"].reshape(D, CPP).T                   # [CPP, D]
    vecs = jnp.concatenate([
        params["patch_b"].reshape(1, D),
        params["cls_token"].reshape(1, D),
        params["norm_g"].reshape(1, D),
        params["norm_b"].reshape(1, D),
        params["pos_embed"].reshape(S, D),
    ], axis=0)                                                 # [NVEC, D]

    wq_l, wk_l, wv_l, bq_l, bk_l, bv_l = [], [], [], [], [], []
    wp_l, w1_l, b1_l, w2_l, bd_l = [], [], [], [], []

    def heads_w(Wm):                                            # [D, D] -> [HEADS, D, DH]
        return Wm.reshape(D, HEADS, DH).transpose(1, 0, 2)

    def heads_b(bm):                                            # [D] -> [HEADS, 1, DH]
        return bm.reshape(HEADS, 1, DH)

    for li in range(DEPTH):
        bp = params["blocks"][li]
        # LN1 affine folded into qkv weights/bias
        Wg = bp["ln1_g"][:, None] * bp["qkv_w"]                # [D, 3D]
        bf = bp["ln1_b"] @ bp["qkv_w"] + bp["qkv_b"]           # [3D]
        Wq, Wk, Wv = Wg[:, 0:D] * scale, Wg[:, D:2 * D], Wg[:, 2 * D:3 * D]
        bq, bk, bv = bf[0:D] * scale, bf[D:2 * D], bf[2 * D:3 * D]
        wq_l.append(heads_w(Wq)); wk_l.append(heads_w(Wk)); wv_l.append(heads_w(Wv))
        bq_l.append(heads_b(bq)); bk_l.append(heads_b(bk)); bv_l.append(heads_b(bv))

        # LayerScale-1 folded into attention output projection
        Wp = bp["proj_w"] * bp["ls1"][None, :]                 # [D, D]
        wp_l.append(Wp.reshape(HEADS, DH, D))                  # per-head input-row slices
        bproj = bp["ls1"] * bp["proj_b"]                       # [D]

        # LN2 affine folded into fc1; LayerScale-2 folded into fc2
        w1_l.append(bp["ln2_g"][:, None] * bp["fc1_w"])        # [D, MLP]
        b1_l.append((bp["ln2_b"] @ bp["fc1_w"] + bp["fc1_b"]).reshape(1, MLP))
        w2_l.append(bp["fc2_w"] * bp["ls2"][None, :])          # [MLP, D]
        b2 = bp["ls2"] * bp["fc2_b"]                           # [D]
        bd_l.append(jnp.stack([bproj, b2], axis=0))            # [2, D]

    wq = jnp.stack(wq_l).reshape(DEPTH * HEADS, D, DH)
    wk = jnp.stack(wk_l).reshape(DEPTH * HEADS, D, DH)
    wv = jnp.stack(wv_l).reshape(DEPTH * HEADS, D, DH)
    bq = jnp.stack(bq_l).reshape(DEPTH * HEADS, 1, DH)
    bk = jnp.stack(bk_l).reshape(DEPTH * HEADS, 1, DH)
    bv = jnp.stack(bv_l).reshape(DEPTH * HEADS, 1, DH)

    return {
        "pw": pw,
        "vecs": vecs,
        "wqkv": jnp.concatenate([wq, wk, wv], axis=0),          # [3*DEPTH*HEADS, D, DH]
        "bqkv": jnp.concatenate([bq, bk, bv], axis=0),          # [3*DEPTH*HEADS, 1, DH]
        "wproj": jnp.stack(wp_l).reshape(DEPTH * HEADS, DH, D), # [DEPTH*HEADS, DH, D]
        "w1": jnp.stack(w1_l),                                  # [DEPTH, D, MLP]
        "b1": jnp.stack(b1_l),                                  # [DEPTH, 1, MLP]
        "w2": jnp.stack(w2_l),                                  # [DEPTH, MLP, D]
        "bd": jnp.stack(bd_l),                                  # [DEPTH, 2, D]
    }


# ----------------------------- forward wrapper ---------------------------------
@jax.jit
def model_with_intermediate_layers_forward(images, packed):
    """torch.inference_mode + autocast(dtype=float) -> plain fp32 eval forward."""
    assert images.shape[0] == B
    Hp = IMG // PATCH

    # pure layout: extract per-patch vectors in (C, p, p) order (matches conv weight flat)
    xi = images.reshape(B, C, Hp, PATCH, Hp, PATCH)
    xi = jnp.transpose(xi, (0, 2, 4, 1, 3, 5)).reshape(B, NP, CPP)

    outs = pl.pallas_call(
        vit_fused_kernel,
        out_shape=jax.ShapeDtypeStruct((N_LAST_BLOCKS, B, S, D), jnp.float32),
        grid=(1,),                                             # single step: whole forward
        in_specs=[
            pl.BlockSpec((B, NP, CPP), lambda i: (0, 0, 0)),
            pl.BlockSpec((CPP, D), lambda i: (0, 0)),
            pl.BlockSpec((NVEC, D), lambda i: (0, 0)),
            pl.BlockSpec((3 * DEPTH * HEADS, D, DH), lambda i: (0, 0, 0)),
            pl.BlockSpec((3 * DEPTH * HEADS, 1, DH), lambda i: (0, 0, 0)),
            pl.BlockSpec((DEPTH * HEADS, DH, D), lambda i: (0, 0, 0)),
            pl.BlockSpec((DEPTH, D, MLP), lambda i: (0, 0, 0)),
            pl.BlockSpec((DEPTH, 1, MLP), lambda i: (0, 0, 0)),
            pl.BlockSpec((DEPTH, MLP, D), lambda i: (0, 0, 0)),
            pl.BlockSpec((DEPTH, 2, D), lambda i: (0, 0, 0)),
        ],
        out_specs=pl.BlockSpec((N_LAST_BLOCKS, B, S, D), lambda i: (0, 0, 0, 0)),
        compiler_params=pltpu.CompilerParams(dimension_semantics=("arbitrary",)),
    )(xi, packed["pw"], packed["vecs"], packed["wqkv"], packed["bqkv"],
      packed["wproj"], packed["w1"], packed["b1"], packed["w2"], packed["bd"])

    results = []
    for i in range(N_LAST_BLOCKS):
        out_i = outs[i]                                        # [B, S, D]
        patch_tokens = out_i[:, 1:, :]                         # [B, NP, D]
        class_token = out_i[:, 0, :]                           # [B, D]
        results.append((patch_tokens, class_token))
    return tuple(results)


# ----------------------------- pure-JAX reference -------------------------------
def reference_forward(images, params):
    Bn = images.shape[0]
    Hp = IMG // PATCH
    xi = images.reshape(Bn, C, Hp, PATCH, Hp, PATCH)
    xi = jnp.transpose(xi, (0, 2, 4, 1, 3, 5)).reshape(Bn, NP, CPP)
    x = xi @ params["patch_w"].reshape(D, CPP).T + params["patch_b"]
    cls = jnp.broadcast_to(params["cls_token"], (Bn, 1, D))
    x = jnp.concatenate([cls, x], axis=1) + params["pos_embed"]

    def ln(v, g, b):
        mu = v.mean(-1, keepdims=True)
        var = ((v - mu) ** 2).mean(-1, keepdims=True)
        return (v - mu) * jax.lax.rsqrt(var + LN_EPS) * g + b

    collected = []
    for li in range(DEPTH):
        bp = params["blocks"][li]
        h = ln(x, bp["ln1_g"], bp["ln1_b"])
        qkv = (h @ bp["qkv_w"] + bp["qkv_b"]).reshape(Bn, S, 3, HEADS, DH)
        q = jnp.transpose(qkv[:, :, 0], (0, 2, 1, 3)) / math.sqrt(DH)
        k = jnp.transpose(qkv[:, :, 1], (0, 2, 1, 3))
        v = jnp.transpose(qkv[:, :, 2], (0, 2, 1, 3))
        s = jnp.einsum("bhqd,bhkd->bhqk", q, k)
        p = jax.nn.softmax(s, axis=-1)
        o = jnp.einsum("bhqk,bhkd->bhqd", p, v)
        o = jnp.transpose(o, (0, 2, 1, 3)).reshape(Bn, S, D)
        o = o @ bp["proj_w"] + bp["proj_b"]
        x = x + bp["ls1"] * o
        h2 = ln(x, bp["ln2_g"], bp["ln2_b"])
        h2 = h2 @ bp["fc1_w"] + bp["fc1_b"]
        h2 = 0.5 * h2 * (1.0 + jax.lax.erf(h2 / math.sqrt(2.0)))
        h2 = h2 @ bp["fc2_w"] + bp["fc2_b"]
        x = x + bp["ls2"] * h2
        if li >= DEPTH - N_LAST_BLOCKS:
            collected.append(x)

    outs = []
    for c in collected:
        cn = ln(c, params["norm_g"], params["norm_b"])
        outs.append((cn[:, 1:], cn[:, 0]))
    return tuple(outs)


# ----------------------------- deterministic params -----------------------------
def init_params(key):
    ks = jax.random.split(key, 8 + DEPTH)
    std = 0.02
    params = {
        "patch_w": std * jax.random.normal(ks[0], (D, C, PATCH, PATCH), jnp.float32),
        "patch_b": jnp.zeros((D,), jnp.float32),
        "cls_token": std * jax.random.normal(ks[1], (1, 1, D), jnp.float32),
        "pos_embed": std * jax.random.normal(ks[2], (1, S, D), jnp.float32),
        "norm_g": jnp.ones((D,), jnp.float32),
        "norm_b": jnp.zeros((D,), jnp.float32),
        "blocks": [],
    }
    for li in range(DEPTH):
        bk = jax.random.split(ks[8 + li], 6)
        params["blocks"].append({
            "ln1_g": jnp.ones((D,), jnp.float32),
            "ln1_b": jnp.zeros((D,), jnp.float32),
            "qkv_w": std * jax.random.normal(bk[0], (D, 3 * D), jnp.float32),
            "qkv_b": jnp.zeros((3 * D,), jnp.float32),
            "proj_w": std * jax.random.normal(bk[1], (D, D), jnp.float32),
            "proj_b": jnp.zeros((D,), jnp.float32),
            "ls1": 0.1 * jnp.ones((D,), jnp.float32),          # LayerScale gamma
            "ln2_g": jnp.ones((D,), jnp.float32),
            "ln2_b": jnp.zeros((D,), jnp.float32),
            "fc1_w": std * jax.random.normal(bk[2], (D, MLP), jnp.float32),
            "fc1_b": jnp.zeros((MLP,), jnp.float32),
            "fc2_w": std * jax.random.normal(bk[3], (MLP, D), jnp.float32),
            "fc2_b": jnp.zeros((D,), jnp.float32),
            "ls2": 0.1 * jnp.ones((D,), jnp.float32),
        })
    return params


# ----------------------------- main ---------------------------------------------
if __name__ == "__main__":
    key = jax.random.PRNGKey(0)
    pkey, xkey = jax.random.split(key)
    params = init_params(pkey)
    packed = pack_params(params)         # one-time weight folding/packing (cached)
    images = jax.random.normal(xkey, (B, C, IMG, IMG), jnp.float32)   # NCHW, like PyTorch

    features = model_with_intermediate_layers_forward(images, packed)
    features = jax.block_until_ready(features)

    (patch_tokens, class_token), = features
    assert patch_tokens.shape == (B, NP, D), patch_tokens.shape
    assert class_token.shape == (B, D), class_token.shape
    assert bool(jnp.all(jnp.isfinite(patch_tokens)))
    assert bool(jnp.all(jnp.isfinite(class_token)))

    # numerical check vs pure-JAX reference (exact softmax, fp32 everywhere)
    (ref_patch, ref_cls), = reference_forward(images, params)
    assert jnp.allclose(patch_tokens, ref_patch, atol=1e-3, rtol=1e-3)
    assert jnp.allclose(class_token, ref_cls, atol=1e-3, rtol=1e-3)

    print("KERNEL_OK")
</pallas_src>

<mosaic_0001>
module attributes {stable_mosaic.version = 11 : i64} {
  func.func @vit_fused_kernel(%arg0: i32, %arg1: memref<2x4x192xf32, #tpu.memory_space<vmem>>, %arg2: memref<192x32xf32, #tpu.memory_space<vmem>>, %arg3: memref<9x32xf32, #tpu.memory_space<vmem>>, %arg4: memref<12x32x16xf32, #tpu.memory_space<vmem>>, %arg5: memref<12x1x16xf32, #tpu.memory_space<vmem>>, %arg6: memref<4x16x32xf32, #tpu.memory_space<vmem>>, %arg7: memref<2x32x64xf32, #tpu.memory_space<vmem>>, %arg8: memref<2x1x64xf32, #tpu.memory_space<vmem>>, %arg9: memref<2x64x32xf32, #tpu.memory_space<vmem>>, %arg10: memref<2x2x32xf32, #tpu.memory_space<vmem>>, %arg11: memref<1x2x5x32xf32, #tpu.memory_space<vmem>>) attributes {dimension_semantics = [#tpu.dimension_semantics<arbitrary>], iteration_bounds = array<i64: 1>, scalar_prefetch = 0 : i64, scratch_operands = 0 : i64, tpu.core_type = #tpu.core_type<tc>, window_params = [{pipeline_mode = #tpu.pipeline_mode<synchronous>, transform_indices = @transform_0, window_bounds = array<i64: 2, 4, 192>}, {pipeline_mode = #tpu.pipeline_mode<synchronous>, transform_indices = @transform_1, window_bounds = array<i64: 192, 32>}, {pipeline_mode = #tpu.pipeline_mode<synchronous>, transform_indices = @transform_2, window_bounds = array<i64: 9, 32>}, {pipeline_mode = #tpu.pipeline_mode<synchronous>, transform_indices = @transform_3, window_bounds = array<i64: 12, 32, 16>}, {pipeline_mode = #tpu.pipeline_mode<synchronous>, transform_indices = @transform_4, window_bounds = array<i64: 12, 1, 16>}, {pipeline_mode = #tpu.pipeline_mode<synchronous>, transform_indices = @transform_5, window_bounds = array<i64: 4, 16, 32>}, {pipeline_mode = #tpu.pipeline_mode<synchronous>, transform_indices = @transform_6, window_bounds = array<i64: 2, 32, 64>}, {pipeline_mode = #tpu.pipeline_mode<synchronous>, transform_indices = @transform_7, window_bounds = array<i64: 2, 1, 64>}, {pipeline_mode = #tpu.pipeline_mode<synchronous>, transform_indices = @transform_8, window_bounds = array<i64: 2, 64, 32>}, {pipeline_mode = #tpu.pipeline_mode<synchronous>, transform_indices = @transform_9, window_bounds = array<i64: 2, 2, 32>}, {pipeline_mode = #tpu.pipeline_mode<synchronous>, transform_indices = @transform_10, window_bounds = array<i64: 1, 2, 5, 32>}]} {
    %c0 = arith.constant 0 : index
    %c0_0 = arith.constant 0 : index
    %0 = vector.load %arg3[%c0, %c0_0] : memref<9x32xf32, #tpu.memory_space<vmem>>, vector<9x32xf32>
    %1 = vector.extract_strided_slice %0 {offsets = [0, 0], sizes = [1, 32], strides = [1, 1]} : vector<9x32xf32> to vector<1x32xf32>
    %2 = vector.extract_strided_slice %0 {offsets = [1, 0], sizes = [1, 32], strides = [1, 1]} : vector<9x32xf32> to vector<1x32xf32>
    %3 = vector.extract_strided_slice %0 {offsets = [2, 0], sizes = [1, 32], strides = [1, 1]} : vector<9x32xf32> to vector<1x32xf32>
    %4 = vector.extract_strided_slice %0 {offsets = [3, 0], sizes = [1, 32], strides = [1, 1]} : vector<9x32xf32> to vector<1x32xf32>
    %5 = vector.extract_strided_slice %0 {offsets = [4, 0], sizes = [5, 32], strides = [1, 1]} : vector<9x32xf32> to vector<5x32xf32>
    %c0_1 = arith.constant 0 : index
    %c0_2 = arith.constant 0 : index
    %6 = vector.load %arg2[%c0_1, %c0_2] : memref<192x32xf32, #tpu.memory_space<vmem>>, vector<192x32xf32>
    %c0_3 = arith.constant 0 : index
    %c0_4 = arith.constant 0 : index
    %c0_5 = arith.constant 0 : index
    %7 = vector.load %arg1[%c0_3, %c0_4, %c0_5] : memref<2x4x192xf32, #tpu.memory_space<vmem>>, vector<1x4x192xf32>
    %8 = vector.shape_cast %7 : vector<1x4x192xf32> to vector<4x192xf32>
    %cst = arith.constant dense<0.000000e+00> : vector<4x32xf32>
    %9 = tpu.matmul %8, %6, %cst {dimension_numbers = #tpu.dot_dimension_numbers<[1], [0], [0], [1], [0, 0, 1, 1], [], []>} : vector<4x192xf32>, vector<192x32xf32>, vector<4x32xf32> -> vector<4x32xf32>
    %10 = vector.broadcast %1 : vector<1x32xf32> to vector<4x32xf32>
    %11 = arith.addf %9, %10 : vector<4x32xf32>
    %12 = tpu.concatenate %2, %11 in 0 : vector<1x32xf32>, vector<4x32xf32> -> vector<5x32xf32>
    %13 = arith.addf %12, %5 : vector<5x32xf32>
    %cst_6 = arith.constant dense<0.000000e+00> : vector<5xf32>
    %14 = vector.multi_reduction <add>, %13, %cst_6 [1] : vector<5x32xf32> to vector<5xf32>
    %15 = vector.shape_cast %14 : vector<5xf32> to vector<5x1xf32>
    %cst_7 = arith.constant 3.200000e+01 : f32
    %16 = vector.broadcast %cst_7 : f32 to vector<5x1xf32>
    %17 = arith.divf %15, %16 : vector<5x1xf32>
    %18 = vector.broadcast %17 : vector<5x1xf32> to vector<5x32xf32>
    %19 = arith.subf %13, %18 : vector<5x32xf32>
    %20 = arith.mulf %19, %19 : vector<5x32xf32>
    %cst_8 = arith.constant dense<0.000000e+00> : vector<5xf32>
    %21 = vector.multi_reduction <add>, %20, %cst_8 [1] : vector<5x32xf32> to vector<5xf32>
    %22 = vector.shape_cast %21 : vector<5xf32> to vector<5x1xf32>
    %cst_9 = arith.constant 3.200000e+01 : f32
    %23 = vector.broadcast %cst_9 : f32 to vector<5x1xf32>
    %24 = arith.divf %22, %23 : vector<5x1xf32>
    %25 = vector.broadcast %17 : vector<5x1xf32> to vector<5x32xf32>
    %26 = arith.subf %13, %25 : vector<5x32xf32>
    %cst_10 = arith.constant 9.99999997E-7 : f32
    %27 = vector.broadcast %cst_10 : f32 to vector<5x1xf32>
    %28 = arith.addf %24, %27 : vector<5x1xf32>
    %29 = math.rsqrt %28 : vector<5x1xf32>
    %30 = vector.broadcast %29 : vector<5x1xf32> to vector<5x32xf32>
    %31 = arith.mulf %26, %30 : vector<5x32xf32>
    %c0_11 = arith.constant 0 : index
    %c0_12 = arith.constant 0 : index
    %c0_13 = arith.constant 0 : index
    %32 = vector.load %arg10[%c0_11, %c0_12, %c0_13] : memref<2x2x32xf32, #tpu.memory_space<vmem>>, vector<1x2x32xf32>
    %33 = vector.shape_cast %32 : vector<1x2x32xf32> to vector<2x32xf32>
    %34 = vector.extract_strided_slice %33 {offsets = [0, 0], sizes = [1, 32], strides = [1, 1]} : vector<2x32xf32> to vector<1x32xf32>
    %c0_14 = arith.constant 0 : index
    %c0_15 = arith.constant 0 : index
    %c0_16 = arith.constant 0 : index
    %35 = vector.load %arg4[%c0_14, %c0_15, %c0_16] : memref<12x32x16xf32, #tpu.memory_space<vmem>>, vector<1x32x16xf32>
    %36 = vector.shape_cast %35 : vector<1x32x16xf32> to vector<32x16xf32>
    %cst_17 = arith.constant dense<0.000000e+00> : vector<5x16xf32>
    %37 = tpu.matmul %31, %36, %cst_17 {dimension_numbers = #tpu.dot_dimension_numbers<[1], [0], [0], [1], [0, 0, 1, 1], [], []>} : vector<5x32xf32>, vector<32x16xf32>, vector<5x16xf32> -> vector<5x16xf32>
    %c0_18 = arith.constant 0 : index
    %c0_19 = arith.constant 0 : index
    %c0_20 = arith.constant 0 : index
    %38 = vector.load %arg5[%c0_18, %c0_19, %c0_20] : memref<12x1x16xf32, #tpu.memory_space<vmem>>, vector<1x1x16xf32>
    %39 = vector.shape_cast %38 : vector<1x1x16xf32> to vector<1x16xf32>
    %40 = vector.broadcast %39 : vector<1x16xf32> to vector<5x16xf32>
    %41 = arith.addf %37, %40 : vector<5x16xf32>
    %c4 = arith.constant 4 : index
    %c0_21 = arith.constant 0 : index
    %c0_22 = arith.constant 0 : index
    %42 = vector.load %arg4[%c4, %c0_21, %c0_22] : memref<12x32x16xf32, #tpu.memory_space<vmem>>, vector<1x32x16xf32>
    %43 = vector.shape_cast %42 : vector<1x32x16xf32> to vector<32x16xf32>
    %cst_23 = arith.constant dense<0.000000e+00> : vector<5x16xf32>
    %44 = tpu.matmul %31, %43, %cst_23 {dimension_numbers = #tpu.dot_dimension_numbers<[1], [0], [0], [1], [0, 0, 1, 1], [], []>} : vector<5x32xf32>, vector<32x16xf32>, vector<5x16xf32> -> vector<5x16xf32>
    %c4_24 = arith.constant 4 : index
    %c0_25 = arith.constant 0 : index
    %c0_26 = arith.constant 0 : index
    %45 = vector.load %arg5[%c4_24, %c0_25, %c0_26] : memref<12x1x16xf32, #tpu.memory_space<vmem>>, vector<1x1x16xf32>
    %46 = vector.shape_cast %45 : vector<1x1x16xf32> to vector<1x16xf32>
    %47 = vector.broadcast %46 : vector<1x16xf32> to vector<5x16xf32>
    %48 = arith.addf %44, %47 : vector<5x16xf32>
    %c8 = arith.constant 8 : index
    %c0_27 = arith.constant 0 : index
    %c0_28 = arith.constant 0 : index
    %49 = vector.load %arg4[%c8, %c0_27, %c0_28] : memref<12x32x16xf32, #tpu.memory_space<vmem>>, vector<1x32x16xf32>
    %50 = vector.shape_cast %49 : vector<1x32x16xf32> to vector<32x16xf32>
    %cst_29 = arith.constant dense<0.000000e+00> : vector<5x16xf32>
    %51 = tpu.matmul %31, %50, %cst_29 {dimension_numbers = #tpu.dot_dimension_numbers<[1], [0], [0], [1], [0, 0, 1, 1], [], []>} : vector<5x32xf32>, vector<32x16xf32>, vector<5x16xf32> -> vector<5x16xf32>
    %c8_30 = arith.constant 8 : index
    %c0_31 = arith.constant 0 : index
    %c0_32 = arith.constant 0 : index
    %52 = vector.load %arg5[%c8_30, %c0_31, %c0_32] : memref<12x1x16xf32, #tpu.memory_space<vmem>>, vector<1x1x16xf32>
    %53 = vector.shape_cast %52 : vector<1x1x16xf32> to vector<1x16xf32>
    %54 = vector.broadcast %53 : vector<1x16xf32> to vector<5x16xf32>
    %55 = arith.addf %51, %54 : vector<5x16xf32>
    %cst_33 = arith.constant dense<0.000000e+00> : vector<5x5xf32>
    %56 = tpu.matmul %41, %48, %cst_33 {dimension_numbers = #tpu.dot_dimension_numbers<[1], [1], [0], [0], [0, 0, 1, 0], [], []>} : vector<5x16xf32>, vector<5x16xf32>, vector<5x5xf32> -> vector<5x5xf32>
    %cst_34 = arith.constant dense<0xFF800000> : vector<5xf32>
    %57 = vector.multi_reduction <maximumf>, %56, %cst_34 [1] : vector<5x5xf32> to vector<5xf32>
    %58 = vector.shape_cast %57 : vector<5xf32> to vector<5x1xf32>
    %59 = vector.broadcast %58 : vector<5x1xf32> to vector<5x5xf32>
    %60 = arith.subf %56, %59 : vector<5x5xf32>
    %61 = math.exp %60 : vector<5x5xf32>
    %cst_35 = arith.constant dense<0.000000e+00> : vector<5xf32>
    %62 = vector.multi_reduction <add>, %61, %cst_35 [1] : vector<5x5xf32> to vector<5xf32>
    %63 = vector.shape_cast %62 : vector<5xf32> to vector<5x1xf32>
    %64 = vector.broadcast %63 : vector<5x1xf32> to vector<5x5xf32>
    %65 = arith.divf %61, %64 : vector<5x5xf32>
    %cst_36 = arith.constant dense<0.000000e+00> : vector<5x16xf32>
    %66 = tpu.matmul %65, %55, %cst_36 {dimension_numbers = #tpu.dot_dimension_numbers<[1], [0], [0], [1], [0, 0, 1, 1], [], []>} : vector<5x5xf32>, vector<5x16xf32>, vector<5x16xf32> -> vector<5x16xf32>
    %c0_37 = arith.constant 0 : index
    %c0_38 = arith.constant 0 : index
    %c0_39 = arith.constant 0 : index
    %67 = vector.load %arg6[%c0_37, %c0_38, %c0_39] : memref<4x16x32xf32, #tpu.memory_space<vmem>>, vector<1x16x32xf32>
    %68 = vector.shape_cast %67 : vector<1x16x32xf32> to vector<16x32xf32>
    %cst_40 = arith.constant dense<0.000000e+00> : vector<5x32xf32>
    %69 = tpu.matmul %66, %68, %cst_40 {dimension_numbers = #tpu.dot_dimension_numbers<[1], [0], [0], [1], [0, 0, 1, 1], [], []>} : vector<5x16xf32>, vector<16x32xf32>, vector<5x32xf32> -> vector<5x32xf32>
    %70 = vector.broadcast %34 : vector<1x32xf32> to vector<5x32xf32>
    %71 = arith.addf %70, %69 : vector<5x32xf32>
    %c1 = arith.constant 1 : index
    %c0_41 = arith.constant 0 : index
    %c0_42 = arith.constant 0 : index
    %72 = vector.load %arg4[%c1, %c0_41, %c0_42] : memref<12x32x16xf32, #tpu.memory_space<vmem>>, vector<1x32x16xf32>
    %73 = vector.shape_cast %72 : vector<1x32x16xf32> to vector<32x16xf32>
    %cst_43 = arith.constant dense<0.000000e+00> : vector<5x16xf32>
    %74 = tpu.matmul %31, %73, %cst_43 {dimension_numbers = #tpu.dot_dimension_numbers<[1], [0], [0], [1], [0, 0, 1, 1], [], []>} : vector<5x32xf32>, vector<32x16xf32>, vector<5x16xf32> -> vector<5x16xf32>
    %c1_44 = arith.constant 1 : index
    %c0_45 = arith.constant 0 : index
    %c0_46 = arith.constant 0 : index
    %75 = vector.load %arg5[%c1_44, %c0_45, %c0_46] : memref<12x1x16xf32, #tpu.memory_space<vmem>>, vector<1x1x16xf32>
    %76 = vector.shape_cast %75 : vector<1x1x16xf32> to vector<1x16xf32>
    %77 = vector.broadcast %76 : vector<1x16xf32> to vector<5x16xf32>
    %78 = arith.addf %74, %77 : vector<5x16xf32>
    %c5 = arith.constant 5 : index
    %c0_47 = arith.constant 0 : index
    %c0_48 = arith.constant 0 : index
    %79 = vector.load %arg4[%c5, %c0_47, %c0_48] : memref<12x32x16xf32, #tpu.memory_space<vmem>>, vector<1x32x16xf32>
    %80 = vector.shape_cast %79 : vector<1x32x16xf32> to vector<32x16xf32>
    %cst_49 = arith.constant dense<0.000000e+00> : vector<5x16xf32>
    %81 = tpu.matmul %31, %80, %cst_49 {dimension_numbers = #tpu.dot_dimension_numbers<[1], [0], [0], [1], [0, 0, 1, 1], [], []>} : vector<5x32xf32>, vector<32x16xf32>, vector<5x16xf32> -> vector<5x16xf32>
    %c5_50 = arith.constant 5 : index
    %c0_51 = arith.constant 0 : index
    %c0_52 = arith.constant 0 : index
    %82 = vector.load %arg5[%c5_50, %c0_51, %c0_52] : memref<12x1x16xf32, #tpu.memory_space<vmem>>, vector<1x1x16xf32>
    %83 = vector.shape_cast %82 : vector<1x1x16xf32> to vector<1x16xf32>
    %84 = vector.broadcast %83 : vector<1x16xf32> to vector<5x16xf32>
    %85 = arith.addf %81, %84 : vector<5x16xf32>
    %c9 = arith.constant 9 : index
    %c0_53 = arith.constant 0 : index
    %c0_54 = arith.constant 0 : index
    %86 = vector.load %arg4[%c9, %c0_53, %c0_54] : memref<12x32x16xf32, #tpu.memory_space<vmem>>, vector<1x32x16xf32>
    %87 = vector.shape_cast %86 : vector<1x32x16xf32> to vector<32x16xf32>
    %cst_55 = arith.constant dense<0.000000e+00> : vector<5x16xf32>
    %88 = tpu.matmul %31, %87, %cst_55 {dimension_numbers = #tpu.dot_dimension_numbers<[1], [0], [0], [1], [0, 0, 1, 1], [], []>} : vector<5x32xf32>, vector<32x16xf32>, vector<5x16xf32> -> vector<5x16xf32>
    %c9_56 = arith.constant 9 : index
    %c0_57 = arith.constant 0 : index
    %c0_58 = arith.constant 0 : index
    %89 = vector.load %arg5[%c9_56, %c0_57, %c0_58] : memref<12x1x16xf32, #tpu.memory_space<vmem>>, vector<1x1x16xf32>
    %90 = vector.shape_cast %89 : vector<1x1x16xf32> to vector<1x16xf32>
    %91 = vector.broadcast %90 : vector<1x16xf32> to vector<5x16xf32>
    %92 = arith.addf %88, %91 : vector<5x16xf32>
    %cst_59 = arith.constant dense<0.000000e+00> : vector<5x5xf32>
    %93 = tpu.matmul %78, %85, %cst_59 {dimension_numbers = #tpu.dot_dimension_numbers<[1], [1], [0], [0], [0, 0, 1, 0], [], []>} : vector<5x16xf32>, vector<5x16xf32>, vector<5x5xf32> -> vector<5x5xf32>
    %cst_60 = arith.constant dense<0xFF800000> : vector<5xf32>
    %94 = vector.multi_reduction <maximumf>, %93, %cst_60 [1] : vector<5x5xf32> to vector<5xf32>
    %95 = vector.shape_cast %94 : vector<5xf32> to vector<5x1xf32>
    %96 = vector.broadcast %95 : vector<5x1xf32> to vector<5x5xf32>
    %97 = arith.subf %93, %96 : vector<5x5xf32>
    %98 = math.exp %97 : vector<5x5xf32>
    %cst_61 = arith.constant dense<0.000000e+00> : vector<5xf32>
    %99 = vector.multi_reduction <add>, %98, %cst_61 [1] : vector<5x5xf32> to vector<5xf32>
    %100 = vector.shape_cast %99 : vector<5xf32> to vector<5x1xf32>
    %101 = vector.broadcast %100 : vector<5x1xf32> to vector<5x5xf32>
    %102 = arith.divf %98, %101 : vector<5x5xf32>
    %cst_62 = arith.constant dense<0.000000e+00> : vector<5x16xf32>
    %103 = tpu.matmul %102, %92, %cst_62 {dimension_numbers = #tpu.dot_dimension_numbers<[1], [0], [0], [1], [0, 0, 1, 1], [], []>} : vector<5x5xf32>, vector<5x16xf32>, vector<5x16xf32> -> vector<5x16xf32>
    %c1_63 = arith.constant 1 : index
    %c0_64 = arith.constant 0 : index
    %c0_65 = arith.constant 0 : index
    %104 = vector.load %arg6[%c1_63, %c0_64, %c0_65] : memref<4x16x32xf32, #tpu.memory_space<vmem>>, vector<1x16x32xf32>
    %105 = vector.shape_cast %104 : vector<1x16x32xf32> to vector<16x32xf32>
    %cst_66 = arith.constant dense<0.000000e+00> : vector<5x32xf32>
    %106 = tpu.matmul %103, %105, %cst_66 {dimension_numbers = #tpu.dot_dimension_numbers<[1], [0], [0], [1], [0, 0, 1, 1], [], []>} : vector<5x16xf32>, vector<16x32xf32>, vector<5x32xf32> -> vector<5x32xf32>
    %107 = arith.addf %71, %106 : vector<5x32xf32>
    %108 = arith.addf %13, %107 : vector<5x32xf32>
    %cst_67 = arith.constant dense<0.000000e+00> : vector<5xf32>
    %109 = vector.multi_reduction <add>, %108, %cst_67 [1] : vector<5x32xf32> to vector<5xf32>
    %110 = vector.shape_cast %109 : vector<5xf32> to vector<5x1xf32>
    %cst_68 = arith.constant 3.200000e+01 : f32
    %111 = vector.broadcast %cst_68 : f32 to vector<5x1xf32>
    %112 = arith.divf %110, %111 : vector<5x1xf32>
    %113 = vector.broadcast %112 : vector<5x1xf32> to vector<5x32xf32>
    %114 = arith.subf %108, %113 : vector<5x32xf32>
    %115 = arith.mulf %114, %114 : vector<5x32xf32>
    %cst_69 = arith.constant dense<0.000000e+00> : vector<5xf32>
    %116 = vector.multi_reduction <add>, %115, %cst_69 [1] : vector<5x32xf32> to vector<5xf32>
    %117 = vector.shape_cast %116 : vector<5xf32> to vector<5x1xf32>
    %cst_70 = arith.constant 3.200000e+01 : f32
    %118 = vector.broadcast %cst_70 : f32 to vector<5x1xf32>
    %119 = arith.divf %117, %118 : vector<5x1xf32>
    %120 = vector.broadcast %112 : vector<5x1xf32> to vector<5x32xf32>
    %121 = arith.subf %108, %120 : vector<5x32xf32>
    %cst_71 = arith.constant 9.99999997E-7 : f32
    %122 = vector.broadcast %cst_71 : f32 to vector<5x1xf32>
    %123 = arith.addf %119, %122 : vector<5x1xf32>
    %124 = math.rsqrt %123 : vector<5x1xf32>
    %125 = vector.broadcast %124 : vector<5x1xf32> to vector<5x32xf32>
    %126 = arith.mulf %121, %125 : vector<5x32xf32>
    %c0_72 = arith.constant 0 : index
    %c0_73 = arith.constant 0 : index
    %c0_74 = arith.constant 0 : index
    %127 = vector.load %arg7[%c0_72, %c0_73, %c0_74] : memref<2x32x64xf32, #tpu.memory_space<vmem>>, vector<1x32x64xf32>
    %128 = vector.shape_cast %127 : vector<1x32x64xf32> to vector<32x64xf32>
    %cst_75 = arith.constant dense<0.000000e+00> : vector<5x64xf32>
    %129 = tpu.matmul %126, %128, %cst_75 {dimension_numbers = #tpu.dot_dimension_numbers<[1], [0], [0], [1], [0, 0, 1, 1], [], []>} : vector<5x32xf32>, vector<32x64xf32>, vector<5x64xf32> -> vector<5x64xf32>
    %c0_76 = arith.constant 0 : index
    %c0_77 = arith.constant 0 : index
    %c0_78 = arith.constant 0 : index
    %130 = vector.load %arg8[%c0_76, %c0_77, %c0_78] : memref<2x1x64xf32, #tpu.memory_space<vmem>>, vector<1x1x64xf32>
    %131 = vector.shape_cast %130 : vector<1x1x64xf32> to vector<1x64xf32>
    %132 = vector.broadcast %131 : vector<1x64xf32> to vector<5x64xf32>
    %133 = arith.addf %129, %132 : vector<5x64xf32>
    %cst_79 = arith.constant 5.000000e-01 : f32
    %134 = vector.broadcast %cst_79 : f32 to vector<5x64xf32>
    %135 = arith.mulf %134, %133 : vector<5x64xf32>
    %cst_80 = arith.constant 0.707106769 : f32
    %136 = vector.broadcast %cst_80 : f32 to vector<5x64xf32>
    %137 = arith.mulf %133, %136 : vector<5x64xf32>
    %138 = math.erf %137 : vector<5x64xf32>
    %cst_81 = arith.constant 1.000000e+00 : f32
    %139 = vector.broadcast %cst_81 : f32 to vector<5x64xf32>
    %140 = arith.addf %139, %138 : vector<5x64xf32>
    %141 = arith.mulf %135, %140 : vector<5x64xf32>
    %c0_82 = arith.constant 0 : index
    %c0_83 = arith.constant 0 : index
    %c0_84 = arith.constant 0 : index
    %142 = vector.load %arg9[%c0_82, %c0_83, %c0_84] : memref<2x64x32xf32, #tpu.memory_space<vmem>>, vector<1x64x32xf32>
    %143 = vector.shape_cast %142 : vector<1x64x32xf32> to vector<64x32xf32>
    %cst_85 = arith.constant dense<0.000000e+00> : vector<5x32xf32>
    %144 = tpu.matmul %141, %143, %cst_85 {dimension_numbers = #tpu.dot_dimension_numbers<[1], [0], [0], [1], [0, 0, 1, 1], [], []>} : vector<5x64xf32>, vector<64x32xf32>, vector<5x32xf32> -> vector<5x32xf32>
    %145 = vector.extract_strided_slice %33 {offsets = [1, 0], sizes = [1, 32], strides = [1, 1]} : vector<2x32xf32> to vector<1x32xf32>
    %146 = vector.broadcast %145 : vector<1x32xf32> to vector<5x32xf32>
    %147 = arith.addf %144, %146 : vector<5x32xf32>
    %148 = arith.addf %108, %147 : vector<5x32xf32>
    %cst_86 = arith.constant dense<0.000000e+00> : vector<5xf32>
    %149 = vector.multi_reduction <add>, %148, %cst_86 [1] : vector<5x32xf32> to vector<5xf32>
    %150 = vector.shape_cast %149 : vector<5xf32> to vector<5x1xf32>
    %cst_87 = arith.constant 3.200000e+01 : f32
    %151 = vector.broadcast %cst_87 : f32 to vector<5x1xf32>
    %152 = arith.divf %150, %151 : vector<5x1xf32>
    %153 = vector.broadcast %152 : vector<5x1xf32> to vector<5x32xf32>
    %154 = arith.subf %148, %153 : vector<5x32xf32>
    %155 = arith.mulf %154, %154 : vector<5x32xf32>
    %cst_88 = arith.constant dense<0.000000e+00> : vector<5xf32>
    %156 = vector.multi_reduction <add>, %155, %cst_88 [1] : vector<5x32xf32> to vector<5xf32>
    %157 = vector.shape_cast %156 : vector<5xf32> to vector<5x1xf32>
    %cst_89 = arith.constant 3.200000e+01 : f32
    %158 = vector.broadcast %cst_89 : f32 to vector<5x1xf32>
    %159 = arith.divf %157, %158 : vector<5x1xf32>
    %160 = vector.broadcast %152 : vector<5x1xf32> to vector<5x32xf32>
    %161 = arith.subf %148, %160 : vector<5x32xf32>
    %cst_90 = arith.constant 9.99999997E-7 : f32
    %162 = vector.broadcast %cst_90 : f32 to vector<5x1xf32>
    %163 = arith.addf %159, %162 : vector<5x1xf32>
    %164 = math.rsqrt %163 : vector<5x1xf32>
    %165 = vector.broadcast %164 : vector<5x1xf32> to vector<5x32xf32>
    %166 = arith.mulf %161, %165 : vector<5x32xf32>
    %c1_91 = arith.constant 1 : index
    %c0_92 = arith.constant 0 : index
    %c0_93 = arith.constant 0 : index
    %167 = vector.load %arg10[%c1_91, %c0_92, %c0_93] : memref<2x2x32xf32, #tpu.memory_space<vmem>>, vector<1x2x32xf32>
    %168 = vector.shape_cast %167 : vector<1x2x32xf32> to vector<2x32xf32>
    %169 = vector.extract_strided_slice %168 {offsets = [0, 0], sizes = [1, 32], strides = [1, 1]} : vector<2x32xf32> to vector<1x32xf32>
    %c2 = arith.constant 2 : index
    %c0_94 = arith.constant 0 : index
    %c0_95 = arith.constant 0 : index
    %170 = vector.load %arg4[%c2, %c0_94, %c0_95] : memref<12x32x16xf32, #tpu.memory_space<vmem>>, vector<1x32x16xf32>
    %171 = vector.shape_cast %170 : vector<1x32x16xf32> to vector<32x16xf32>
    %cst_96 = arith.constant dense<0.000000e+00> : vector<5x16xf32>
    %172 = tpu.matmul %166, %171, %cst_96 {dimension_numbers = #tpu.dot_dimension_numbers<[1], [0], [0], [1], [0, 0, 1, 1], [], []>} : vector<5x32xf32>, vector<32x16xf32>, vector<5x16xf32> -> vector<5x16xf32>
    %c2_97 = arith.constant 2 : index
    %c0_98 = arith.constant 0 : index
    %c0_99 = arith.constant 0 : index
    %173 = vector.load %arg5[%c2_97, %c0_98, %c0_99] : memref<12x1x16xf32, #tpu.memory_space<vmem>>, vector<1x1x16xf32>
    %174 = vector.shape_cast %173 : vector<1x1x16xf32> to vector<1x16xf32>
    %175 = vector.broadcast %174 : vector<1x16xf32> to vector<5x16xf32>
    %176 = arith.addf %172, %175 : vector<5x16xf32>
    %c6 = arith.constant 6 : index
    %c0_100 = arith.constant 0 : index
    %c0_101 = arith.constant 0 : index
    %177 = vector.load %arg4[%c6, %c0_100, %c0_101] : memref<12x32x16xf32, #tpu.memory_space<vmem>>, vector<1x32x16xf32>
    %178 = vector.shape_cast %177 : vector<1x32x16xf32> to vector<32x16xf32>
    %cst_102 = arith.constant dense<0.000000e+00> : vector<5x16xf32>
    %179 = tpu.matmul %166, %178, %cst_102 {dimension_numbers = #tpu.dot_dimension_numbers<[1], [0], [0], [1], [0, 0, 1, 1], [], []>} : vector<5x32xf32>, vector<32x16xf32>, vector<5x16xf32> -> vector<5x16xf32>
    %c6_103 = arith.constant 6 : index
    %c0_104 = arith.constant 0 : index
    %c0_105 = arith.constant 0 : index
    %180 = vector.load %arg5[%c6_103, %c0_104, %c0_105] : memref<12x1x16xf32, #tpu.memory_space<vmem>>, vector<1x1x16xf32>
    %181 = vector.shape_cast %180 : vector<1x1x16xf32> to vector<1x16xf32>
    %182 = vector.broadcast %181 : vector<1x16xf32> to vector<5x16xf32>
    %183 = arith.addf %179, %182 : vector<5x16xf32>
    %c10 = arith.constant 10 : index
    %c0_106 = arith.constant 0 : index
    %c0_107 = arith.constant 0 : index
    %184 = vector.load %arg4[%c10, %c0_106, %c0_107] : memref<12x32x16xf32, #tpu.memory_space<vmem>>, vector<1x32x16xf32>
    %185 = vector.shape_cast %184 : vector<1x32x16xf32> to vector<32x16xf32>
    %cst_108 = arith.constant dense<0.000000e+00> : vector<5x16xf32>
    %186 = tpu.matmul %166, %185, %cst_108 {dimension_numbers = #tpu.dot_dimension_numbers<[1], [0], [0], [1], [0, 0, 1, 1], [], []>} : vector<5x32xf32>, vector<32x16xf32>, vector<5x16xf32> -> vector<5x16xf32>
    %c10_109 = arith.constant 10 : index
    %c0_110 = arith.constant 0 : index
    %c0_111 = arith.constant 0 : index
    %187 = vector.load %arg5[%c10_109, %c0_110, %c0_111] : memref<12x1x16xf32, #tpu.memory_space<vmem>>, vector<1x1x16xf32>
    %188 = vector.shape_cast %187 : vector<1x1x16xf32> to vector<1x16xf32>
    %189 = vector.broadcast %188 : vector<1x16xf32> to vector<5x16xf32>
    %190 = arith.addf %186, %189 : vector<5x16xf32>
    %cst_112 = arith.constant dense<0.000000e+00> : vector<5x5xf32>
    %191 = tpu.matmul %176, %183, %cst_112 {dimension_numbers = #tpu.dot_dimension_numbers<[1], [1], [0], [0], [0, 0, 1, 0], [], []>} : vector<5x16xf32>, vector<5x16xf32>, vector<5x5xf32> -> vector<5x5xf32>
    %cst_113 = arith.constant dense<0xFF800000> : vector<5xf32>
    %192 = vector.multi_reduction <maximumf>, %191, %cst_113 [1] : vector<5x5xf32> to vector<5xf32>
    %193 = vector.shape_cast %192 : vector<5xf32> to vector<5x1xf32>
    %194 = vector.broadcast %193 : vector<5x1xf32> to vector<5x5xf32>
    %195 = arith.subf %191, %194 : vector<5x5xf32>
    %196 = math.exp %195 : vector<5x5xf32>
    %cst_114 = arith.constant dense<0.000000e+00> : vector<5xf32>
    %197 = vector.multi_reduction <add>, %196, %cst_114 [1] : vector<5x5xf32> to vector<5xf32>
    %198 = vector.shape_cast %197 : vector<5xf32> to vector<5x1xf32>
    %199 = vector.broadcast %198 : vector<5x1xf32> to vector<5x5xf32>
    %200 = arith.divf %196, %199 : vector<5x5xf32>
    %cst_115 = arith.constant dense<0.000000e+00> : vector<5x16xf32>
    %201 = tpu.matmul %200, %190, %cst_115 {dimension_numbers = #tpu.dot_dimension_numbers<[1], [0], [0], [1], [0, 0, 1, 1], [], []>} : vector<5x5xf32>, vector<5x16xf32>, vector<5x16xf32> -> vector<5x16xf32>
    %c2_116 = arith.constant 2 : index
    %c0_117 = arith.constant 0 : index
    %c0_118 = arith.constant 0 : index
    %202 = vector.load %arg6[%c2_116, %c0_117, %c0_118] : memref<4x16x32xf32, #tpu.memory_space<vmem>>, vector<1x16x32xf32>
    %203 = vector.shape_cast %202 : vector<1x16x32xf32> to vector<16x32xf32>
    %cst_119 = arith.constant dense<0.000000e+00> : vector<5x32xf32>
    %204 = tpu.matmul %201, %203, %cst_119 {dimension_numbers = #tpu.dot_dimension_numbers<[1], [0], [0], [1], [0, 0, 1, 1], [], []>} : vector<5x16xf32>, vector<16x32xf32>, vector<5x32xf32> -> vector<5x32xf32>
    %205 = vector.broadcast %169 : vector<1x32xf32> to vector<5x32xf32>
    %206 = arith.addf %205, %204 : vector<5x32xf32>
    %c3 = arith.constant 3 : index
    %c0_120 = arith.constant 0 : index
    %c0_121 = arith.constant 0 : index
    %207 = vector.load %arg4[%c3, %c0_120, %c0_121] : memref<12x32x16xf32, #tpu.memory_space<vmem>>, vector<1x32x16xf32>
    %208 = vector.shape_cast %207 : vector<1x32x16xf32> to vector<32x16xf32>
    %cst_122 = arith.constant dense<0.000000e+00> : vector<5x16xf32>
    %209 = tpu.matmul %166, %208, %cst_122 {dimension_numbers = #tpu.dot_dimension_numbers<[1], [0], [0], [1], [0, 0, 1, 1], [], []>} : vector<5x32xf32>, vector<32x16xf32>, vector<5x16xf32> -> vector<5x16xf32>
    %c3_123 = arith.constant 3 : index
    %c0_124 = arith.constant 0 : index
    %c0_125 = arith.constant 0 : index
    %210 = vector.load %arg5[%c3_123, %c0_124, %c0_125] : memref<12x1x16xf32, #tpu.memory_space<vmem>>, vector<1x1x16xf32>
    %211 = vector.shape_cast %210 : vector<1x1x16xf32> to vector<1x16xf32>
    %212 = vector.broadcast %211 : vector<1x16xf32> to vector<5x16xf32>
    %213 = arith.addf %209, %212 : vector<5x16xf32>
    %c7 = arith.constant 7 : index
    %c0_126 = arith.constant 0 : index
    %c0_127 = arith.constant 0 : index
    %214 = vector.load %arg4[%c7, %c0_126, %c0_127] : memref<12x32x16xf32, #tpu.memory_space<vmem>>, vector<1x32x16xf32>
    %215 = vector.shape_cast %214 : vector<1x32x16xf32> to vector<32x16xf32>
    %cst_128 = arith.constant dense<0.000000e+00> : vector<5x16xf32>
    %216 = tpu.matmul %166, %215, %cst_128 {dimension_numbers = #tpu.dot_dimension_numbers<[1], [0], [0], [1], [0, 0, 1, 1], [], []>} : vector<5x32xf32>, vector<32x16xf32>, vector<5x16xf32> -> vector<5x16xf32>
    %c7_129 = arith.constant 7 : index
    %c0_130 = arith.constant 0 : index
    %c0_131 = arith.constant 0 : index
    %217 = vector.load %arg5[%c7_129, %c0_130, %c0_131] : memref<12x1x16xf32, #tpu.memory_space<vmem>>, vector<1x1x16xf32>
    %218 = vector.shape_cast %217 : vector<1x1x16xf32> to vector<1x16xf32>
    %219 = vector.broadcast %218 : vector<1x16xf32> to vector<5x16xf32>
    %220 = arith.addf %216, %219 : vector<5x16xf32>
    %c11 = arith.constant 11 : index
    %c0_132 = arith.constant 0 : index
    %c0_133 = arith.constant 0 : index
    %221 = vector.load %arg4[%c11, %c0_132, %c0_133] : memref<12x32x16xf32, #tpu.memory_space<vmem>>, vector<1x32x16xf32>
    %222 = vector.shape_cast %221 : vector<1x32x16xf32> to vector<32x16xf32>
    %cst_134 = arith.constant dense<0.000000e+00> : vector<5x16xf32>
    %223 = tpu.matmul %166, %222, %cst_134 {dimension_numbers = #tpu.dot_dimension_numbers<[1], [0], [0], [1], [0, 0, 1, 1], [], []>} : vector<5x32xf32>, vector<32x16xf32>, vector<5x16xf32> -> vector<5x16xf32>
    %c11_135 = arith.constant 11 : index
    %c0_136 = arith.constant 0 : index
    %c0_137 = arith.constant 0 : index
    %224 = vector.load %arg5[%c11_135, %c0_136, %c0_137] : memref<12x1x16xf32, #tpu.memory_space<vmem>>, vector<1x1x16xf32>
    %225 = vector.shape_cast %224 : vector<1x1x16xf32> to vector<1x16xf32>
    %226 = vector.broadcast %225 : vector<1x16xf32> to vector<5x16xf32>
    %227 = arith.addf %223, %226 : vector<5x16xf32>
    %cst_138 = arith.constant dense<0.000000e+00> : vector<5x5xf32>
    %228 = tpu.matmul %213, %220, %cst_138 {dimension_numbers = #tpu.dot_dimension_numbers<[1], [1], [0], [0], [0, 0, 1, 0], [], []>} : vector<5x16xf32>, vector<5x16xf32>, vector<5x5xf32> -> vector<5x5xf32>
    %cst_139 = arith.constant dense<0xFF800000> : vector<5xf32>
    %229 = vector.multi_reduction <maximumf>, %228, %cst_139 [1] : vector<5x5xf32> to vector<5xf32>
    %230 = vector.shape_cast %229 : vector<5xf32> to vector<5x1xf32>
    %231 = vector.broadcast %230 : vector<5x1xf32> to vector<5x5xf32>
    %232 = arith.subf %228, %231 : vector<5x5xf32>
    %233 = math.exp %232 : vector<5x5xf32>
    %cst_140 = arith.constant dense<0.000000e+00> : vector<5xf32>
    %234 = vector.multi_reduction <add>, %233, %cst_140 [1] : vector<5x5xf32> to vector<5xf32>
    %235 = vector.shape_cast %234 : vector<5xf32> to vector<5x1xf32>
    %236 = vector.broadcast %235 : vector<5x1xf32> to vector<5x5xf32>
    %237 = arith.divf %233, %236 : vector<5x5xf32>
    %cst_141 = arith.constant dense<0.000000e+00> : vector<5x16xf32>
    %238 = tpu.matmul %237, %227, %cst_141 {dimension_numbers = #tpu.dot_dimension_numbers<[1], [0], [0], [1], [0, 0, 1, 1], [], []>} : vector<5x5xf32>, vector<5x16xf32>, vector<5x16xf32> -> vector<5x16xf32>
    %c3_142 = arith.constant 3 : index
    %c0_143 = arith.constant 0 : index
    %c0_144 = arith.constant 0 : index
    %239 = vector.load %arg6[%c3_142, %c0_143, %c0_144] : memref<4x16x32xf32, #tpu.memory_space<vmem>>, vector<1x16x32xf32>
    %240 = vector.shape_cast %239 : vector<1x16x32xf32> to vector<16x32xf32>
    %cst_145 = arith.constant dense<0.000000e+00> : vector<5x32xf32>
    %241 = tpu.matmul %238, %240, %cst_145 {dimension_numbers = #tpu.dot_dimension_numbers<[1], [0], [0], [1], [0, 0, 1, 1], [], []>} : vector<5x16xf32>, vector<16x32xf32>, vector<5x32xf32> -> vector<5x32xf32>
    %242 = arith.addf %206, %241 : vector<5x32xf32>
    %243 = arith.addf %148, %242 : vector<5x32xf32>
    %cst_146 = arith.constant dense<0.000000e+00> : vector<5xf32>
    %244 = vector.multi_reduction <add>, %243, %cst_146 [1] : vector<5x32xf32> to vector<5xf32>
    %245 = vector.shape_cast %244 : vector<5xf32> to vector<5x1xf32>
    %cst_147 = arith.constant 3.200000e+01 : f32
    %246 = vector.broadcast %cst_147 : f32 to vector<5x1xf32>
    %247 = arith.divf %245, %246 : vector<5x1xf32>
    %248 = vector.broadcast %247 : vector<5x1xf32> to vector<5x32xf32>
    %249 = arith.subf %243, %248 : vector<5x32xf32>
    %250 = arith.mulf %249, %249 : vector<5x32xf32>
    %cst_148 = arith.constant dense<0.000000e+00> : vector<5xf32>
    %251 = vector.multi_reduction <add>, %250, %cst_148 [1] : vector<5x32xf32> to vector<5xf32>
    %252 = vector.shape_cast %251 : vector<5xf32> to vector<5x1xf32>
    %cst_149 = arith.constant 3.200000e+01 : f32
    %253 = vector.broadcast %cst_149 : f32 to vector<5x1xf32>
    %254 = arith.divf %252, %253 : vector<5x1xf32>
    %255 = vector.broadcast %247 : vector<5x1xf32> to vector<5x32xf32>
    %256 = arith.subf %243, %255 : vector<5x32xf32>
    %cst_150 = arith.constant 9.99999997E-7 : f32
    %257 = vector.broadcast %cst_150 : f32 to vector<5x1xf32>
    %258 = arith.addf %254, %257 : vector<5x1xf32>
    %259 = math.rsqrt %258 : vector<5x1xf32>
    %260 = vector.broadcast %259 : vector<5x1xf32> to vector<5x32xf32>
    %261 = arith.mulf %256, %260 : vector<5x32xf32>
    %c1_151 = arith.constant 1 : index
    %c0_152 = arith.constant 0 : index
    %c0_153 = arith.constant 0 : index
    %262 = vector.load %arg7[%c1_151, %c0_152, %c0_153] : memref<2x32x64xf32, #tpu.memory_space<vmem>>, vector<1x32x64xf32>
    %263 = vector.shape_cast %262 : vector<1x32x64xf32> to vector<32x64xf32>
    %cst_154 = arith.constant dense<0.000000e+00> : vector<5x64xf32>
    %264 = tpu.matmul %261, %263, %cst_154 {dimension_numbers = #tpu.dot_dimension_numbers<[1], [0], [0], [1], [0, 0, 1, 1], [], []>} : vector<5x32xf32>, vector<32x64xf32>, vector<5x64xf32> -> vector<5x64xf32>
    %c1_155 = arith.constant 1 : index
    %c0_156 = arith.constant 0 : index
    %c0_157 = arith.constant 0 : index
    %265 = vector.load %arg8[%c1_155, %c0_156, %c0_157] : memref<2x1x64xf32, #tpu.memory_space<vmem>>, vector<1x1x64xf32>
    %266 = vector.shape_cast %265 : vector<1x1x64xf32> to vector<1x64xf32>
    %267 = vector.broadcast %266 : vector<1x64xf32> to vector<5x64xf32>
    %268 = arith.addf %264, %267 : vector<5x64xf32>
    %cst_158 = arith.constant 5.000000e-01 : f32
    %269 = vector.broadcast %cst_158 : f32 to vector<5x64xf32>
    %270 = arith.mulf %269, %268 : vector<5x64xf32>
    %cst_159 = arith.constant 0.707106769 : f32
    %271 = vector.broadcast %cst_159 : f32 to vector<5x64xf32>
    %272 = arith.mulf %268, %271 : vector<5x64xf32>
    %273 = math.erf %272 : vector<5x64xf32>
    %cst_160 = arith.constant 1.000000e+00 : f32
    %274 = vector.broadcast %cst_160 : f32 to vector<5x64xf32>
    %275 = arith.addf %274, %273 : vector<5x64xf32>
    %276 = arith.mulf %270, %275 : vector<5x64xf32>
    %c1_161 = arith.constant 1 : index
    %c0_162 = arith.constant 0 : index
    %c0_163 = arith.constant 0 : index
    %277 = vector.load %arg9[%c1_161, %c0_162, %c0_163] : memref<2x64x32xf32, #tpu.memory_space<vmem>>, vector<1x64x32xf32>
    %278 = vector.shape_cast %277 : vector<1x64x32xf32> to vector<64x32xf32>
    %cst_164 = arith.constant dense<0.000000e+00> : vector<5x32xf32>
    %279 = tpu.matmul %276, %278, %cst_164 {dimension_numbers = #tpu.dot_dimension_numbers<[1], [0], [0], [1], [0, 0, 1, 1], [], []>} : vector<5x64xf32>, vector<64x32xf32>, vector<5x32xf32> -> vector<5x32xf32>
    %280 = vector.extract_strided_slice %168 {offsets = [1, 0], sizes = [1, 32], strides = [1, 1]} : vector<2x32xf32> to vector<1x32xf32>
    %281 = vector.broadcast %280 : vector<1x32xf32> to vector<5x32xf32>
    %282 = arith.addf %279, %281 : vector<5x32xf32>
    %283 = arith.addf %243, %282 : vector<5x32xf32>
    %cst_165 = arith.constant dense<0.000000e+00> : vector<5xf32>
    %284 = vector.multi_reduction <add>, %283, %cst_165 [1] : vector<5x32xf32> to vector<5xf32>
    %285 = vector.shape_cast %284 : vector<5xf32> to vector<5x1xf32>
    %cst_166 = arith.constant 3.200000e+01 : f32
    %286 = vector.broadcast %cst_166 : f32 to vector<5x1xf32>
    %287 = arith.divf %285, %286 : vector<5x1xf32>
    %288 = vector.broadcast %287 : vector<5x1xf32> to vector<5x32xf32>
    %289 = arith.subf %283, %288 : vector<5x32xf32>
    %290 = arith.mulf %289, %289 : vector<5x32xf32>
    %cst_167 = arith.constant dense<0.000000e+00> : vector<5xf32>
    %291 = vector.multi_reduction <add>, %290, %cst_167 [1] : vector<5x32xf32> to vector<5xf32>
    %292 = vector.shape_cast %291 : vector<5xf32> to vector<5x1xf32>
    %cst_168 = arith.constant 3.200000e+01 : f32
    %293 = vector.broadcast %cst_168 : f32 to vector<5x1xf32>
    %294 = arith.divf %292, %293 : vector<5x1xf32>
    %295 = vector.broadcast %287 : vector<5x1xf32> to vector<5x32xf32>
    %296 = arith.subf %283, %295 : vector<5x32xf32>
    %cst_169 = arith.constant 9.99999997E-7 : f32
    %297 = vector.broadcast %cst_169 : f32 to vector<5x1xf32>
    %298 = arith.addf %294, %297 : vector<5x1xf32>
    %299 = math.rsqrt %298 : vector<5x1xf32>
    %300 = vector.broadcast %299 : vector<5x1xf32> to vector<5x32xf32>
    %301 = arith.mulf %296, %300 : vector<5x32xf32>
    %302 = vector.broadcast %3 : vector<1x32xf32> to vector<5x32xf32>
    %303 = arith.mulf %301, %302 : vector<5x32xf32>
    %304 = vector.broadcast %4 : vector<1x32xf32> to vector<5x32xf32>
    %305 = arith.addf %303, %304 : vector<5x32xf32>
    %c1_170 = arith.constant 1 : index
    %c0_171 = arith.constant 0 : index
    %c0_172 = arith.constant 0 : index
    %306 = vector.load %arg1[%c1_170, %c0_171, %c0_172] : memref<2x4x192xf32, #tpu.memory_space<vmem>>, vector<1x4x192xf32>
    %307 = vector.shape_cast %306 : vector<1x4x192xf32> to vector<4x192xf32>
    %cst_173 = arith.constant dense<0.000000e+00> : vector<4x32xf32>
    %308 = tpu.matmul %307, %6, %cst_173 {dimension_numbers = #tpu.dot_dimension_numbers<[1], [0], [0], [1], [0, 0, 1, 1], [], []>} : vector<4x192xf32>, vector<192x32xf32>, vector<4x32xf32> -> vector<4x32xf32>
    %309 = vector.broadcast %1 : vector<1x32xf32> to vector<4x32xf32>
    %310 = arith.addf %308, %309 : vector<4x32xf32>
    %311 = tpu.concatenate %2, %310 in 0 : vector<1x32xf32>, vector<4x32xf32> -> vector<5x32xf32>
    %312 = arith.addf %311, %5 : vector<5x32xf32>
    %cst_174 = arith.constant dense<0.000000e+00> : vector<5xf32>
    %313 = vector.multi_reduction <add>, %312, %cst_174 [1] : vector<5x32xf32> to vector<5xf32>
    %314 = vector.shape_cast %313 : vector<5xf32> to vector<5x1xf32>
    %cst_175 = arith.constant 3.200000e+01 : f32
    %315 = vector.broadcast %cst_175 : f32 to vector<5x1xf32>
    %316 = arith.divf %314, %315 : vector<5x1xf32>
    %317 = vector.broadcast %316 : vector<5x1xf32> to vector<5x32xf32>
    %318 = arith.subf %312, %317 : vector<5x32xf32>
    %319 = arith.mulf %318, %318 : vector<5x32xf32>
    %cst_176 = arith.constant dense<0.000000e+00> : vector<5xf32>
    %320 = vector.multi_reduction <add>, %319, %cst_176 [1] : vector<5x32xf32> to vector<5xf32>
    %321 = vector.shape_cast %320 : vector<5xf32> to vector<5x1xf32>
    %cst_177 = arith.constant 3.200000e+01 : f32
    %322 = vector.broadcast %cst_177 : f32 to vector<5x1xf32>
    %323 = arith.divf %321, %322 : vector<5x1xf32>
    %324 = vector.broadcast %316 : vector<5x1xf32> to vector<5x32xf32>
    %325 = arith.subf %312, %324 : vector<5x32xf32>
    %cst_178 = arith.constant 9.99999997E-7 : f32
    %326 = vector.broadcast %cst_178 : f32 to vector<5x1xf32>
    %327 = arith.addf %323, %326 : vector<5x1xf32>
    %328 = math.rsqrt %327 : vector<5x1xf32>
    %329 = vector.broadcast %328 : vector<5x1xf32> to vector<5x32xf32>
    %330 = arith.mulf %325, %329 : vector<5x32xf32>
    %c0_179 = arith.constant 0 : index
    %c0_180 = arith.constant 0 : index
    %c0_181 = arith.constant 0 : index
    %331 = vector.load %arg10[%c0_179, %c0_180, %c0_181] : memref<2x2x32xf32, #tpu.memory_space<vmem>>, vector<1x2x32xf32>
    %332 = vector.shape_cast %331 : vector<1x2x32xf32> to vector<2x32xf32>
    %333 = vector.extract_strided_slice %332 {offsets = [0, 0], sizes = [1, 32], strides = [1, 1]} : vector<2x32xf32> to vector<1x32xf32>
    %c0_182 = arith.constant 0 : index
    %c0_183 = arith.constant 0 : index
    %c0_184 = arith.constant 0 : index
    %334 = vector.load %arg4[%c0_182, %c0_183, %c0_184] : memref<12x32x16xf32, #tpu.memory_space<vmem>>, vector<1x32x16xf32>
    %335 = vector.shape_cast %334 : vector<1x32x16xf32> to vector<32x16xf32>
    %cst_185 = arith.constant dense<0.000000e+00> : vector<5x16xf32>
    %336 = tpu.matmul %330, %335, %cst_185 {dimension_numbers = #tpu.dot_dimension_numbers<[1], [0], [0], [1], [0, 0, 1, 1], [], []>} : vector<5x32xf32>, vector<32x16xf32>, vector<5x16xf32> -> vector<5x16xf32>
    %c0_186 = arith.constant 0 : index
    %c0_187 = arith.constant 0 : index
    %c0_188 = arith.constant 0 : index
    %337 = vector.load %arg5[%c0_186, %c0_187, %c0_188] : memref<12x1x16xf32, #tpu.memory_space<vmem>>, vector<1x1x16xf32>
    %338 = vector.shape_cast %337 : vector<1x1x16xf32> to vector<1x16xf32>
    %339 = vector.broadcast %338 : vector<1x16xf32> to vector<5x16xf32>
    %340 = arith.addf %336, %339 : vector<5x16xf32>
    %c4_189 = arith.constant 4 : index
    %c0_190 = arith.constant 0 : index
    %c0_191 = arith.constant 0 : index
    %341 = vector.load %arg4[%c4_189, %c0_190, %c0_191] : memref<12x32x16xf32, #tpu.memory_space<vmem>>, vector<1x32x16xf32>
    %342 = vector.shape_cast %341 : vector<1x32x16xf32> to vector<32x16xf32>
    %cst_192 = arith.constant dense<0.000000e+00> : vector<5x16xf32>
    %343 = tpu.matmul %330, %342, %cst_192 {dimension_numbers = #tpu.dot_dimension_numbers<[1], [0], [0], [1], [0, 0, 1, 1], [], []>} : vector<5x32xf32>, vector<32x16xf32>, vector<5x16xf32> -> vector<5x16xf32>
    %c4_193 = arith.constant 4 : index
    %c0_194 = arith.constant 0 : index
    %c0_195 = arith.constant 0 : index
    %344 = vector.load %arg5[%c4_193, %c0_194, %c0_195] : memref<12x1x16xf32, #tpu.memory_space<vmem>>, vector<1x1x16xf32>
    %345 = vector.shape_cast %344 : vector<1x1x16xf32> to vector<1x16xf32>
    %346 = vector.broadcast %345 : vector<1x16xf32> to vector<5x16xf32>
    %347 = arith.addf %343, %346 : vector<5x16xf32>
    %c8_196 = arith.constant 8 : index
    %c0_197 = arith.constant 0 : index
    %c0_198 = arith.constant 0 : index
    %348 = vector.load %arg4[%c8_196, %c0_197, %c0_198] : memref<12x32x16xf32, #tpu.memory_space<vmem>>, vector<1x32x16xf32>
    %349 = vector.shape_cast %348 : vector<1x32x16xf32> to vector<32x16xf32>
    %cst_199 = arith.constant dense<0.000000e+00> : vector<5x16xf32>
    %350 = tpu.matmul %330, %349, %cst_199 {dimension_numbers = #tpu.dot_dimension_numbers<[1], [0], [0], [1], [0, 0, 1, 1], [], []>} : vector<5x32xf32>, vector<32x16xf32>, vector<5x16xf32> -> vector<5x16xf32>
    %c8_200 = arith.constant 8 : index
    %c0_201 = arith.constant 0 : index
    %c0_202 = arith.constant 0 : index
    %351 = vector.load %arg5[%c8_200, %c0_201, %c0_202] : memref<12x1x16xf32, #tpu.memory_space<vmem>>, vector<1x1x16xf32>
    %352 = vector.shape_cast %351 : vector<1x1x16xf32> to vector<1x16xf32>
    %353 = vector.broadcast %352 : vector<1x16xf32> to vector<5x16xf32>
    %354 = arith.addf %350, %353 : vector<5x16xf32>
    %cst_203 = arith.constant dense<0.000000e+00> : vector<5x5xf32>
    %355 = tpu.matmul %340, %347, %cst_203 {dimension_numbers = #tpu.dot_dimension_numbers<[1], [1], [0], [0], [0, 0, 1, 0], [], []>} : vector<5x16xf32>, vector<5x16xf32>, vector<5x5xf32> -> vector<5x5xf32>
    %cst_204 = arith.constant dense<0xFF800000> : vector<5xf32>
    %356 = vector.multi_reduction <maximumf>, %355, %cst_204 [1] : vector<5x5xf32> to vector<5xf32>
    %357 = vector.shape_cast %356 : vector<5xf32> to vector<5x1xf32>
    %358 = vector.broadcast %357 : vector<5x1xf32> to vector<5x5xf32>
    %359 = arith.subf %355, %358 : vector<5x5xf32>
    %360 = math.exp %359 : vector<5x5xf32>
    %cst_205 = arith.constant dense<0.000000e+00> : vector<5xf32>
    %361 = vector.multi_reduction <add>, %360, %cst_205 [1] : vector<5x5xf32> to vector<5xf32>
    %362 = vector.shape_cast %361 : vector<5xf32> to vector<5x1xf32>
    %363 = vector.broadcast %362 : vector<5x1xf32> to vector<5x5xf32>
    %364 = arith.divf %360, %363 : vector<5x5xf32>
    %cst_206 = arith.constant dense<0.000000e+00> : vector<5x16xf32>
    %365 = tpu.matmul %364, %354, %cst_206 {dimension_numbers = #tpu.dot_dimension_numbers<[1], [0], [0], [1], [0, 0, 1, 1], [], []>} : vector<5x5xf32>, vector<5x16xf32>, vector<5x16xf32> -> vector<5x16xf32>
    %c0_207 = arith.constant 0 : index
    %c0_208 = arith.constant 0 : index
    %c0_209 = arith.constant 0 : index
    %366 = vector.load %arg6[%c0_207, %c0_208, %c0_209] : memref<4x16x32xf32, #tpu.memory_space<vmem>>, vector<1x16x32xf32>
    %367 = vector.shape_cast %366 : vector<1x16x32xf32> to vector<16x32xf32>
    %cst_210 = arith.constant dense<0.000000e+00> : vector<5x32xf32>
    %368 = tpu.matmul %365, %367, %cst_210 {dimension_numbers = #tpu.dot_dimension_numbers<[1], [0], [0], [1], [0, 0, 1, 1], [], []>} : vector<5x16xf32>, vector<16x32xf32>, vector<5x32xf32> -> vector<5x32xf32>
    %369 = vector.broadcast %333 : vector<1x32xf32> to vector<5x32xf32>
    %370 = arith.addf %369, %368 : vector<5x32xf32>
    %c1_211 = arith.constant 1 : index
    %c0_212 = arith.constant 0 : index
    %c0_213 = arith.constant 0 : index
    %371 = vector.load %arg4[%c1_211, %c0_212, %c0_213] : memref<12x32x16xf32, #tpu.memory_space<vmem>>, vector<1x32x16xf32>
    %372 = vector.shape_cast %371 : vector<1x32x16xf32> to vector<32x16xf32>
    %cst_214 = arith.constant dense<0.000000e+00> : vector<5x16xf32>
    %373 = tpu.matmul %330, %372, %cst_214 {dimension_numbers = #tpu.dot_dimension_numbers<[1], [0], [0], [1], [0, 0, 1, 1], [], []>} : vector<5x32xf32>, vector<32x16xf32>, vector<5x16xf32> -> vector<5x16xf32>
    %c1_215 = arith.constant 1 : index
    %c0_216 = arith.constant 0 : index
    %c0_217 = arith.constant 0 : index
    %374 = vector.load %arg5[%c1_215, %c0_216, %c0_217] : memref<12x1x16xf32, #tpu.memory_space<vmem>>, vector<1x1x16xf32>
    %375 = vector.shape_cast %374 : vector<1x1x16xf32> to vector<1x16xf32>
    %376 = vector.broadcast %375 : vector<1x16xf32> to vector<5x16xf32>
    %377 = arith.addf %373, %376 : vector<5x16xf32>
    %c5_218 = arith.constant 5 : index
    %c0_219 = arith.constant 0 : index
    %c0_220 = arith.constant 0 : index
    %378 = vector.load %arg4[%c5_218, %c0_219, %c0_220] : memref<12x32x16xf32, #tpu.memory_space<vmem>>, vector<1x32x16xf32>
    %379 = vector.shape_cast %378 : vector<1x32x16xf32> to vector<32x16xf32>
    %cst_221 = arith.constant dense<0.000000e+00> : vector<5x16xf32>
    %380 = tpu.matmul %330, %379, %cst_221 {dimension_numbers = #tpu.dot_dimension_numbers<[1], [0], [0], [1], [0, 0, 1, 1], [], []>} : vector<5x32xf32>, vector<32x16xf32>, vector<5x16xf32> -> vector<5x16xf32>
    %c5_222 = arith.constant 5 : index
    %c0_223 = arith.constant 0 : index
    %c0_224 = arith.constant 0 : index
    %381 = vector.load %arg5[%c5_222, %c0_223, %c0_224] : memref<12x1x16xf32, #tpu.memory_space<vmem>>, vector<1x1x16xf32>
    %382 = vector.shape_cast %381 : vector<1x1x16xf32> to vector<1x16xf32>
    %383 = vector.broadcast %382 : vector<1x16xf32> to vector<5x16xf32>
    %384 = arith.addf %380, %383 : vector<5x16xf32>
    %c9_225 = arith.constant 9 : index
    %c0_226 = arith.constant 0 : index
    %c0_227 = arith.constant 0 : index
    %385 = vector.load %arg4[%c9_225, %c0_226, %c0_227] : memref<12x32x16xf32, #tpu.memory_space<vmem>>, vector<1x32x16xf32>
    %386 = vector.shape_cast %385 : vector<1x32x16xf32> to vector<32x16xf32>
    %cst_228 = arith.constant dense<0.000000e+00> : vector<5x16xf32>
    %387 = tpu.matmul %330, %386, %cst_228 {dimension_numbers = #tpu.dot_dimension_numbers<[1], [0], [0], [1], [0, 0, 1, 1], [], []>} : vector<5x32xf32>, vector<32x16xf32>, vector<5x16xf32> -> vector<5x16xf32>
    %c9_229 = arith.constant 9 : index
    %c0_230 = arith.constant 0 : index
    %c0_231 = arith.constant 0 : index
    %388 = vector.load %arg5[%c9_229, %c0_230, %c0_231] : memref<12x1x16xf32, #tpu.memory_space<vmem>>, vector<1x1x16xf32>
    %389 = vector.shape_cast %388 : vector<1x1x16xf32> to vector<1x16xf32>
    %390 = vector.broadcast %389 : vector<1x16xf32> to vector<5x16xf32>
    %391 = arith.addf %387, %390 : vector<5x16xf32>
    %cst_232 = arith.constant dense<0.000000e+00> : vector<5x5xf32>
    %392 = tpu.matmul %377, %384, %cst_232 {dimension_numbers = #tpu.dot_dimension_numbers<[1], [1], [0], [0], [0, 0, 1, 0], [], []>} : vector<5x16xf32>, vector<5x16xf32>, vector<5x5xf32> -> vector<5x5xf32>
    %cst_233 = arith.constant dense<0xFF800000> : vector<5xf32>
    %393 = vector.multi_reduction <maximumf>, %392, %cst_233 [1] : vector<5x5xf32> to vector<5xf32>
    %394 = vector.shape_cast %393 : vector<5xf32> to vector<5x1xf32>
    %395 = vector.broadcast %394 : vector<5x1xf32> to vector<5x5xf32>
    %396 = arith.subf %392, %395 : vector<5x5xf32>
    %397 = math.exp %396 : vector<5x5xf32>
    %cst_234 = arith.constant dense<0.000000e+00> : vector<5xf32>
    %398 = vector.multi_reduction <add>, %397, %cst_234 [1] : vector<5x5xf32> to vector<5xf32>
    %399 = vector.shape_cast %398 : vector<5xf32> to vector<5x1xf32>
    %400 = vector.broadcast %399 : vector<5x1xf32> to vector<5x5xf32>
    %401 = arith.divf %397, %400 : vector<5x5xf32>
    %cst_235 = arith.constant dense<0.000000e+00> : vector<5x16xf32>
    %402 = tpu.matmul %401, %391, %cst_235 {dimension_numbers = #tpu.dot_dimension_numbers<[1], [0], [0], [1], [0, 0, 1, 1], [], []>} : vector<5x5xf32>, vector<5x16xf32>, vector<5x16xf32> -> vector<5x16xf32>
    %c1_236 = arith.constant 1 : index
    %c0_237 = arith.constant 0 : index
    %c0_238 = arith.constant 0 : index
    %403 = vector.load %arg6[%c1_236, %c0_237, %c0_238] : memref<4x16x32xf32, #tpu.memory_space<vmem>>, vector<1x16x32xf32>
    %404 = vector.shape_cast %403 : vector<1x16x32xf32> to vector<16x32xf32>
    %cst_239 = arith.constant dense<0.000000e+00> : vector<5x32xf32>
    %405 = tpu.matmul %402, %404, %cst_239 {dimension_numbers = #tpu.dot_dimension_numbers<[1], [0], [0], [1], [0, 0, 1, 1], [], []>} : vector<5x16xf32>, vector<16x32xf32>, vector<5x32xf32> -> vector<5x32xf32>
    %406 = arith.addf %370, %405 : vector<5x32xf32>
    %407 = arith.addf %312, %406 : vector<5x32xf32>
    %cst_240 = arith.constant dense<0.000000e+00> : vector<5xf32>
    %408 = vector.multi_reduction <add>, %407, %cst_240 [1] : vector<5x32xf32> to vector<5xf32>
    %409 = vector.shape_cast %408 : vector<5xf32> to vector<5x1xf32>
    %cst_241 = arith.constant 3.200000e+01 : f32
    %410 = vector.broadcast %cst_241 : f32 to vector<5x1xf32>
    %411 = arith.divf %409, %410 : vector<5x1xf32>
    %412 = vector.broadcast %411 : vector<5x1xf32> to vector<5x32xf32>
    %413 = arith.subf %407, %412 : vector<5x32xf32>
    %414 = arith.mulf %413, %413 : vector<5x32xf32>
    %cst_242 = arith.constant dense<0.000000e+00> : vector<5xf32>
    %415 = vector.multi_reduction <add>, %414, %cst_242 [1] : vector<5x32xf32> to vector<5xf32>
    %416 = vector.shape_cast %415 : vector<5xf32> to vector<5x1xf32>
    %cst_243 = arith.constant 3.200000e+01 : f32
    %417 = vector.broadcast %cst_243 : f32 to vector<5x1xf32>
    %418 = arith.divf %416, %417 : vector<5x1xf32>
    %419 = vector.broadcast %411 : vector<5x1xf32> to vector<5x32xf32>
    %420 = arith.subf %407, %419 : vector<5x32xf32>
    %cst_244 = arith.constant 9.99999997E-7 : f32
    %421 = vector.broadcast %cst_244 : f32 to vector<5x1xf32>
    %422 = arith.addf %418, %421 : vector<5x1xf32>
    %423 = math.rsqrt %422 : vector<5x1xf32>
    %424 = vector.broadcast %423 : vector<5x1xf32> to vector<5x32xf32>
    %425 = arith.mulf %420, %424 : vector<5x32xf32>
    %c0_245 = arith.constant 0 : index
    %c0_246 = arith.constant 0 : index
    %c0_247 = arith.constant 0 : index
    %426 = vector.load %arg7[%c0_245, %c0_246, %c0_247] : memref<2x32x64xf32, #tpu.memory_space<vmem>>, vector<1x32x64xf32>
    %427 = vector.shape_cast %426 : vector<1x32x64xf32> to vector<32x64xf32>
    %cst_248 = arith.constant dense<0.000000e+00> : vector<5x64xf32>
    %428 = tpu.matmul %425, %427, %cst_248 {dimension_numbers = #tpu.dot_dimension_numbers<[1], [0], [0], [1], [0, 0, 1, 1], [], []>} : vector<5x32xf32>, vector<32x64xf32>, vector<5x64xf32> -> vector<5x64xf32>
    %c0_249 = arith.constant 0 : index
    %c0_250 = arith.constant 0 : index
    %c0_251 = arith.constant 0 : index
    %429 = vector.load %arg8[%c0_249, %c0_250, %c0_251] : memref<2x1x64xf32, #tpu.memory_space<vmem>>, vector<1x1x64xf32>
    %430 = vector.shape_cast %429 : vector<1x1x64xf32> to vector<1x64xf32>
    %431 = vector.broadcast %430 : vector<1x64xf32> to vector<5x64xf32>
    %432 = arith.addf %428, %431 : vector<5x64xf32>
    %cst_252 = arith.constant 5.000000e-01 : f32
    %433 = vector.broadcast %cst_252 : f32 to vector<5x64xf32>
    %434 = arith.mulf %433, %432 : vector<5x64xf32>
    %cst_253 = arith.constant 0.707106769 : f32
    %435 = vector.broadcast %cst_253 : f32 to vector<5x64xf32>
    %436 = arith.mulf %432, %435 : vector<5x64xf32>
    %437 = math.erf %436 : vector<5x64xf32>
    %cst_254 = arith.constant 1.000000e+00 : f32
    %438 = vector.broadcast %cst_254 : f32 to vector<5x64xf32>
    %439 = arith.addf %438, %437 : vector<5x64xf32>
    %440 = arith.mulf %434, %439 : vector<5x64xf32>
    %c0_255 = arith.constant 0 : index
    %c0_256 = arith.constant 0 : index
    %c0_257 = arith.constant 0 : index
    %441 = vector.load %arg9[%c0_255, %c0_256, %c0_257] : memref<2x64x32xf32, #tpu.memory_space<vmem>>, vector<1x64x32xf32>
    %442 = vector.shape_cast %441 : vector<1x64x32xf32> to vector<64x32xf32>
    %cst_258 = arith.constant dense<0.000000e+00> : vector<5x32xf32>
    %443 = tpu.matmul %440, %442, %cst_258 {dimension_numbers = #tpu.dot_dimension_numbers<[1], [0], [0], [1], [0, 0, 1, 1], [], []>} : vector<5x64xf32>, vector<64x32xf32>, vector<5x32xf32> -> vector<5x32xf32>
    %444 = vector.extract_strided_slice %332 {offsets = [1, 0], sizes = [1, 32], strides = [1, 1]} : vector<2x32xf32> to vector<1x32xf32>
    %445 = vector.broadcast %444 : vector<1x32xf32> to vector<5x32xf32>
    %446 = arith.addf %443, %445 : vector<5x32xf32>
    %447 = arith.addf %407, %446 : vector<5x32xf32>
    %cst_259 = arith.constant dense<0.000000e+00> : vector<5xf32>
    %448 = vector.multi_reduction <add>, %447, %cst_259 [1] : vector<5x32xf32> to vector<5xf32>
    %449 = vector.shape_cast %448 : vector<5xf32> to vector<5x1xf32>
    %cst_260 = arith.constant 3.200000e+01 : f32
    %450 = vector.broadcast %cst_260 : f32 to vector<5x1xf32>
    %451 = arith.divf %449, %450 : vector<5x1xf32>
    %452 = vector.broadcast %451 : vector<5x1xf32> to vector<5x32xf32>
    %453 = arith.subf %447, %452 : vector<5x32xf32>
    %454 = arith.mulf %453, %453 : vector<5x32xf32>
    %cst_261 = arith.constant dense<0.000000e+00> : vector<5xf32>
    %455 = vector.multi_reduction <add>, %454, %cst_261 [1] : vector<5x32xf32> to vector<5xf32>
    %456 = vector.shape_cast %455 : vector<5xf32> to vector<5x1xf32>
    %cst_262 = arith.constant 3.200000e+01 : f32
    %457 = vector.broadcast %cst_262 : f32 to vector<5x1xf32>
    %458 = arith.divf %456, %457 : vector<5x1xf32>
    %459 = vector.broadcast %451 : vector<5x1xf32> to vector<5x32xf32>
    %460 = arith.subf %447, %459 : vector<5x32xf32>
    %cst_263 = arith.constant 9.99999997E-7 : f32
    %461 = vector.broadcast %cst_263 : f32 to vector<5x1xf32>
    %462 = arith.addf %458, %461 : vector<5x1xf32>
    %463 = math.rsqrt %462 : vector<5x1xf32>
    %464 = vector.broadcast %463 : vector<5x1xf32> to vector<5x32xf32>
    %465 = arith.mulf %460, %464 : vector<5x32xf32>
    %c1_264 = arith.constant 1 : index
    %c0_265 = arith.constant 0 : index
    %c0_266 = arith.constant 0 : index
    %466 = vector.load %arg10[%c1_264, %c0_265, %c0_266] : memref<2x2x32xf32, #tpu.memory_space<vmem>>, vector<1x2x32xf32>
    %467 = vector.shape_cast %466 : vector<1x2x32xf32> to vector<2x32xf32>
    %468 = vector.extract_strided_slice %467 {offsets = [0, 0], sizes = [1, 32], strides = [1, 1]} : vector<2x32xf32> to vector<1x32xf32>
    %c2_267 = arith.constant 2 : index
    %c0_268 = arith.constant 0 : index
    %c0_269 = arith.constant 0 : index
    %469 = vector.load %arg4[%c2_267, %c0_268, %c0_269] : memref<12x32x16xf32, #tpu.memory_space<vmem>>, vector<1x32x16xf32>
    %470 = vector.shape_cast %469 : vector<1x32x16xf32> to vector<32x16xf32>
    %cst_270 = arith.constant dense<0.000000e+00> : vector<5x16xf32>
    %471 = tpu.matmul %465, %470, %cst_270 {dimension_numbers = #tpu.dot_dimension_numbers<[1], [0], [0], [1], [0, 0, 1, 1], [], []>} : vector<5x32xf32>, vector<32x16xf32>, vector<5x16xf32> -> vector<5x16xf32>
    %c2_271 = arith.constant 2 : index
    %c0_272 = arith.constant 0 : index
    %c0_273 = arith.constant 0 : index
    %472 = vector.load %arg5[%c2_271, %c0_272, %c0_273] : memref<12x1x16xf32, #tpu.memory_space<vmem>>, vector<1x1x16xf32>
    %473 = vector.shape_cast %472 : vector<1x1x16xf32> to vector<1x16xf32>
    %474 = vector.broadcast %473 : vector<1x16xf32> to vector<5x16xf32>
    %475 = arith.addf %471, %474 : vector<5x16xf32>
    %c6_274 = arith.constant 6 : index
    %c0_275 = arith.constant 0 : index
    %c0_276 = arith.constant 0 : index
    %476 = vector.load %arg4[%c6_274, %c0_275, %c0_276] : memref<12x32x16xf32, #tpu.memory_space<vmem>>, vector<1x32x16xf32>
    %477 = vector.shape_cast %476 : vector<1x32x16xf32> to vector<32x16xf32>
    %cst_277 = arith.constant dense<0.000000e+00> : vector<5x16xf32>
    %478 = tpu.matmul %465, %477, %cst_277 {dimension_numbers = #tpu.dot_dimension_numbers<[1], [0], [0], [1], [0, 0, 1, 1], [], []>} : vector<5x32xf32>, vector<32x16xf32>, vector<5x16xf32> -> vector<5x16xf32>
    %c6_278 = arith.constant 6 : index
    %c0_279 = arith.constant 0 : index
    %c0_280 = arith.constant 0 : index
    %479 = vector.load %arg5[%c6_278, %c0_279, %c0_280] : memref<12x1x16xf32, #tpu.memory_space<vmem>>, vector<1x1x16xf32>
    %480 = vector.shape_cast %479 : vector<1x1x16xf32> to vector<1x16xf32>
    %481 = vector.broadcast %480 : vector<1x16xf32> to vector<5x16xf32>
    %482 = arith.addf %478, %481 : vector<5x16xf32>
    %c10_281 = arith.constant 10 : index
    %c0_282 = arith.constant 0 : index
    %c0_283 = arith.constant 0 : index
    %483 = vector.load %arg4[%c10_281, %c0_282, %c0_283] : memref<12x32x16xf32, #tpu.memory_space<vmem>>, vector<1x32x16xf32>
    %484 = vector.shape_cast %483 : vector<1x32x16xf32> to vector<32x16xf32>
    %cst_284 = arith.constant dense<0.000000e+00> : vector<5x16xf32>
    %485 = tpu.matmul %465, %484, %cst_284 {dimension_numbers = #tpu.dot_dimension_numbers<[1], [0], [0], [1], [0, 0, 1, 1], [], []>} : vector<5x32xf32>, vector<32x16xf32>, vector<5x16xf32> -> vector<5x16xf32>
    %c10_285 = arith.constant 10 : index
    %c0_286 = arith.constant 0 : index
    %c0_287 = arith.constant 0 : index
    %486 = vector.load %arg5[%c10_285, %c0_286, %c0_287] : memref<12x1x16xf32, #tpu.memory_space<vmem>>, vector<1x1x16xf32>
    %487 = vector.shape_cast %486 : vector<1x1x16xf32> to vector<1x16xf32>
    %488 = vector.broadcast %487 : vector<1x16xf32> to vector<5x16xf32>
    %489 = arith.addf %485, %488 : vector<5x16xf32>
    %cst_288 = arith.constant dense<0.000000e+00> : vector<5x5xf32>
    %490 = tpu.matmul %475, %482, %cst_288 {dimension_numbers = #tpu.dot_dimension_numbers<[1], [1], [0], [0], [0, 0, 1, 0], [], []>} : vector<5x16xf32>, vector<5x16xf32>, vector<5x5xf32> -> vector<5x5xf32>
    %cst_289 = arith.constant dense<0xFF800000> : vector<5xf32>
    %491 = vector.multi_reduction <maximumf>, %490, %cst_289 [1] : vector<5x5xf32> to vector<5xf32>
    %492 = vector.shape_cast %491 : vector<5xf32> to vector<5x1xf32>
    %493 = vector.broadcast %492 : vector<5x1xf32> to vector<5x5xf32>
    %494 = arith.subf %490, %493 : vector<5x5xf32>
    %495 = math.exp %494 : vector<5x5xf32>
    %cst_290 = arith.constant dense<0.000000e+00> : vector<5xf32>
    %496 = vector.multi_reduction <add>, %495, %cst_290 [1] : vector<5x5xf32> to vector<5xf32>
    %497 = vector.shape_cast %496 : vector<5xf32> to vector<5x1xf32>
    %498 = vector.broadcast %497 : vector<5x1xf32> to vector<5x5xf32>
    %499 = arith.divf %495, %498 : vector<5x5xf32>
    %cst_291 = arith.constant dense<0.000000e+00> : vector<5x16xf32>
    %500 = tpu.matmul %499, %489, %cst_291 {dimension_numbers = #tpu.dot_dimension_numbers<[1], [0], [0], [1], [0, 0, 1, 1], [], []>} : vector<5x5xf32>, vector<5x16xf32>, vector<5x16xf32> -> vector<5x16xf32>
    %c2_292 = arith.constant 2 : index
    %c0_293 = arith.constant 0 : index
    %c0_294 = arith.constant 0 : index
    %501 = vector.load %arg6[%c2_292, %c0_293, %c0_294] : memref<4x16x32xf32, #tpu.memory_space<vmem>>, vector<1x16x32xf32>
    %502 = vector.shape_cast %501 : vector<1x16x32xf32> to vector<16x32xf32>
    %cst_295 = arith.constant dense<0.000000e+00> : vector<5x32xf32>
    %503 = tpu.matmul %500, %502, %cst_295 {dimension_numbers = #tpu.dot_dimension_numbers<[1], [0], [0], [1], [0, 0, 1, 1], [], []>} : vector<5x16xf32>, vector<16x32xf32>, vector<5x32xf32> -> vector<5x32xf32>
    %504 = vector.broadcast %468 : vector<1x32xf32> to vector<5x32xf32>
    %505 = arith.addf %504, %503 : vector<5x32xf32>
    %c3_296 = arith.constant 3 : index
    %c0_297 = arith.constant 0 : index
    %c0_298 = arith.constant 0 : index
    %506 = vector.load %arg4[%c3_296, %c0_297, %c0_298] : memref<12x32x16xf32, #tpu.memory_space<vmem>>, vector<1x32x16xf32>
    %507 = vector.shape_cast %506 : vector<1x32x16xf32> to vector<32x16xf32>
    %cst_299 = arith.constant dense<0.000000e+00> : vector<5x16xf32>
    %508 = tpu.matmul %465, %507, %cst_299 {dimension_numbers = #tpu.dot_dimension_numbers<[1], [0], [0], [1], [0, 0, 1, 1], [], []>} : vector<5x32xf32>, vector<32x16xf32>, vector<5x16xf32> -> vector<5x16xf32>
    %c3_300 = arith.constant 3 : index
    %c0_301 = arith.constant 0 : index
    %c0_302 = arith.constant 0 : index
    %509 = vector.load %arg5[%c3_300, %c0_301, %c0_302] : memref<12x1x16xf32, #tpu.memory_space<vmem>>, vector<1x1x16xf32>
    %510 = vector.shape_cast %509 : vector<1x1x16xf32> to vector<1x16xf32>
    %511 = vector.broadcast %510 : vector<1x16xf32> to vector<5x16xf32>
    %512 = arith.addf %508, %511 : vector<5x16xf32>
    %c7_303 = arith.constant 7 : index
    %c0_304 = arith.constant 0 : index
    %c0_305 = arith.constant 0 : index
    %513 = vector.load %arg4[%c7_303, %c0_304, %c0_305] : memref<12x32x16xf32, #tpu.memory_space<vmem>>, vector<1x32x16xf32>
    %514 = vector.shape_cast %513 : vector<1x32x16xf32> to vector<32x16xf32>
    %cst_306 = arith.constant dense<0.000000e+00> : vector<5x16xf32>
    %515 = tpu.matmul %465, %514, %cst_306 {dimension_numbers = #tpu.dot_dimension_numbers<[1], [0], [0], [1], [0, 0, 1, 1], [], []>} : vector<5x32xf32>, vector<32x16xf32>, vector<5x16xf32> -> vector<5x16xf32>
    %c7_307 = arith.constant 7 : index
    %c0_308 = arith.constant 0 : index
    %c0_309 = arith.constant 0 : index
    %516 = vector.load %arg5[%c7_307, %c0_308, %c0_309] : memref<12x1x16xf32, #tpu.memory_space<vmem>>, vector<1x1x16xf32>
    %517 = vector.shape_cast %516 : vector<1x1x16xf32> to vector<1x16xf32>
    %518 = vector.broadcast %517 : vector<1x16xf32> to vector<5x16xf32>
    %519 = arith.addf %515, %518 : vector<5x16xf32>
    %c11_310 = arith.constant 11 : index
    %c0_311 = arith.constant 0 : index
    %c0_312 = arith.constant 0 : index
    %520 = vector.load %arg4[%c11_310, %c0_311, %c0_312] : memref<12x32x16xf32, #tpu.memory_space<vmem>>, vector<1x32x16xf32>
    %521 = vector.shape_cast %520 : vector<1x32x16xf32> to vector<32x16xf32>
    %cst_313 = arith.constant dense<0.000000e+00> : vector<5x16xf32>
    %522 = tpu.matmul %465, %521, %cst_313 {dimension_numbers = #tpu.dot_dimension_numbers<[1], [0], [0], [1], [0, 0, 1, 1], [], []>} : vector<5x32xf32>, vector<32x16xf32>, vector<5x16xf32> -> vector<5x16xf32>
    %c11_314 = arith.constant 11 : index
    %c0_315 = arith.constant 0 : index
    %c0_316 = arith.constant 0 : index
    %523 = vector.load %arg5[%c11_314, %c0_315, %c0_316] : memref<12x1x16xf32, #tpu.memory_space<vmem>>, vector<1x1x16xf32>
    %524 = vector.shape_cast %523 : vector<1x1x16xf32> to vector<1x16xf32>
    %525 = vector.broadcast %524 : vector<1x16xf32> to vector<5x16xf32>
    %526 = arith.addf %522, %525 : vector<5x16xf32>
    %cst_317 = arith.constant dense<0.000000e+00> : vector<5x5xf32>
    %527 = tpu.matmul %512, %519, %cst_317 {dimension_numbers = #tpu.dot_dimension_numbers<[1], [1], [0], [0], [0, 0, 1, 0], [], []>} : vector<5x16xf32>, vector<5x16xf32>, vector<5x5xf32> -> vector<5x5xf32>
    %cst_318 = arith.constant dense<0xFF800000> : vector<5xf32>
    %528 = vector.multi_reduction <maximumf>, %527, %cst_318 [1] : vector<5x5xf32> to vector<5xf32>
    %529 = vector.shape_cast %528 : vector<5xf32> to vector<5x1xf32>
    %530 = vector.broadcast %529 : vector<5x1xf32> to vector<5x5xf32>
    %531 = arith.subf %527, %530 : vector<5x5xf32>
    %532 = math.exp %531 : vector<5x5xf32>
    %cst_319 = arith.constant dense<0.000000e+00> : vector<5xf32>
    %533 = vector.multi_reduction <add>, %532, %cst_319 [1] : vector<5x5xf32> to vector<5xf32>
    %534 = vector.shape_cast %533 : vector<5xf32> to vector<5x1xf32>
    %535 = vector.broadcast %534 : vector<5x1xf32> to vector<5x5xf32>
    %536 = arith.divf %532, %535 : vector<5x5xf32>
    %cst_320 = arith.constant dense<0.000000e+00> : vector<5x16xf32>
    %537 = tpu.matmul %536, %526, %cst_320 {dimension_numbers = #tpu.dot_dimension_numbers<[1], [0], [0], [1], [0, 0, 1, 1], [], []>} : vector<5x5xf32>, vector<5x16xf32>, vector<5x16xf32> -> vector<5x16xf32>
    %c3_321 = arith.constant 3 : index
    %c0_322 = arith.constant 0 : index
    %c0_323 = arith.constant 0 : index
    %538 = vector.load %arg6[%c3_321, %c0_322, %c0_323] : memref<4x16x32xf32, #tpu.memory_space<vmem>>, vector<1x16x32xf32>
    %539 = vector.shape_cast %538 : vector<1x16x32xf32> to vector<16x32xf32>
    %cst_324 = arith.constant dense<0.000000e+00> : vector<5x32xf32>
    %540 = tpu.matmul %537, %539, %cst_324 {dimension_numbers = #tpu.dot_dimension_numbers<[1], [0], [0], [1], [0, 0, 1, 1], [], []>} : vector<5x16xf32>, vector<16x32xf32>, vector<5x32xf32> -> vector<5x32xf32>
    %541 = arith.addf %505, %540 : vector<5x32xf32>
    %542 = arith.addf %447, %541 : vector<5x32xf32>
    %cst_325 = arith.constant dense<0.000000e+00> : vector<5xf32>
    %543 = vector.multi_reduction <add>, %542, %cst_325 [1] : vector<5x32xf32> to vector<5xf32>
    %544 = vector.shape_cast %543 : vector<5xf32> to vector<5x1xf32>
    %cst_326 = arith.constant 3.200000e+01 : f32
    %545 = vector.broadcast %cst_326 : f32 to vector<5x1xf32>
    %546 = arith.divf %544, %545 : vector<5x1xf32>
    %547 = vector.broadcast %546 : vector<5x1xf32> to vector<5x32xf32>
    %548 = arith.subf %542, %547 : vector<5x32xf32>
    %549 = arith.mulf %548, %548 : vector<5x32xf32>
    %cst_327 = arith.constant dense<0.000000e+00> : vector<5xf32>
    %550 = vector.multi_reduction <add>, %549, %cst_327 [1] : vector<5x32xf32> to vector<5xf32>
    %551 = vector.shape_cast %550 : vector<5xf32> to vector<5x1xf32>
    %cst_328 = arith.constant 3.200000e+01 : f32
    %552 = vector.broadcast %cst_328 : f32 to vector<5x1xf32>
    %553 = arith.divf %551, %552 : vector<5x1xf32>
    %554 = vector.broadcast %546 : vector<5x1xf32> to vector<5x32xf32>
    %555 = arith.subf %542, %554 : vector<5x32xf32>
    %cst_329 = arith.constant 9.99999997E-7 : f32
    %556 = vector.broadcast %cst_329 : f32 to vector<5x1xf32>
    %557 = arith.addf %553, %556 : vector<5x1xf32>
    %558 = math.rsqrt %557 : vector<5x1xf32>
    %559 = vector.broadcast %558 : vector<5x1xf32> to vector<5x32xf32>
    %560 = arith.mulf %555, %559 : vector<5x32xf32>
    %c1_330 = arith.constant 1 : index
    %c0_331 = arith.constant 0 : index
    %c0_332 = arith.constant 0 : index
    %561 = vector.load %arg7[%c1_330, %c0_331, %c0_332] : memref<2x32x64xf32, #tpu.memory_space<vmem>>, vector<1x32x64xf32>
    %562 = vector.shape_cast %561 : vector<1x32x64xf32> to vector<32x64xf32>
    %cst_333 = arith.constant dense<0.000000e+00> : vector<5x64xf32>
    %563 = tpu.matmul %560, %562, %cst_333 {dimension_numbers = #tpu.dot_dimension_numbers<[1], [0], [0], [1], [0, 0, 1, 1], [], []>} : vector<5x32xf32>, vector<32x64xf32>, vector<5x64xf32> -> vector<5x64xf32>
    %c1_334 = arith.constant 1 : index
    %c0_335 = arith.constant 0 : index
    %c0_336 = arith.constant 0 : index
    %564 = vector.load %arg8[%c1_334, %c0_335, %c0_336] : memref<2x1x64xf32, #tpu.memory_space<vmem>>, vector<1x1x64xf32>
    %565 = vector.shape_cast %564 : vector<1x1x64xf32> to vector<1x64xf32>
    %566 = vector.broadcast %565 : vector<1x64xf32> to vector<5x64xf32>
    %567 = arith.addf %563, %566 : vector<5x64xf32>
    %cst_337 = arith.constant 5.000000e-01 : f32
    %568 = vector.broadcast %cst_337 : f32 to vector<5x64xf32>
    %569 = arith.mulf %568, %567 : vector<5x64xf32>
    %cst_338 = arith.constant 0.707106769 : f32
    %570 = vector.broadcast %cst_338 : f32 to vector<5x64xf32>
    %571 = arith.mulf %567, %570 : vector<5x64xf32>
    %572 = math.erf %571 : vector<5x64xf32>
    %cst_339 = arith.constant 1.000000e+00 : f32
    %573 = vector.broadcast %cst_339 : f32 to vector<5x64xf32>
    %574 = arith.addf %573, %572 : vector<5x64xf32>
    %575 = arith.mulf %569, %574 : vector<5x64xf32>
    %c1_340 = arith.constant 1 : index
    %c0_341 = arith.constant 0 : index
    %c0_342 = arith.constant 0 : index
    %576 = vector.load %arg9[%c1_340, %c0_341, %c0_342] : memref<2x64x32xf32, #tpu.memory_space<vmem>>, vector<1x64x32xf32>
    %577 = vector.shape_cast %576 : vector<1x64x32xf32> to vector<64x32xf32>
    %cst_343 = arith.constant dense<0.000000e+00> : vector<5x32xf32>
    %578 = tpu.matmul %575, %577, %cst_343 {dimension_numbers = #tpu.dot_dimension_numbers<[1], [0], [0], [1], [0, 0, 1, 1], [], []>} : vector<5x64xf32>, vector<64x32xf32>, vector<5x32xf32> -> vector<5x32xf32>
    %579 = vector.extract_strided_slice %467 {offsets = [1, 0], sizes = [1, 32], strides = [1, 1]} : vector<2x32xf32> to vector<1x32xf32>
    %580 = vector.broadcast %579 : vector<1x32xf32> to vector<5x32xf32>
    %581 = arith.addf %578, %580 : vector<5x32xf32>
    %582 = arith.addf %542, %581 : vector<5x32xf32>
    %cst_344 = arith.constant dense<0.000000e+00> : vector<5xf32>
    %583 = vector.multi_reduction <add>, %582, %cst_344 [1] : vector<5x32xf32> to vector<5xf32>
    %584 = vector.shape_cast %583 : vector<5xf32> to vector<5x1xf32>
    %cst_345 = arith.constant 3.200000e+01 : f32
    %585 = vector.broadcast %cst_345 : f32 to vector<5x1xf32>
    %586 = arith.divf %584, %585 : vector<5x1xf32>
    %587 = vector.broadcast %586 : vector<5x1xf32> to vector<5x32xf32>
    %588 = arith.subf %582, %587 : vector<5x32xf32>
    %589 = arith.mulf %588, %588 : vector<5x32xf32>
    %cst_346 = arith.constant dense<0.000000e+00> : vector<5xf32>
    %590 = vector.multi_reduction <add>, %589, %cst_346 [1] : vector<5x32xf32> to vector<5xf32>
    %591 = vector.shape_cast %590 : vector<5xf32> to vector<5x1xf32>
    %cst_347 = arith.constant 3.200000e+01 : f32
    %592 = vector.broadcast %cst_347 : f32 to vector<5x1xf32>
    %593 = arith.divf %591, %592 : vector<5x1xf32>
    %594 = vector.broadcast %586 : vector<5x1xf32> to vector<5x32xf32>
    %595 = arith.subf %582, %594 : vector<5x32xf32>
    %cst_348 = arith.constant 9.99999997E-7 : f32
    %596 = vector.broadcast %cst_348 : f32 to vector<5x1xf32>
    %597 = arith.addf %593, %596 : vector<5x1xf32>
    %598 = math.rsqrt %597 : vector<5x1xf32>
    %599 = vector.broadcast %598 : vector<5x1xf32> to vector<5x32xf32>
    %600 = arith.mulf %595, %599 : vector<5x32xf32>
    %601 = vector.broadcast %3 : vector<1x32xf32> to vector<5x32xf32>
    %602 = arith.mulf %600, %601 : vector<5x32xf32>
    %603 = vector.broadcast %4 : vector<1x32xf32> to vector<5x32xf32>
    %604 = arith.addf %602, %603 : vector<5x32xf32>
    %605 = vector.shape_cast %305 : vector<5x32xf32> to vector<1x5x32xf32>
    %606 = vector.shape_cast %604 : vector<5x32xf32> to vector<1x5x32xf32>
    %607 = tpu.concatenate %605, %606 in 0 : vector<1x5x32xf32>, vector<1x5x32xf32> -> vector<2x5x32xf32>
    %c0_349 = arith.constant 0 : index
    %c0_350 = arith.constant 0 : index
    %c0_351 = arith.constant 0 : index
    %c0_352 = arith.constant 0 : index
    %608 = vector.load %arg11[%c0_349, %c0_350, %c0_351, %c0_352] : memref<1x2x5x32xf32, #tpu.memory_space<vmem>>, vector<1x2x5x32xf32>
    %609 = vector.shape_cast %608 : vector<1x2x5x32xf32> to vector<2x5x32xf32>
    %610 = vector.shape_cast %607 : vector<2x5x32xf32> to vector<1x2x5x32xf32>
    tpu.vector_store %arg11[%c0_349, %c0_350, %c0_351, %c0_352], %610 {strides = array<i32>} : memref<1x2x5x32xf32, #tpu.memory_space<vmem>>, vector<1x2x5x32xf32>,
    return
  }
  func.func @transform_0(%arg0: i32) -> (i32, i32, i32) {
    %c0_i32 = arith.constant 0 : i32
    %c0_i32_0 = arith.constant 0 : i32
    %c0_i32_1 = arith.constant 0 : i32
    %c0_i32_2 = arith.constant 0 : i32
    return %c0_i32, %c0_i32_0, %c0_i32_1 : i32, i32, i32
  }
  func.func @transform_1(%arg0: i32) -> (i32, i32) {
    %c0_i32 = arith.constant 0 : i32
    %c0_i32_0 = arith.constant 0 : i32
    %c0_i32_1 = arith.constant 0 : i32
    return %c0_i32, %c0_i32_0 : i32, i32
  }
  func.func @transform_2(%arg0: i32) -> (i32, i32) {
    %c0_i32 = arith.constant 0 : i32
    %c0_i32_0 = arith.constant 0 : i32
    %c0_i32_1 = arith.constant 0 : i32
    return %c0_i32, %c0_i32_0 : i32, i32
  }
  func.func @transform_3(%arg0: i32) -> (i32, i32, i32) {
    %c0_i32 = arith.constant 0 : i32
    %c0_i32_0 = arith.constant 0 : i32
    %c0_i32_1 = arith.constant 0 : i32
    %c0_i32_2 = arith.constant 0 : i32
    return %c0_i32, %c0_i32_0, %c0_i32_1 : i32, i32, i32
  }
  func.func @transform_4(%arg0: i32) -> (i32, i32, i32) {
    %c0_i32 = arith.constant 0 : i32
    %c0_i32_0 = arith.constant 0 : i32
    %c0_i32_1 = arith.constant 0 : i32
    %c0_i32_2 = arith.constant 0 : i32
    return %c0_i32, %c0_i32_0, %c0_i32_1 : i32, i32, i32
  }
  func.func @transform_5(%arg0: i32) -> (i32, i32, i32) {
    %c0_i32 = arith.constant 0 : i32
    %c0_i32_0 = arith.constant 0 : i32
    %c0_i32_1 = arith.constant 0 : i32
    %c0_i32_2 = arith.constant 0 : i32
    return %c0_i32, %c0_i32_0, %c0_i32_1 : i32, i32, i32
  }
  func.func @transform_6(%arg0: i32) -> (i32, i32, i32) {
    %c0_i32 = arith.constant 0 : i32
    %c0_i32_0 = arith.constant 0 : i32
    %c0_i32_1 = arith.constant 0 : i32
    %c0_i32_2 = arith.constant 0 : i32
    return %c0_i32, %c0_i32_0, %c0_i32_1 : i32, i32, i32
  }
  func.func @transform_7(%arg0: i32) -> (i32, i32, i32) {
    %c0_i32 = arith.constant 0 : i32
    %c0_i32_0 = arith.constant 0 : i32
    %c0_i32_1 = arith.constant 0 : i32
    %c0_i32_2 = arith.constant 0 : i32
    return %c0_i32, %c0_i32_0, %c0_i32_1 : i32, i32, i32
  }
  func.func @transform_8(%arg0: i32) -> (i32, i32, i32) {
    %c0_i32 = arith.constant 0 : i32
    %c0_i32_0 = arith.constant 0 : i32
    %c0_i32_1 = arith.constant 0 : i32
    %c0_i32_2 = arith.constant 0 : i32
    return %c0_i32, %c0_i32_0, %c0_i32_1 : i32, i32, i32
  }
  func.func @transform_9(%arg0: i32) -> (i32, i32, i32) {
    %c0_i32 = arith.constant 0 : i32
    %c0_i32_0 = arith.constant 0 : i32
    %c0_i32_1 = arith.constant 0 : i32
    %c0_i32_2 = arith.constant 0 : i32
    return %c0_i32, %c0_i32_0, %c0_i32_1 : i32, i32, i32
  }
  func.func @transform_10(%arg0: i32) -> (i32, i32, i32, i32) {
    %c0_i32 = arith.constant 0 : i32
    %c0_i32_0 = arith.constant 0 : i32
    %c0_i32_1 = arith.constant 0 : i32
    %c0_i32_2 = arith.constant 0 : i32
    %c0_i32_3 = arith.constant 0 : i32
    return %c0_i32, %c0_i32_0, %c0_i32_1, %c0_i32_2 : i32, i32, i32, i32
  }
}

</mosaic_0001>

<bundles_post_ra>
// kernel: model_with_intermediate_layers_forward.1
= control target key start
LH: loop header
LB: loop body
LE: loop exit
PB: predicated region body
PF: predicated region fallthrough
CT: control target
= control target key end

     0   :  { %v7292_v0 = vmov 0.0|0.0   ;;  %vm68_vm0 = vcmask 523264   ;;  %v62_v39 = vlaneseq  ;;  %vm150_vm1 = vcmask 1043456   ;;  %s7277_s1 = inlined_call_operand.vmem [shape: f32[192,32], index: 1, kind: input, shape index: {}]   ;;  %s7278_s0 = inlined_call_operand.vmem [shape: f32[2,4,192], index: 0, kind: input, shape index: {}]   ;;  %s7279_s2 = inlined_call_operand.vmem [shape: f32[9,32], index: 2, kind: input, shape index: {}]   ;;  %s7280_s3 = inlined_call_operand.vmem [shape: f32[12,32,16], index: 3, kind: input, shape index: {}]   ;;  %s7281_s4 = inlined_call_operand.vmem [shape: f32[12,1,16], index: 4, kind: input, shape index: {}]   ;;  %s7282_s5 = inlined_call_operand.vmem [shape: f32[4,16,32], index: 5, kind: input, shape index: {}]   ;;  %s7283_s9 = inlined_call_operand.vmem [shape: f32[2,2,32], index: 9, kind: input, shape index: {}]   ;;  %s7284_s6 = inlined_call_operand.vmem [shape: f32[2,32,64], index: 6, kind: input, shape index: {}]   ;;  %s7285_s8 = inlined_call_operand.vmem [shape: f32[2,64,32], index: 8, kind: input, shape index: {}]   ;;  %s7286_s7 = inlined_call_operand.vmem [shape: f32[2,1,64], index: 7, kind: input, shape index: {}]   ;;  %s7287_s10 = inlined_call_operand.vmem [shape: f32[1,2,5,32], index: 10, kind: output, shape index: {}]  }
   0x1   :  { %5733 = vmatprep.subr.bf16.mxu0 %v7292_v0  ;;  %v37_v1 = vld [vmem:[%s7277_s1] sm:$0xff]  ;;  %v38_v2 = vld [vmem:[%s7277_s1 + $0x8] sm:$0xff]  ;;  %v39_v3 = vld [vmem:[%s7277_s1 + $0x10] sm:$0xff]  ;;  %5769 = vmatprep.subr.bf16.mxu1 %v7292_v0  ;;  %vm147_vm2 = vcmask 1040384   ;;  %vm156_vm3 = vcmask 258048   ;;  %vm6116_vm4 = vmmov 0  }
   0x2   :  { %v6184_v4 = vpack.c.bf16 %v38_v2, %v37_v1  ;;  %v40_v5 = vld [vmem:[%s7277_s1 + $0x18] sm:$0xff]  ;;  %v41_v7 = vld [vmem:[%s7277_s1 + $0x20] sm:$0xff]  ;;  %v42_v8 = vld [vmem:[%s7277_s1 + $0x28] sm:$0xff]  ;;  %v6298_v40 = vshrl.u32 %v62_v39, 7  ;;  %vm183_vm5 = vcmask 261120   ;;  %vm423_vm6 = vcmask 130048  }
   0x3   :  { %v6190_v6 = vpack.c.bf16 %v40_v5, %v39_v3  ;;  %v6200_v9 = vpack.c.bf16 %v42_v8, %v41_v7  ;;  %v43_v10 = vld [vmem:[%s7277_s1 + $0x30] sm:$0xff]  ;;  %v44_v11 = vld [vmem:[%s7277_s1 + $0x38] sm:$0xff]  ;;  %v61_v12 = vld [vmem:[%s7278_s0] sm:$0xff]  ;;  %v7294_v5 = vmov 0.0   ;;  %vm516_vm7 = vcmask 1044480  }
   0x4   :  { %5735 = vmatpush1.bf16.msra.mxu0 %v6184_v4  ;;  %v67_v13 = vcombine.high %v61_v12, %v61_v12  ;;  %v6213_v14 = vpack.c.bf16 %v44_v11, %v43_v10  ;;  %v45_v15 = vld [vmem:[%s7277_s1 + $0x40] sm:$0xff]  ;;  %v46_v16 = vld [vmem:[%s7277_s1 + $0x48] sm:$0xff]  ;;  %v47_v18 = vld [vmem:[%s7277_s1 + $0x50] sm:$0xff]  ;;  %7309 = vst [vmem:[#allocation2_spill] sm:$0xff] %v6298_v40  ;;  %v6301_v41 = vsub.s32 0, %v6298_v40  ;;  %5221 = vmatprep.mubr.msk.f32.mxu1 %vm6116_vm4, %v7294_v5  ;;  %vm500_vm8 = vcmask 36864  }
   0x5   :  { %5736 = vmatprep.subr.bf16.mxu0 %v7292_v0  ;;  %v6224_v17 = vpack.c.bf16 %v46_v16, %v45_v15  ;;  %v48_v19 = vld [vmem:[%s7277_s1 + $0x58] sm:$0xff]  ;;  %v49_v21 = vld [vmem:[%s7277_s1 + $0x60] sm:$0xff]  ;;  %v50_v22 = vld [vmem:[%s7277_s1 + $0x68] sm:$0xff]  ;;  %vm512_vm9 = vcmask 39936  }
   0x6   :  { %4817 = vmatprep.mubr.msk.f32.mxu0 %vm68_vm0, %v67_v13  ;;  %v6234_v20 = vpack.c.bf16 %v48_v19, %v47_v18  ;;  %v6244_v23 = vpack.c.bf16 %v50_v22, %v49_v21  ;;  %v51_v24 = vld [vmem:[%s7277_s1 + $0x70] sm:$0xff]  ;;  %v52_v25 = vld [vmem:[%s7277_s1 + $0x78] sm:$0xff]  ;;  %v53_v27 = vld [vmem:[%s7277_s1 + $0x80] sm:$0xff] }
   0x7   :  { %v6254_v26 = vpack.c.bf16 %v52_v25, %v51_v24  ;;  %v54_v28 = vld [vmem:[%s7277_s1 + $0x88] sm:$0xff]  ;;  %v55_v30 = vld [vmem:[%s7277_s1 + $0x90] sm:$0xff]  ;;  %v56_v31 = vld [vmem:[%s7277_s1 + $0x98] sm:$0xff] }
   0x8   :  { %5738 = vmatpush1.bf16.msra.mxu0 %v6190_v6  ;;  %v6264_v29 = vpack.c.bf16 %v54_v28, %v53_v27  ;;  %v6274_v32 = vpack.c.bf16 %v56_v31, %v55_v30  ;;  %v57_v33 = vld [vmem:[%s7277_s1 + $0xa0] sm:$0xff]  ;;  %v58_v34 = vld [vmem:[%s7277_s1 + $0xa8] sm:$0xff]  ;;  %v59_v36 = vld [vmem:[%s7277_s1 + $0xb0] sm:$0xff] }
   0x9   :  { %5739 = vmatprep.subr.bf16.mxu0 %v7292_v0  ;;  %v6284_v35 = vpack.c.bf16 %v58_v34, %v57_v33  ;;  %v60_v37 = vld [vmem:[%s7277_s1 + $0xb8] sm:$0xff]  ;;  %v6306_v42 = vld [vmem:[%s7279_s2] sm:$0xff]  ;;  %v36_v43 = vld [vmem:[%s7279_s2 + $0x8] sm:$0x1] }
   0xa   :  { %v6294_v38 = vpack.c.bf16 %v60_v37, %v59_v36  ;;  %v6313_v44 = vrot.slane %v6306_v42, %v6301_v41  ;;  %v151_v45 = vrot.slane %v6306_v42, 4  ;;  %v152_v46 = vrot.slane %v36_v43, 4  ;;  %v172_v61 = vld [vmem:[%s7280_s3] sm:$0xff]  ;;  %v173_v62 = vld [vmem:[%s7280_s3 + $0x8] sm:$0xff]  ;;  %v174_v1 = vld [vmem:[%s7280_s3 + $0x10] sm:$0xff] }
   0xb   :  { %v7289_v50 = vrot.slane %v6306_v42, 1  ;;  %v6336_v63 = vpack.c.bf16 %v173_v62, %v172_v61  ;;  %v175_v2 = vld [vmem:[%s7280_s3 + $0x18] sm:$0xff]  ;;  %v4820_v11 = vld [vmem:[%s7280_s3 + $0x80] sm:$0xff]  ;;  %v4822_v18 = vld [vmem:[%s7280_s3 + $0x90] sm:$0xff] }
   0xc   :  { %5741 = vmatpush1.bf16.msra.mxu0 %v6200_v9  ;;  %v6318_v52 = vsel %vm150_vm1, %v151_v45, %v152_v46  ;;  %v6346_v3 = vpack.c.bf16 %v175_v2, %v174_v1  ;;  %v4823_v19 = vld [vmem:[%s7280_s3 + $0x98] sm:$0xff]  ;;  %v4827_v22 = vld [vmem:[%s7280_s3 + $0x100] sm:$0xff]  ;;  %v4828_v24 = vld [vmem:[%s7280_s3 + $0x108] sm:$0xff] }
   0xd   :  { %5742 = vmatprep.subr.bf16.mxu0 %v7292_v0  ;;  %5771 = vmatpush3.bf16.msra.mxu1 %v6336_v63  ;;  %v6374_v21 = vpack.c.bf16 %v4823_v19, %v4822_v18  ;;  %v6386_v25 = vpack.c.bf16 %v4828_v24, %v4827_v22  ;;  %v4829_v27 = vld [vmem:[%s7280_s3 + $0x110] sm:$0xff]  ;;  %v4830_v28 = vld [vmem:[%s7280_s3 + $0x118] sm:$0xff]  ;;  %v4825_v34 = vld [vmem:[%s7281_s4 + $0x4] ss:$0 sm:$0xff] }
   0xe   :  { %5772 = vmatprep.subr.bf16.mxu1 %v7292_v0  ;;  %v6398_v30 = vpack.c.bf16 %v4830_v28, %v4829_v27  ;;  %v4853_v37 = vld [vmem:[%s7280_s3 + $0x120] sm:$0xff]  ;;  %v4854_v39 = vld [vmem:[%s7280_s3 + $0x128] sm:$0xff] }
   0xf   :  { %v4818_v43 = vld [vmem:[%s7281_s4] ss:$0 sm:$0xff]  ;;  %v4858_v62 = vld [vmem:[%s7281_s4 + $0x9] ss:$0 sm:$0xff] }
  0x10   :  { %5744 = vmatpush1.bf16.msra.mxu0 %v6213_v14  ;;  %v590_v19 = vld [vmem:[%s7282_s5] sm:$0xff]  ;;  %v591_v22 = vld [vmem:[%s7282_s5 + $0x8] sm:$0xff] }
  0x11   :  { %5745 = vmatprep.subr.bf16.mxu0 %v7292_v0  ;;  %5774 = vmatpush3.bf16.msra.mxu1 %v6346_v3  ;;  %v6462_v27 = vpack.c.bf16 %v591_v22, %v590_v19 }
  0x12   :  { %5775 = vmatprep.subr.bf16.mxu1 %v7292_v0 }
  0x14   :  { %5747 = vmatpush1.bf16.msra.mxu0 %v6224_v17 }
  0x15   :  { %5748 = vmatprep.subr.bf16.mxu0 %v7292_v0 }
  0x18   :  { %5750 = vmatpush1.bf16.msra.mxu0 %v6234_v20 }
  0x19   :  { %5751 = vmatprep.subr.bf16.mxu0 %v7292_v0 }
  0x1c   :  { %5753 = vmatpush1.bf16.msra.mxu0 %v6244_v23 }
  0x1d   :  { %5754 = vmatprep.subr.bf16.mxu0 %v7292_v0 }
  0x20   :  { %5756 = vmatpush1.bf16.msra.mxu0 %v6254_v26 }
  0x21   :  { %5757 = vmatprep.subr.bf16.mxu0 %v7292_v0 }
  0x24   :  { %5759 = vmatpush1.bf16.msra.mxu0 %v6264_v29 }
  0x25   :  { %5760 = vmatprep.subr.bf16.mxu0 %v7292_v0 }
  0x28   :  { %5762 = vmatpush1.bf16.msra.mxu0 %v6274_v32 }
  0x29   :  { %5763 = vmatprep.subr.bf16.mxu0 %v7292_v0 }
  0x2c   :  { %5765 = vmatpush1.bf16.msra.mxu0 %v6284_v35 }
  0x2d   :  { %5766 = vmatprep.subr.bf16.mxu0 %v7292_v0 }
  0x30   :  { %5768 = vmatpush1.bf16.msra.mxu0 %v6294_v38 }
  0x31   :  { %5246 = vmatprep.subr.mxu0 %v7294_v5 }
  0x33   :  { %136 = vmatmul.mubr.f32.vlgmr.msra.gmra.mrb[0].mxu0 %v61_v12  ;;  %v4821_v12 = vld [vmem:[%s7280_s3 + $0x88] sm:$0xff] }
  0x34   :  { %5248 = vmatprep.mubr.msk.f32.mxu0 %vm6116_vm4, %v7294_v5  ;;  %v6361_v15 = vpack.c.bf16 %v4821_v12, %v4820_v11 }
 0x106   :  { %v137_v47 = vpop.f32.mrb[0].mxu0 }
 0x107   :  { %v138_v48 = vadd.f32 %v137_v47, %v6313_v44  ;;  %v139_v49 = vpop.f32.mrb[1].mxu0  ;;  %v6422_v47 = vpack.c.bf16 %v4854_v39, %v4853_v37  ;;  %v4842_v37 = vld [vmem:[%s7280_s3 + $0x38] sm:$0xff] }
 0x108   :  { %v4855_v49 = vld [vmem:[%s7280_s3 + $0x130] sm:$0xff] }
 0x109   :  { %v145_v51 = vrot.slane %v138_v48, 7 }
 0x10b   :  { %v148_v53 = vsel %vm147_vm2, %v7289_v50, %v145_v51  ;;  %v4856_v51 = vld [vmem:[%s7280_s3 + $0x138] sm:$0xff] }
 0x10c   :  { %v6324_v54 = vadd.f32 %v6318_v52, %v148_v53  ;;  %v4832_v53 = vld [vmem:[%s7281_s4 + $0x8] ss:$0 sm:$0xff] }
 0x10e   :  { %v157_v55 = vsel %vm156_vm3, %v6324_v54, 0.0 }
 0x10f   :  { %158 = vadd.xlane.f32.xlu0 %v157_v55  ;;  %v6436_v55 = vpack.c.bf16 %v4856_v51, %v4855_v49  ;;  %v4848_v51 = vld [vmem:[%s7280_s3 + $0xb0] sm:$0xff] }
 0x19c   :  { %v159_v56 = vpop.xlane.xlu0 %158 }
 0x19d   :  { %v161_v57 = vmul.f32 0.03125, %v159_v56 }
 0x19f   :  { %v162_v58 = vsub.f32 %v6324_v54, %v161_v57 }
 0x1a1   :  { %v163_v59 = vmul.f32 %v162_v58, %v162_v58 }
 0x1a3   :  { %v164_v60 = vsel %vm156_vm3, %v163_v59, 0.0 }
 0x1a4   :  { %165 = vadd.xlane.f32.xlu0 %v164_v60 }
 0x231   :  { %v166_v7 = vpop.xlane.xlu0 %165 }
 0x232   :  { %v167_v8 = vmul.f32 0.03125, %v166_v7 }
 0x234   :  { %v168_v10 = vadd.f32 1e-06, %v167_v8 }
 0x236   :  { %6050 = vrsqrt.f32 %v168_v10 }
 0x240   :  { %v6051_v13 = vpop.eup %6050 }
 0x241   :  { %v6363_v16 = vmul.f32 %v6051_v13, %v162_v58 }
 0x243   :  { %5222 = vmatmul.mubr.msk.f32.vlgmr.msra.gmra.mrb[0].mxu1 %vm183_vm5, %v6363_v16 }
 0x244   :  { %5777 = vmatpush3.bf16.msra.mxu1 %v6361_v15  ;;  %5232 = vmatprep.mubr.msk.f32.mxu1 %vm6116_vm4, %v7294_v5 }
 0x245   :  { %5778 = vmatprep.subr.bf16.mxu1 %v7292_v0 }
 0x248   :  { %5780 = vmatpush3.bf16.msra.mxu1 %v6374_v21 }
 0x249   :  { %5781 = vmatprep.subr.bf16.mxu1 %v7292_v0 }
 0x24b   :  { %5233 = vmatmul.mubr.msk.f32.vlgmr.msra.gmra.mrb[2].mxu1 %vm183_vm5, %v6363_v16 }
 0x24c   :  { %5783 = vmatpush3.bf16.msra.mxu1 %v6386_v25  ;;  %5243 = vmatprep.mubr.msk.f32.mxu1 %vm6116_vm4, %v7294_v5 }
 0x24d   :  { %5784 = vmatprep.subr.bf16.mxu1 %v7292_v0 }
 0x250   :  { %5786 = vmatpush3.bf16.msra.mxu1 %v6398_v30 }
 0x251   :  { %5251 = vmatprep.subr.mxu1 %v7294_v5 }
 0x253   :  { %5244 = vmatmul.mubr.msk.f32.vlgmr.msra.gmra.mrb[4].mxu1 %vm183_vm5, %v6363_v16 }
 0x254   :  { %5253 = vmatprep.mubr.msk.f32.mxu1 %vm6116_vm4, %v7294_v5 }
 0x316   :  { %v253_v31 = vpop.f32.mrb[0].mxu1 }
 0x317   :  { %v5223_v33 = vpop.f32.mrb[1].mxu1  ;;  %v254_v48 = vadd.f32 %v4818_v43, %v253_v31  ;;  %v4839_v31 = vld [vmem:[%s7280_s3 + $0x20] sm:$0xff] }
 0x318   :  { %v4840_v33 = vld [vmem:[%s7280_s3 + $0x28] sm:$0xff] }
 0x31e   :  { %v336_v36 = vpop.f32.mrb[2].mxu1 }
 0x31f   :  { %v337_v45 = vadd.f32 %v4825_v34, %v336_v36  ;;  %v5234_v46 = vpop.f32.mrb[3].mxu1  ;;  %v6475_v34 = vpack.c.bf16 %v4840_v33, %v4839_v31  ;;  %v4841_v36 = vld [vmem:[%s7280_s3 + $0x30] sm:$0xff] }
 0x320   :  { %v4846_v46 = vld [vmem:[%s7280_s3 + $0xa0] sm:$0xff] }
 0x321   :  { %5247 = vmatpush3.xpose.msk.msra.mxu0 %vm423_vm6, %v337_v45  ;;  %v6485_v45 = vpack.c.bf16 %v4842_v37, %v4841_v36 }
 0x322   :  { %5802 = vmatprep.subr.bf16.mxu0 %v7292_v0 }
 0x324   :  { %5249 = vmatmul.mubr.msk.f32.vlgmr.msra.gmra.mrb[2].mxu0 %vm423_vm6, %v254_v48  ;;  %v4847_v48 = vld [vmem:[%s7280_s3 + $0xa8] sm:$0xff] }
 0x325   :  { %5804 = vmatpush3.bf16.msra.mxu0 %v6422_v47  ;;  %5293 = vmatprep.mubr.msk.f32.mxu0 %vm6116_vm4, %v7294_v5  ;;  %v6497_v49 = vpack.c.bf16 %v4847_v48, %v4846_v46  ;;  %v6558_v46 = vld [vmem:[%s7283_s9] sm:$0x3] }
 0x326   :  { %v419_v56 = vpop.f32.mrb[4].mxu1  ;;  %5805 = vmatprep.subr.bf16.mxu0 %v7292_v0  ;;  %v6562_v48 = vrot.slane %v6558_v46, %v6301_v41 }
 0x327   :  { %v420_v57 = vadd.f32 %v4832_v53, %v419_v56  ;;  %v5245_v58 = vpop.f32.mrb[5].mxu1  ;;  %v4849_v53 = vld [vmem:[%s7280_s3 + $0xb8] sm:$0xff] }
 0x328   :  { %v6509_v56 = vpack.c.bf16 %v4849_v53, %v4848_v51 }
 0x329   :  { %5252 = vmatpush3.msk.msra.mxu1 %vm516_vm7, %v420_v57  ;;  %5807 = vmatpush3.bf16.msra.mxu0 %v6436_v55 }
 0x32a   :  { %5301 = vmatprep.subr.mxu0 %v7294_v5  ;;  %5787 = vmatprep.subr.bf16.mxu1 %v7292_v0 }
 0x32c   :  { %5294 = vmatmul.mubr.msk.f32.vlgmr.msra.gmra.mrb[4].mxu0 %vm183_vm5, %v6363_v16 }
 0x32d   :  { %5303 = vmatprep.mubr.msk.f32.mxu0 %vm6116_vm4, %v7294_v5 }
 0x3f7   :  { %v496_v59 = vpop.f32.mrb[2].mxu0 }
 0x3f8   :  { %v5250_v60 = vpop.f32.mrb[3].mxu0  ;;  %v501_v61 = vsel %vm500_vm8, %v496_v59, -inf }
 0x3f9   :  { %502 = vmax.xlane.f32.xlu1 %v501_v61  ;;  %v6523_v61 = vld [vmem:[%s7281_s4 + $0x5] ss:$0 sm:$0xff] }
 0x3ff   :  { %v915_v1 = vpop.f32.mrb[4].mxu0 }
 0x400   :  { %v916_v2 = vadd.f32 %v4858_v62, %v915_v1  ;;  %v5295_v7 = vpop.f32.mrb[5].mxu0  ;;  %v6528_v1 = vld [vmem:[%s7281_s4 + $0x1] ss:$0 sm:$0xff] }
 0x402   :  { %5302 = vmatpush3.msk.msra.mxu0 %vm516_vm7, %v916_v2 }
 0x403   :  { %5811 = vmatprep.subr.bf16.mxu0 %v7292_v0 }
 0x486   :  { %v503_v8 = vpop.xlane.xlu1 %502 }
 0x487   :  { %v504_v10 = vsub.f32 %v496_v59, %v503_v8 }
 0x489   :  { %v505_v11 = vmul.f32 1.442695, %v504_v10 }
 0x48b   :  { %6052 = vpow2.f32 %v505_v11 }
 0x495   :  { %v6053_v12 = vpop.eup %6052 }
 0x496   :  { %v507_v13 = vsel %vm500_vm8, %v6053_v12, 0.0 }
 0x497   :  { %508 = vadd.xlane.f32.xlu1 %v507_v13 }
 0x524   :  { %v509_v18 = vpop.xlane.xlu1 %508 }
 0x525   :  { %6054 = vrcp.f32 %v509_v18 }
 0x52f   :  { %v6055_v24 = vpop.eup %6054 }
 0x530   :  { %v511_v28 = vmul.f32 %v6055_v24, %v6053_v12  ;;  %v4864_v24 = vld [vmem:[%s7282_s5 + $0x10] sm:$0xff] }
 0x532   :  { %5254 = vmatmul.mubr.msk.f32.vlgmr.msra.gmra.mrb[6].mxu1 %vm512_vm9, %v511_v28  ;;  %v4865_v28 = vld [vmem:[%s7282_s5 + $0x18] sm:$0xff] }
 0x533   :  { %5789 = vmatpush3.bf16.msra.mxu1 %v6462_v27  ;;  %5260 = vmatprep.mubr.msk.f32.mxu1 %vm6116_vm4, %v7294_v5  ;;  %v6545_v31 = vpack.c.bf16 %v4865_v28, %v4864_v24 }
 0x534   :  { %5790 = vmatprep.subr.bf16.mxu1 %v7292_v0 }
 0x605   :  { %v586_v39 = vpop.f32.mrb[6].mxu1 }
 0x606   :  { %v5255_v43 = vpop.f32.mrb[7].mxu1  ;;  %5261 = vmatmul.mubr.msk.f32.vlgmr.msra.gmra.mrb[8].mxu1 %vm423_vm6, %v586_v39 }
 0x607   :  { %5792 = vmatpush3.bf16.msra.mxu1 %v6475_v34  ;;  %5271 = vmatprep.mubr.msk.f32.mxu1 %vm6116_vm4, %v7294_v5 }
 0x608   :  { %5793 = vmatprep.subr.bf16.mxu1 %v7292_v0 }
 0x60b   :  { %5795 = vmatpush3.bf16.msra.mxu1 %v6485_v45 }
 0x60c   :  { %5796 = vmatprep.subr.bf16.mxu1 %v7292_v0 }
 0x60e   :  { %5272 = vmatmul.mubr.msk.f32.vlgmr.msra.gmra.mrb[10].mxu1 %vm183_vm5, %v6363_v16 }
 0x60f   :  { %5798 = vmatpush3.bf16.msra.mxu1 %v6497_v49  ;;  %5282 = vmatprep.mubr.msk.f32.mxu1 %vm6116_vm4, %v7294_v5 }
 0x610   :  { %5799 = vmatprep.subr.bf16.mxu1 %v7292_v0 }
 0x613   :  { %5801 = vmatpush3.bf16.msra.mxu1 %v6509_v56 }
 0x614   :  { %5296 = vmatprep.subr.mxu1 %v7294_v5 }
 0x616   :  { %5283 = vmatmul.mubr.msk.f32.vlgmr.msra.gmra.mrb[12].mxu1 %vm183_vm5, %v6363_v16 }
 0x617   :  { %5298 = vmatprep.mubr.msk.f32.mxu1 %vm6116_vm4, %v7294_v5 }
 0x6d9   :  { %v661_v57 = vpop.f32.mrb[8].mxu1 }
 0x6da   :  { %v5262_v58 = vpop.f32.mrb[9].mxu1  ;;  %v669_v51 = vadd.f32 %v6562_v48, %v661_v57  ;;  %v1173_v57 = vld [vmem:[%s7284_s6] sm:$0xff] }
 0x6e1   :  { %v749_v59 = vpop.f32.mrb[10].mxu1 }
 0x6e2   :  { %v5273_v60 = vpop.f32.mrb[11].mxu1  ;;  %v750_v7 = vadd.f32 %v6528_v1, %v749_v59 }
 0x6e9   :  { %v832_v62 = vpop.f32.mrb[12].mxu1 }
 0x6ea   :  { %v833_v16 = vadd.f32 %v6523_v61, %v832_v62  ;;  %v5284_v2 = vpop.f32.mrb[13].mxu1 }
 0x6ec   :  { %5297 = vmatpush3.xpose.msk.msra.mxu1 %vm423_vm6, %v833_v16 }
 0x6ed   :  { %5808 = vmatprep.subr.bf16.mxu1 %v7292_v0 }
 0x6ef   :  { %5299 = vmatmul.mubr.msk.f32.vlgmr.msra.gmra.mrb[14].mxu1 %vm423_vm6, %v750_v7 }
 0x6f0   :  { %5310 = vmatprep.mubr.msk.f32.mxu1 %vm6116_vm4, %v7294_v5  ;;  %5810 = vmatpush3.bf16.msra.mxu1 %v6545_v31 }
 0x6f1   :  { %5817 = vmatprep.subr.bf16.mxu1 %v7292_v0 }
 0x7c2   :  { %v991_v8 = vpop.f32.mrb[14].mxu1 }
 0x7c3   :  { %v5300_v10 = vpop.f32.mrb[15].mxu1  ;;  %v995_v11 = vsel %vm500_vm8, %v991_v8, -inf }
 0x7c4   :  { %996 = vmax.xlane.f32.xlu0 %v995_v11  ;;  %v1175_v11 = vld [vmem:[%s7284_s6 + $0x10] sm:$0xff] }
 0x851   :  { %v997_v12 = vpop.xlane.xlu0 %996 }
 0x852   :  { %v998_v13 = vsub.f32 %v991_v8, %v997_v12 }
 0x854   :  { %v999_v18 = vmul.f32 1.442695, %v998_v13  ;;  %v1176_v13 = vld [vmem:[%s7284_s6 + $0x18] sm:$0xff] }
 0x856   :  { %6056 = vpow2.f32 %v999_v18  ;;  %v6587_v18 = vpack.c.bf16 %v1176_v13, %v1175_v11 }
 0x860   :  { %v6057_v19 = vpop.eup %6056 }
 0x861   :  { %v1001_v22 = vsel %vm500_vm8, %v6057_v19, 0.0 }
 0x862   :  { %1002 = vadd.xlane.f32.xlu1 %v1001_v22 }
 0x8ef   :  { %v1003_v33 = vpop.xlane.xlu1 %1002 }
 0x8f0   :  { %6058 = vrcp.f32 %v1003_v33 }
 0x8fa   :  { %v6059_v36 = vpop.eup %6058 }
 0x8fb   :  { %v1005_v37 = vmul.f32 %v6059_v36, %v6057_v19  ;;  %v1262_v36 = vld [vmem:[%s7285_s8] sm:$0xff] }
 0x8fd   :  { %5304 = vmatmul.mubr.msk.f32.vlgmr.msra.gmra.mrb[6].mxu0 %vm512_vm9, %v1005_v37  ;;  %v1263_v37 = vld [vmem:[%s7285_s8 + $0x8] sm:$0xff] }
 0x8fe   :  { %5321 = vmatprep.mubr.msk.f32.mxu0 %vm6116_vm4, %v7294_v5 }
 0x9d0   :  { %v1078_v39 = vpop.f32.mrb[6].mxu0 }
 0x9d1   :  { %v5305_v43 = vpop.f32.mrb[7].mxu0  ;;  %5311 = vmatmul.mubr.msk.f32.vlgmr.msra.gmra.mrb[16].mxu1 %vm423_vm6, %v1078_v39  ;;  %v6601_v39 = vpack.c.bf16 %v1263_v37, %v1262_v36 }
 0x9d2   :  { %5340 = vmatprep.mubr.msk.f32.mxu1 %vm6116_vm4, %v7294_v5  ;;  %v1264_v43 = vld [vmem:[%s7285_s8 + $0x10] sm:$0xff] }
 0x9d3   :  { %5819 = vmatpush3.bf16.msra.mxu1 %v6601_v39 }
 0x9d4   :  { %5820 = vmatprep.subr.bf16.mxu1 %v7292_v0 }
 0xaa4   :  { %v1154_v53 = vpop.f32.mrb[16].mxu1 }
 0xaa5   :  { %v1158_v58 = vadd.f32 %v1154_v53, %v669_v51  ;;  %v5312_v59 = vpop.f32.mrb[17].mxu1  ;;  %v1265_v51 = vld [vmem:[%s7285_s8 + $0x18] sm:$0xff] }
 0xaa6   :  { %v6611_v53 = vpack.c.bf16 %v1265_v51, %v1264_v43  ;;  %v1267_v59 = vld [vmem:[%s7285_s8 + $0x28] sm:$0xff] }
 0xaa7   :  { %v6566_v60 = vadd.f32 %v1158_v58, %v6324_v54  ;;  %v1174_v54 = vld [vmem:[%s7284_s6 + $0x8] sm:$0xff]  ;;  %v1266_v58 = vld [vmem:[%s7285_s8 + $0x20] sm:$0xff] }
 0xaa8   :  { %v6581_v12 = vpack.c.bf16 %v1174_v54, %v1173_v57  ;;  %5822 = vmatpush3.bf16.msra.mxu1 %v6611_v53 }
 0xaa9   :  { %v1160_v62 = vsel %vm156_vm3, %v6566_v60, 0.0  ;;  %5823 = vmatprep.subr.bf16.mxu1 %v7292_v0 }
 0xaaa   :  { %1161 = vadd.xlane.f32.xlu0 %v1160_v62  ;;  %5813 = vmatpush3.bf16.msra.mxu0 %v6581_v12  ;;  %v6621_v62 = vpack.c.bf16 %v1267_v59, %v1266_v58 }
 0xaab   :  { %5814 = vmatprep.subr.bf16.mxu0 %v7292_v0 }
 0xaac   :  { %5825 = vmatpush3.bf16.msra.mxu1 %v6621_v62 }
 0xaad   :  { %5826 = vmatprep.subr.bf16.mxu1 %v7292_v0 }
 0xaae   :  { %5816 = vmatpush3.bf16.msra.mxu0 %v6587_v18 }
 0xaaf   :  { %5829 = vmatprep.subr.bf16.mxu0 %v7292_v0 }
 0xb37   :  { %v1162_v16 = vpop.xlane.xlu0 %1161 }
 0xb38   :  { %v1163_v2 = vmul.f32 0.03125, %v1162_v16  ;;  %v1268_v16 = vld [vmem:[%s7285_s8 + $0x30] sm:$0xff] }
 0xb3a   :  { %v1164_v7 = vsub.f32 %v6566_v60, %v1163_v2  ;;  %v1269_v2 = vld [vmem:[%s7285_s8 + $0x38] sm:$0xff] }
 0xb3c   :  { %v1165_v8 = vmul.f32 %v1164_v7, %v1164_v7 }
 0xb3e   :  { %v1166_v10 = vsel %vm156_vm3, %v1165_v8, 0.0  ;;  %v6638_v8 = vld [vmem:[%s7286_s7] ss:$0 sm:$0xff] }
 0xb3f   :  { %1167 = vadd.xlane.f32.xlu1 %v1166_v10 }
 0xbcc   :  { %v1168_v19 = vpop.xlane.xlu1 %1167 }
 0xbcd   :  { %v1169_v22 = vmul.f32 0.03125, %v1168_v19 }
 0xbcf   :  { %v1170_v24 = vadd.f32 1e-06, %v1169_v22 }
 0xbd1   :  { %6060 = vrsqrt.f32 %v1170_v24 }
 0xbdb   :  { %v6061_v28 = vpop.eup %6060 }
 0xbdc   :  { %v1172_v33 = vmul.f32 %v6061_v28, %v1164_v7  ;;  %v6631_v7 = vpack.c.bf16 %v1269_v2, %v1268_v16  ;;  %v7288_v28 = vsub.s32 1, %v6298_v40 }
 0xbde   :  { %5322 = vmatmul.mubr.msk.f32.vlgmr.msra.gmra.mrb[8].mxu0 %vm183_vm5, %v1172_v33  ;;  %5828 = vmatpush3.bf16.msra.mxu1 %v6631_v7  ;;  %v6648_v33 = vrot.slane %v6558_v46, %v7288_v28  ;;  %v4871_v46 = vld [vmem:[%s7280_s3 + $0x40] sm:$0xff] }
 0xbdf   :  { %5351 = vmatprep.mubr.msk.f32.mxu0 %vm6116_vm4, %v7294_v5  ;;  %5841 = vmatprep.subr.bf16.mxu1 %v7292_v0 }
 0xcb1   :  { %v1253_v10 = vpop.f32.mrb[8].mxu0 }
 0xcb2   :  { %v1254_v57 = vadd.f32 %v6638_v8, %v1253_v10  ;;  %v5323_v54 = vpop.f32.mrb[9].mxu0 }
 0xcb4   :  { %v1258_v11 = vmul.f32 0.70710677, %v1254_v57  ;;  %v1257_v19 = vmul.f32 0.5, %v1254_v57 }
 0xcb6   :  { %6062 = verf.f32 %v1258_v11  ;;  %v4885_v11 = vld [vmem:[%s7280_s3 + $0x140] sm:$0xff] }
 0xcc0   :  { %v6063_v13 = vpop.eup %6062 }
 0xcc1   :  { %v1260_v22 = vadd.f32 1.0, %v6063_v13  ;;  %v4886_v13 = vld [vmem:[%s7280_s3 + $0x148] sm:$0xff] }
 0xcc3   :  { %v1261_v24 = vmul.f32 %v1260_v22, %v1257_v19  ;;  %v6672_v19 = vpack.c.bf16 %v4886_v13, %v4885_v11  ;;  %v4873_v22 = vld [vmem:[%s7280_s3 + $0x50] sm:$0xff] }
 0xcc5   :  { %5341 = vmatmul.mubr.msk.f32.vlgmr.msra.gmra.mrb[18].mxu1 %vm68_vm0, %v1261_v24  ;;  %v4874_v24 = vld [vmem:[%s7280_s3 + $0x58] sm:$0xff] }
 0xcc6   :  { %5373 = vmatprep.mubr.msk.f32.mxu1 %vm6116_vm4, %v7294_v5  ;;  %5843 = vmatpush3.bf16.msra.mxu1 %v6672_v19 }
 0xcc7   :  { %5844 = vmatprep.subr.bf16.mxu1 %v7292_v0 }
 0xd98   :  { %v1343_v36 = vpop.f32.mrb[18].mxu1 }
 0xd99   :  { %v1344_v37 = vadd.f32 %v1343_v36, %v6648_v33  ;;  %v5342_v43 = vpop.f32.mrb[19].mxu1  ;;  %v6683_v36 = vpack.c.bf16 %v4874_v24, %v4873_v22  ;;  %v4880_v22 = vld [vmem:[%s7280_s3 + $0xd0] sm:$0xff]  ;;  %v4881_v24 = vld [vmem:[%s7280_s3 + $0xd8] sm:$0xff] }
 0xd9a   :  { %v4888_v43 = vld [vmem:[%s7280_s3 + $0x158] sm:$0xff] }
 0xd9b   :  { %v6652_v51 = vadd.f32 %v1344_v37, %v6566_v60  ;;  %v4872_v60 = vld [vmem:[%s7280_s3 + $0x48] sm:$0xff]  ;;  %v4887_v37 = vld [vmem:[%s7280_s3 + $0x150] sm:$0xff] }
 0xd9c   :  { %v6664_v54 = vpack.c.bf16 %v4872_v60, %v4871_v46  ;;  %v4879_v46 = vld [vmem:[%s7280_s3 + $0xc8] sm:$0xff] }
 0xd9d   :  { %v1348_v58 = vsel %vm156_vm3, %v6652_v51, 0.0 }
 0xd9e   :  { %1349 = vadd.xlane.f32.xlu0 %v1348_v58  ;;  %5831 = vmatpush3.bf16.msra.mxu0 %v6664_v54  ;;  %v6692_v58 = vpack.c.bf16 %v4888_v43, %v4887_v37  ;;  %v6719_v37 = vpack.c.bf16 %v4881_v24, %v4880_v22  ;;  %v6748_v22 = vld [vmem:[%s7281_s4 + $0x2] ss:$0 sm:$0xff] }
 0xd9f   :  { %5832 = vmatprep.subr.bf16.mxu0 %v7292_v0  ;;  %7311 = vst [vmem:[#allocation4_spill] sm:$0xff] %v6748_v22 }
 0xda0   :  { %5846 = vmatpush3.bf16.msra.mxu1 %v6692_v58 }
 0xda1   :  { %5381 = vmatprep.subr.mxu1 %v7294_v5 }
 0xda2   :  { %5834 = vmatpush3.bf16.msra.mxu0 %v6683_v36 }
 0xda3   :  { %5835 = vmatprep.subr.bf16.mxu0 %v7292_v0 }
 0xe2b   :  { %v1350_v59 = vpop.xlane.xlu0 %1349 }
 0xe2c   :  { %v1351_v16 = vmul.f32 0.03125, %v1350_v59 }
 0xe2e   :  { %v1352_v2 = vsub.f32 %v6652_v51, %v1351_v16 }
 0xe30   :  { %v1353_v10 = vmul.f32 %v1352_v2, %v1352_v2 }
 0xe32   :  { %v1354_v57 = vsel %vm156_vm3, %v1353_v10, 0.0 }
 0xe33   :  { %1355 = vadd.xlane.f32.xlu1 %v1354_v57  ;;  %v4878_v57 = vld [vmem:[%s7280_s3 + $0xc0] sm:$0xff] }
 0xe34   :  { %v6704_v11 = vpack.c.bf16 %v4879_v46, %v4878_v57  ;;  %v6743_v46 = vld [vmem:[%s7281_s4 + $0x6] ss:$0 sm:$0xff] }
 0xe35   :  { %7310 = vst [vmem:[#allocation3_spill] sm:$0xff] %v6743_v46 }
 0xec0   :  { %v1356_v59 = vpop.xlane.xlu1 %1355 }
 0xec1   :  { %v1357_v16 = vmul.f32 0.03125, %v1356_v59 }
 0xec3   :  { %v1358_v10 = vadd.f32 1e-06, %v1357_v16 }
 0xec5   :  { %6064 = vrsqrt.f32 %v1358_v10 }
 0xecf   :  { %v6065_v60 = vpop.eup %6064 }
 0xed0   :  { %v6706_v13 = vmul.f32 %v6065_v60, %v1352_v2  ;;  %v6735_v2 = vld [vmem:[%s7281_s4 + $0xa] ss:$0 sm:$0xff] }
 0xed2   :  { %5352 = vmatmul.mubr.msk.f32.vlgmr.msra.gmra.mrb[10].mxu0 %vm183_vm5, %v6706_v13  ;;  %5374 = vmatmul.mubr.msk.f32.vlgmr.msra.gmra.mrb[20].mxu1 %vm183_vm5, %v6706_v13 }
 0xed3   :  { %5837 = vmatpush3.bf16.msra.mxu0 %v6704_v11  ;;  %5362 = vmatprep.mubr.msk.f32.mxu0 %vm6116_vm4, %v7294_v5 }
 0xed4   :  { %5838 = vmatprep.subr.bf16.mxu0 %v7292_v0  ;;  %5383 = vmatprep.mubr.msk.f32.mxu1 %vm6116_vm4, %v7294_v5 }
 0xed7   :  { %5840 = vmatpush3.bf16.msra.mxu0 %v6719_v37 }
 0xed8   :  { %5376 = vmatprep.subr.mxu0 %v7294_v5 }
 0xeda   :  { %5363 = vmatmul.mubr.msk.f32.vlgmr.msra.gmra.mrb[12].mxu0 %vm183_vm5, %v6706_v13 }
 0xedb   :  { %5378 = vmatprep.mubr.msk.f32.mxu0 %vm6116_vm4, %v7294_v5 }
 0xfa5   :  { %v1445_v43 = vpop.f32.mrb[10].mxu0  ;;  %v1611_v59 = vpop.f32.mrb[20].mxu1 }
 0xfa6   :  { %v1612_v16 = vadd.f32 %v6735_v2, %v1611_v59  ;;  %v5353_v10 = vpop.f32.mrb[11].mxu0  ;;  %v5375_v57 = vpop.f32.mrb[21].mxu1 }
 0xfa8   :  { %5382 = vmatpush3.msk.msra.mxu1 %vm516_vm7, %v1612_v16  ;;  %v1446_v16 = vadd.f32 %v6748_v22, %v1445_v43  ;;  %v4896_v43 = vld [vmem:[%s7282_s5 + $0x20] sm:$0xff] }
 0xfa9   :  { %5850 = vmatprep.subr.bf16.mxu1 %v7292_v0 }
 0xfad   :  { %v1528_v60 = vpop.f32.mrb[12].mxu0 }
 0xfae   :  { %v1529_v24 = vadd.f32 %v6743_v46, %v1528_v60  ;;  %v5364_v59 = vpop.f32.mrb[13].mxu0 }
 0xfb0   :  { %5377 = vmatpush3.xpose.msk.msra.mxu0 %vm423_vm6, %v1529_v24 }
 0xfb1   :  { %5847 = vmatprep.subr.bf16.mxu0 %v7292_v0 }
 0xfb3   :  { %5379 = vmatmul.mubr.msk.f32.vlgmr.msra.gmra.mrb[14].mxu0 %vm423_vm6, %v1446_v16  ;;  %v4897_v16 = vld [vmem:[%s7282_s5 + $0x28] sm:$0xff] }
 0xfb4   :  { %5390 = vmatprep.mubr.msk.f32.mxu0 %vm6116_vm4, %v7294_v5 }
0x1086   :  { %v1687_v10 = vpop.f32.mrb[14].mxu0 }
0x1087   :  { %v5380_v57 = vpop.f32.mrb[15].mxu0  ;;  %v1691_v28 = vsel %vm500_vm8, %v1687_v10, -inf }
0x1088   :  { %1692 = vmax.xlane.f32.xlu0 %v1691_v28  ;;  %v6765_v57 = vpack.c.bf16 %v4897_v16, %v4896_v43  ;;  %v4900_v28 = vld [vmem:[%s7280_s3 + $0x68] sm:$0xff]  ;;  %v4901_v43 = vld [vmem:[%s7280_s3 + $0x70] sm:$0xff]  ;;  %v4902_v16 = vld [vmem:[%s7280_s3 + $0x78] sm:$0xff] }
0x108a   :  { %7312 = vst [vmem:[#allocation5_spill] sm:$0xff] %v6765_v57  ;;  %5849 = vmatpush3.bf16.msra.mxu0 %v6765_v57 }
0x108b   :  { %5856 = vmatprep.subr.bf16.mxu0 %v7292_v0 }
0x1115   :  { %v1693_v50 = vpop.xlane.xlu0 %1692 }
0x1116   :  { %v1694_v40 = vsub.f32 %v1687_v10, %v1693_v50  ;;  %v4899_v50 = vld [vmem:[%s7280_s3 + $0x60] sm:$0xff] }
0x1118   :  { %v1695_v60 = vmul.f32 1.442695, %v1694_v40 }
0x111a   :  { %6066 = vpow2.f32 %v1695_v60  ;;  %v6775_v60 = vpack.c.bf16 %v4900_v28, %v4899_v50  ;;  %v4914_v50 = vld [vmem:[%s7280_s3 + $0x168] sm:$0xff] }
0x111c   :  { %7313 = vst [vmem:[#allocation6_spill] sm:$0xff] %v6775_v60 }
0x1124   :  { %v6067_v59 = vpop.eup %6066 }
0x1125   :  { %v1697_v24 = vsel %vm500_vm8, %v6067_v59, 0.0 }
0x1126   :  { %1698 = vadd.xlane.f32.xlu1 %v1697_v24 }
0x11b3   :  { %v1699_v40 = vpop.xlane.xlu1 %1698 }
0x11b4   :  { %6068 = vrcp.f32 %v1699_v40  ;;  %v6785_v40 = vpack.c.bf16 %v4902_v16, %v4901_v43  ;;  %v4906_v16 = vld [vmem:[%s7280_s3 + $0xe0] sm:$0xff] }
0x11b6   :  { %7314 = vst [vmem:[#allocation7_spill] sm:$0xff] %v6785_v40 }
0x11be   :  { %v6069_v10 = vpop.eup %6068 }
0x11bf   :  { %v1701_v24 = vmul.f32 %v6069_v10, %v6067_v59  ;;  %v4913_v59 = vld [vmem:[%s7280_s3 + $0x160] sm:$0xff]  ;;  %v4915_v10 = vld [vmem:[%s7280_s3 + $0x170] sm:$0xff] }
0x11c0   :  { %v6797_v28 = vpack.c.bf16 %v4914_v50, %v4913_v59  ;;  %v4907_v59 = vld [vmem:[%s7280_s3 + $0xe8] sm:$0xff] }
0x11c1   :  { %5384 = vmatmul.mubr.msk.f32.vlgmr.msra.gmra.mrb[22].mxu1 %vm512_vm9, %v1701_v24  ;;  %v4916_v24 = vld [vmem:[%s7280_s3 + $0x178] sm:$0xff]  ;;  %v6826_v50 = vpack.c.bf16 %v4907_v59, %v4906_v16  ;;  %v7320_v16 = vmov 0.0|0.0  }
0x11c2   :  { %5852 = vmatpush3.bf16.msra.mxu1 %v6775_v60  ;;  %5401 = vmatprep.mubr.msk.f32.mxu1 %vm6116_vm4, %v7294_v5  ;;  %7315 = vst [vmem:[#allocation8_spill] sm:$0xff] %v6797_v28  ;;  %v6809_v43 = vpack.c.bf16 %v4916_v24, %v4915_v10  ;;  %v4908_v10 = vld [vmem:[%s7280_s3 + $0xf0] sm:$0xff]  ;;  %v4909_v24 = vld [vmem:[%s7280_s3 + $0xf8] sm:$0xff] }
0x11c3   :  { %5853 = vmatprep.subr.bf16.mxu1 %v7292_v0  ;;  %7317 = vst [vmem:[#allocation10_spill] sm:$0xff] %v6826_v50 }
0x11c4   :  { %7316 = vst [vmem:[#allocation9_spill] sm:$0xff] %v6809_v43 }
0x11c6   :  { %5855 = vmatpush3.bf16.msra.mxu1 %v6785_v40 }
0x11c7   :  { %5862 = vmatprep.subr.bf16.mxu1 %v7292_v0 }
0x11c9   :  { %5402 = vmatmul.mubr.msk.f32.vlgmr.msra.gmra.mrb[24].mxu1 %vm183_vm5, %v6706_v13 }
0x11ca   :  { %5864 = vmatpush3.bf16.msra.mxu1 %v6797_v28  ;;  %5423 = vmatprep.mubr.msk.f32.mxu1 %vm6116_vm4, %v7294_v5  ;;  %v7319_v28 = vmov 0.0  }
0x11cb   :  { %5865 = vmatprep.subr.bf16.mxu1 %v7292_v0 }
0x11ce   :  { %5867 = vmatpush3.bf16.msra.mxu1 %v6809_v43  ;;  %v6836_v43 = vpack.c.bf16 %v4909_v24, %v4908_v10 }
0x11cf   :  { %5868 = vmatprep.subr.bf16.mxu1 %v7292_v0 }
0x11d0   :  { %7318 = vst [vmem:[#allocation11_spill] sm:$0xff] %v6836_v43 }
0x11d1   :  { %5424 = vmatmul.mubr.msk.f32.vlgmr.msra.gmra.mrb[26].mxu1 %vm183_vm5, %v6706_v13 }
0x11d2   :  { %5440 = vmatprep.mubr.msk.f32.mxu1 %vm6116_vm4, %v7294_v5 }
0x1294   :  { %v1774_v0 = vpop.f32.mrb[22].mxu1 }
0x1295   :  { %v5385_v5 = vpop.f32.mrb[23].mxu1  ;;  %5391 = vmatmul.mubr.msk.f32.vlgmr.msra.gmra.mrb[16].mxu0 %vm423_vm6, %v1774_v0 }
0x1296   :  { %5858 = vmatpush3.bf16.msra.mxu0 %v6826_v50  ;;  %5412 = vmatprep.mubr.msk.f32.mxu0 %vm6116_vm4, %v7319_v28  ;;  %v6850_v50 = vld [vmem:[%s7281_s4 + $0x7] ss:$0 sm:$0xff] }
0x1297   :  { %5859 = vmatprep.subr.bf16.mxu0 %v7320_v16  ;;  %7321 = vst [vmem:[#allocation12_spill] sm:$0xff] %v6850_v50 }
0x129a   :  { %5861 = vmatpush3.bf16.msra.mxu0 %v6836_v43 }
0x129b   :  { %5426 = vmatprep.subr.mxu0 %v7319_v28 }
0x129c   :  { %v1938_v59 = vpop.f32.mrb[24].mxu1 }
0x129d   :  { %v5403_v40 = vpop.f32.mrb[25].mxu1  ;;  %5413 = vmatmul.mubr.msk.f32.vlgmr.msra.gmra.mrb[18].mxu0 %vm183_vm5, %v6706_v13 }
0x129e   :  { %5428 = vmatprep.mubr.msk.f32.mxu0 %vm6116_vm4, %v7319_v28  ;;  %v6855_v40 = vld [vmem:[%s7281_s4 + $0x3] ss:$0 sm:$0xff] }
0x129f   :  { %7322 = vst [vmem:[#allocation13_spill] sm:$0xff] %v6855_v40 }
0x12a4   :  { %v2104_v0 = vpop.f32.mrb[26].mxu1 }
0x12a5   :  { %v5425_v5 = vpop.f32.mrb[27].mxu1 }
0x12a6   :  { %v6861_v5 = vld [vmem:[%s7281_s4 + $0xb] ss:$0 sm:$0xff] }
0x12a7   :  { %7323 = vst [vmem:[#allocation14_spill] sm:$0xff] %v6861_v5  ;;  %v2105_v57 = vadd.f32 %v6861_v5, %v2104_v0 }
0x1368   :  { %v1850_v10 = vpop.f32.mrb[16].mxu0 }
0x1369   :  { %v5392_v24 = vpop.f32.mrb[17].mxu0 }
0x136a   :  { %v1939_v24 = vadd.f32 %v6855_v40, %v1938_v59 }
0x1370   :  { %v2021_v43 = vpop.f32.mrb[18].mxu0 }
0x1371   :  { %v2022_v13 = vadd.f32 %v6850_v50, %v2021_v43  ;;  %v5414_v60 = vpop.f32.mrb[19].mxu0 }
0x1373   :  { %5427 = vmatpush3.xpose.msk.msra.mxu0 %vm423_vm6, %v2022_v13 }
0x1374   :  { %5431 = vmatprep.subr.mxu0 %v7319_v28 }
0x1376   :  { %5429 = vmatmul.mubr.msk.f32.vlgmr.msra.gmra.mrb[20].mxu0 %vm423_vm6, %v1939_v24  ;;  %v4925_v24 = vld [vmem:[%s7282_s5 + $0x38] sm:$0xff] }
0x1377   :  { %5432 = vmatpush3.msk.msra.mxu0 %vm516_vm7, %v2105_v57  ;;  %5433 = vmatprep.mubr.msk.f32.mxu0 %vm6116_vm4, %v7319_v28  ;;  %v4924_v57 = vld [vmem:[%s7282_s5 + $0x30] sm:$0xff] }
0x1378   :  { %5871 = vmatprep.subr.bf16.mxu0 %v7320_v16 }
0x1449   :  { %v2180_v60 = vpop.f32.mrb[20].mxu0 }
0x144a   :  { %v5430_v43 = vpop.f32.mrb[21].mxu0  ;;  %v2184_v50 = vsel %vm500_vm8, %v2180_v60, -inf }
0x144b   :  { %2185 = vmax.xlane.f32.xlu0 %v2184_v50  ;;  %v6880_v43 = vpack.c.bf16 %v4925_v24, %v4924_v57 }
0x144d   :  { %7324 = vst [vmem:[#allocation15_spill] sm:$0xff] %v6880_v43  ;;  %5870 = vmatpush3.bf16.msra.mxu1 %v6880_v43 }
0x144e   :  { %5877 = vmatprep.subr.bf16.mxu1 %v7320_v16 }
0x14d8   :  { %v2186_v13 = vpop.xlane.xlu0 %2185 }
0x14d9   :  { %v2187_v59 = vsub.f32 %v2180_v60, %v2186_v13 }
0x14db   :  { %v2188_v40 = vmul.f32 1.442695, %v2187_v59 }
0x14dd   :  { %6070 = vpow2.f32 %v2188_v40 }
0x14e7   :  { %v6071_v22 = vpop.eup %6070 }
0x14e8   :  { %v2190_v0 = vsel %vm500_vm8, %v6071_v22, 0.0 }
0x14e9   :  { %2191 = vadd.xlane.f32.xlu1 %v2190_v0  ;;  %v6893_v0 = vld [vmem:[%s7283_s9 + $0x2] sm:$0x3] }
0x1576   :  { %v2192_v50 = vpop.xlane.xlu1 %2191 }
0x1577   :  { %6072 = vrcp.f32 %v2192_v50 }
0x1581   :  { %v6073_v40 = vpop.eup %6072 }
0x1582   :  { %v2194_v60 = vmul.f32 %v6073_v40, %v6071_v22  ;;  %v6897_v22 = vrot.slane %v6893_v0, %v6301_v41 }
0x1584   :  { %5434 = vmatmul.mubr.msk.f32.vlgmr.msra.gmra.mrb[22].mxu0 %vm512_vm9, %v2194_v60  ;;  %v1858_v57 = vadd.f32 %v6897_v22, %v1850_v10  ;;  %v4927_v10 = vld [vmem:[%s7284_s6 + $0x20] sm:$0xff] }
0x1585   :  { %5451 = vmatprep.mubr.msk.f32.mxu0 %vm6116_vm4, %v7319_v28 }
0x1657   :  { %v2267_v13 = vpop.f32.mrb[22].mxu0 }
0x1658   :  { %v5435_v59 = vpop.f32.mrb[23].mxu0  ;;  %5441 = vmatmul.mubr.msk.f32.vlgmr.msra.gmra.mrb[28].mxu1 %vm423_vm6, %v2267_v13 }
0x1659   :  { %5470 = vmatprep.mubr.msk.f32.mxu1 %vm6116_vm4, %v7319_v28 }
0x172b   :  { %v2343_v24 = vpop.f32.mrb[28].mxu1 }
0x172c   :  { %v2347_v50 = vadd.f32 %v2343_v24, %v1858_v57  ;;  %v5442_v40 = vpop.f32.mrb[29].mxu1  ;;  %v4929_v57 = vld [vmem:[%s7284_s6 + $0x30] sm:$0xff] }
0x172e   :  { %v6901_v60 = vadd.f32 %v2347_v50, %v6652_v51  ;;  %v4928_v51 = vld [vmem:[%s7284_s6 + $0x28] sm:$0xff] }
0x172f   :  { %v6916_v24 = vpack.c.bf16 %v4928_v51, %v4927_v10 }
0x1730   :  { %v2349_v13 = vsel %vm156_vm3, %v6901_v60, 0.0 }
0x1731   :  { %2350 = vadd.xlane.f32.xlu0 %v2349_v13  ;;  %5873 = vmatpush3.bf16.msra.mxu0 %v6916_v24 }
0x1732   :  { %5874 = vmatprep.subr.bf16.mxu0 %v7320_v16 }
0x17be   :  { %v2351_v59 = vpop.xlane.xlu0 %2350 }
0x17bf   :  { %v2352_v5 = vmul.f32 0.03125, %v2351_v59  ;;  %v4943_v59 = vld [vmem:[%s7278_s0 + $0x8] sm:$0xff] }
0x17c0   :  { %v2566_v10 = vcombine.high %v4943_v59, %v4943_v59 }
0x17c1   :  { %v2353_v43 = vsub.f32 %v6901_v60, %v2352_v5  ;;  %v4930_v5 = vld [vmem:[%s7284_s6 + $0x38] sm:$0xff] }
0x17c3   :  { %v2354_v46 = vmul.f32 %v2353_v43, %v2353_v43 }
0x17c5   :  { %v2355_v41 = vsel %vm156_vm3, %v2354_v46, 0.0  ;;  %v6922_v46 = vpack.c.bf16 %v4930_v5, %v4929_v57 }
0x17c6   :  { %2356 = vadd.xlane.f32.xlu1 %v2355_v41 }
0x17c7   :  { %5876 = vmatpush3.bf16.msra.mxu0 %v6922_v46 }
0x17c8   :  { %5889 = vmatprep.subr.bf16.mxu0 %v7320_v16 }
0x1853   :  { %v2357_v50 = vpop.xlane.xlu1 %2356 }
0x1854   :  { %v2358_v40 = vmul.f32 0.03125, %v2357_v50 }
0x1856   :  { %v2359_v13 = vadd.f32 1e-06, %v2358_v40 }
0x1858   :  { %6074 = vrsqrt.f32 %v2359_v13 }
0x1862   :  { %v6075_v41 = vpop.eup %6074 }
0x1863   :  { %v2361_v51 = vmul.f32 %v6075_v41, %v2353_v43 }
0x1865   :  { %5452 = vmatmul.mubr.msk.f32.vlgmr.msra.gmra.mrb[24].mxu0 %vm183_vm5, %v2361_v51 }
0x1866   :  { %5891 = vmatpush1.bf16.msra.mxu0 %v6184_v4  ;;  %4944 = vmatprep.mubr.msk.f32.mxu0 %vm68_vm0, %v2566_v10  ;;  %v4934_v4 = vld [vmem:[%s7285_s8 + $0x40] sm:$0xff] }
0x1867   :  { %5892 = vmatprep.subr.bf16.mxu0 %v7320_v16 }
0x186a   :  { %5894 = vmatpush1.bf16.msra.mxu0 %v6190_v6  ;;  %v4935_v6 = vld [vmem:[%s7285_s8 + $0x48] sm:$0xff] }
0x186b   :  { %5895 = vmatprep.subr.bf16.mxu0 %v7320_v16 }
0x186e   :  { %5897 = vmatpush1.bf16.msra.mxu0 %v6200_v9  ;;  %v6968_v9 = vpack.c.bf16 %v4935_v6, %v4934_v4  ;;  %v7325_v6 = vrot.slane %v6306_v42, 1 }
0x186f   :  { %5898 = vmatprep.subr.bf16.mxu0 %v7320_v16 }
0x1870   :  { %5879 = vmatpush3.bf16.msra.mxu1 %v6968_v9 }
0x1871   :  { %5880 = vmatprep.subr.bf16.mxu1 %v7320_v16 }
0x1872   :  { %5900 = vmatpush1.bf16.msra.mxu0 %v6213_v14  ;;  %v4936_v14 = vld [vmem:[%s7285_s8 + $0x50] sm:$0xff] }
0x1873   :  { %5901 = vmatprep.subr.bf16.mxu0 %v7320_v16 }
0x1876   :  { %5903 = vmatpush1.bf16.msra.mxu0 %v6224_v17  ;;  %v4937_v17 = vld [vmem:[%s7285_s8 + $0x58] sm:$0xff] }
0x1877   :  { %5904 = vmatprep.subr.bf16.mxu0 %v7320_v16 }
0x187a   :  { %5906 = vmatpush1.bf16.msra.mxu0 %v6234_v20  ;;  %v6978_v20 = vpack.c.bf16 %v4937_v17, %v4936_v14 }
0x187b   :  { %5907 = vmatprep.subr.bf16.mxu0 %v7320_v16 }
0x187c   :  { %5882 = vmatpush3.bf16.msra.mxu1 %v6978_v20 }
0x187d   :  { %5883 = vmatprep.subr.bf16.mxu1 %v7320_v16 }
0x187e   :  { %5909 = vmatpush1.bf16.msra.mxu0 %v6244_v23  ;;  %v4938_v23 = vld [vmem:[%s7285_s8 + $0x60] sm:$0xff] }
0x187f   :  { %5910 = vmatprep.subr.bf16.mxu0 %v7320_v16 }
0x1882   :  { %5912 = vmatpush1.bf16.msra.mxu0 %v6254_v26  ;;  %v4939_v26 = vld [vmem:[%s7285_s8 + $0x68] sm:$0xff] }
0x1883   :  { %5913 = vmatprep.subr.bf16.mxu0 %v7320_v16 }
0x1886   :  { %5915 = vmatpush1.bf16.msra.mxu0 %v6264_v29  ;;  %v6988_v29 = vpack.c.bf16 %v4939_v26, %v4938_v23 }
0x1887   :  { %5916 = vmatprep.subr.bf16.mxu0 %v7320_v16 }
0x1888   :  { %5885 = vmatpush3.bf16.msra.mxu1 %v6988_v29 }
0x1889   :  { %5886 = vmatprep.subr.bf16.mxu1 %v7320_v16 }
0x188a   :  { %5918 = vmatpush1.bf16.msra.mxu0 %v6274_v32  ;;  %v4940_v32 = vld [vmem:[%s7285_s8 + $0x70] sm:$0xff] }
0x188b   :  { %5919 = vmatprep.subr.bf16.mxu0 %v7320_v16 }
0x188e   :  { %5921 = vmatpush1.bf16.msra.mxu0 %v6284_v35  ;;  %v4941_v35 = vld [vmem:[%s7285_s8 + $0x78] sm:$0xff] }
0x188f   :  { %5922 = vmatprep.subr.bf16.mxu0 %v7320_v16 }
0x1892   :  { %5924 = vmatpush1.bf16.msra.mxu0 %v6294_v38  ;;  %v6998_v38 = vpack.c.bf16 %v4941_v35, %v4940_v32 }
0x1893   :  { %5952 = vmatprep.subr.bf16.mxu0 %v7320_v16 }
0x1894   :  { %5888 = vmatpush3.bf16.msra.mxu1 %v6998_v38 }
0x1895   :  { %2634 = vmatmul.mubr.f32.vlgmr.msra.gmra.mrb[26].mxu0 %v4943_v59  ;;  %5925 = vmatprep.subr.bf16.mxu1 %v7320_v16 }
0x1896   :  { %5954 = vmatpush3.bf16.msra.mxu0 %v6497_v49  ;;  %5542 = vmatprep.mubr.msk.f32.mxu0 %vm6116_vm4, %v7319_v28  ;;  %v7005_v49 = vld [vmem:[%s7286_s7 + $0x1] ss:$0 sm:$0xff] }
0x1897   :  { %5955 = vmatprep.subr.bf16.mxu0 %v7320_v16 }
0x189a   :  { %5957 = vmatpush3.bf16.msra.mxu0 %v6509_v56 }
0x189b   :  { %5556 = vmatprep.subr.mxu0 %v7319_v28 }
0x1938   :  { %v2444_v56 = vpop.f32.mrb[24].mxu0 }
0x1939   :  { %v2445_v43 = vadd.f32 %v7005_v49, %v2444_v56  ;;  %v5453_v57 = vpop.f32.mrb[25].mxu0 }
0x193b   :  { %v2449_v5 = vmul.f32 0.70710677, %v2445_v43  ;;  %v2448_v40 = vmul.f32 0.5, %v2445_v43 }
0x193d   :  { %6076 = verf.f32 %v2449_v5 }
0x1947   :  { %v6077_v50 = vpop.eup %6076 }
0x1948   :  { %v2451_v13 = vadd.f32 1.0, %v6077_v50 }
0x194a   :  { %v2452_v59 = vmul.f32 %v2451_v13, %v2448_v40 }
0x194c   :  { %5471 = vmatmul.mubr.msk.f32.vlgmr.msra.gmra.mrb[30].mxu1 %vm68_vm0, %v2452_v59 }
0x194d   :  { %5927 = vmatpush3.bf16.msra.mxu1 %v6336_v63  ;;  %5481 = vmatprep.mubr.msk.f32.mxu1 %vm6116_vm4, %v7319_v28 }
0x194e   :  { %5928 = vmatprep.subr.bf16.mxu1 %v7320_v16 }
0x1951   :  { %5930 = vmatpush3.bf16.msra.mxu1 %v6346_v3 }
0x1952   :  { %5931 = vmatprep.subr.bf16.mxu1 %v7320_v16 }
0x1968   :  { %v2635_v41 = vpop.f32.mrb[26].mxu0 }
0x1969   :  { %v2636_v10 = vadd.f32 %v2635_v41, %v6313_v44  ;;  %v2637_v51 = vpop.f32.mrb[27].mxu0 }
0x196b   :  { %v2640_v4 = vrot.slane %v2636_v10, 7  ;;  %v6111_v10 = vld [vmem:[%s7281_s4] ss:$0 sm:$0xff] }
0x196d   :  { %v2642_v14 = vsel %vm147_vm2, %v7325_v6, %v2640_v4  ;;  %v6112_v4 = vld [vmem:[%s7281_s4 + $0x8] ss:$0 sm:$0xff] }
0x196e   :  { %v7020_v63 = vadd.f32 %v2642_v14, %v6318_v52 }
0x1970   :  { %v2644_v17 = vsel %vm156_vm3, %v7020_v63, 0.0 }
0x1971   :  { %2645 = vadd.xlane.f32.xlu0 %v2644_v17 }
0x19fe   :  { %v2646_v23 = vpop.xlane.xlu0 %2645 }
0x19ff   :  { %v2647_v3 = vmul.f32 0.03125, %v2646_v23 }
0x1a01   :  { %v2648_v26 = vsub.f32 %v7020_v63, %v2647_v3 }
0x1a03   :  { %v2649_v32 = vmul.f32 %v2648_v26, %v2648_v26 }
0x1a05   :  { %v2650_v44 = vsel %vm156_vm3, %v2649_v32, 0.0 }
0x1a06   :  { %2651 = vadd.xlane.f32.xlu1 %v2650_v44 }
0x1a1f   :  { %v7026_v35 = vpop.f32.mrb[30].mxu1 }
0x1a20   :  { %v5472_v42 = vpop.f32.mrb[31].mxu1 }
0x1a93   :  { %v2652_v56 = vpop.xlane.xlu1 %2651 }
0x1a94   :  { %v2653_v43 = vmul.f32 0.03125, %v2652_v56 }
0x1a96   :  { %v2654_v57 = vadd.f32 1e-06, %v2653_v43 }
0x1a98   :  { %6078 = vrsqrt.f32 %v2654_v57 }
0x1aa2   :  { %v6079_v52 = vpop.eup %6078 }
0x1aa3   :  { %v7028_v5 = vmul.f32 %v6079_v52, %v2648_v26 }
0x1aa5   :  { %5482 = vmatmul.mubr.msk.f32.vlgmr.msra.gmra.mrb[32].mxu1 %vm183_vm5, %v7028_v5  ;;  %5543 = vmatmul.mubr.msk.f32.vlgmr.msra.gmra.mrb[28].mxu0 %vm183_vm5, %v7028_v5 }
0x1aa6   :  { %5933 = vmatpush3.bf16.msra.mxu1 %v6361_v15  ;;  %5492 = vmatprep.mubr.msk.f32.mxu1 %vm6116_vm4, %v7319_v28 }
0x1aa7   :  { %5934 = vmatprep.subr.bf16.mxu1 %v7320_v16  ;;  %5558 = vmatprep.mubr.msk.f32.mxu0 %vm6116_vm4, %v7319_v28 }
0x1aaa   :  { %5936 = vmatpush3.bf16.msra.mxu1 %v6374_v21 }
0x1aab   :  { %5937 = vmatprep.subr.bf16.mxu1 %v7320_v16 }
0x1aad   :  { %5493 = vmatmul.mubr.msk.f32.vlgmr.msra.gmra.mrb[34].mxu1 %vm183_vm5, %v7028_v5 }
0x1aae   :  { %5939 = vmatpush3.bf16.msra.mxu1 %v6386_v25  ;;  %5503 = vmatprep.mubr.msk.f32.mxu1 %vm6116_vm4, %v7319_v28 }
0x1aaf   :  { %5940 = vmatprep.subr.bf16.mxu1 %v7320_v16 }
0x1ab2   :  { %5942 = vmatpush3.bf16.msra.mxu1 %v6398_v30  ;;  %v6110_v30 = vld [vmem:[%s7281_s4 + $0x4] ss:$0 sm:$0xff] }
0x1ab3   :  { %5506 = vmatprep.subr.mxu1 %v7319_v28 }
0x1ab5   :  { %5504 = vmatmul.mubr.msk.f32.vlgmr.msra.gmra.mrb[36].mxu1 %vm183_vm5, %v7028_v5 }
0x1ab6   :  { %5508 = vmatprep.mubr.msk.f32.mxu1 %vm6116_vm4, %v7319_v28 }
0x1b78   :  { %v2726_v15 = vpop.f32.mrb[32].mxu1  ;;  %v3243_v21 = vpop.f32.mrb[28].mxu0 }
0x1b79   :  { %v3244_v50 = vadd.f32 %v6523_v61, %v3243_v21  ;;  %v5483_v25 = vpop.f32.mrb[33].mxu1  ;;  %v5544_v40 = vpop.f32.mrb[29].mxu0  ;;  %v2727_v61 = vadd.f32 %v6111_v10, %v2726_v15 }
0x1b7b   :  { %5557 = vmatpush3.xpose.msk.msra.mxu0 %vm423_vm6, %v3244_v50 }
0x1b7c   :  { %5561 = vmatprep.subr.mxu0 %v7319_v28 }
0x1b80   :  { %v2796_v13 = vpop.f32.mrb[34].mxu1 }
0x1b81   :  { %v2797_v59 = vadd.f32 %v6110_v30, %v2796_v13  ;;  %v5494_v41 = vpop.f32.mrb[35].mxu1 }
0x1b83   :  { %5507 = vmatpush3.xpose.msk.msra.mxu1 %vm423_vm6, %v2797_v59 }
0x1b84   :  { %5511 = vmatprep.subr.mxu1 %v7319_v28 }
0x1b86   :  { %5509 = vmatmul.mubr.msk.f32.vlgmr.msra.gmra.mrb[38].mxu1 %vm423_vm6, %v2727_v61 }
0x1b87   :  { %5513 = vmatprep.mubr.msk.f32.mxu1 %vm6116_vm4, %v7319_v28 }
0x1b88   :  { %v2866_v51 = vpop.f32.mrb[36].mxu1 }
0x1b89   :  { %v2867_v6 = vadd.f32 %v6112_v4, %v2866_v51  ;;  %v5505_v14 = vpop.f32.mrb[37].mxu1 }
0x1b8b   :  { %5512 = vmatpush3.msk.msra.mxu1 %vm516_vm7, %v2867_v6 }
0x1b8c   :  { %5943 = vmatprep.subr.bf16.mxu1 %v7320_v16 }
0x1c59   :  { %v2942_v17 = vpop.f32.mrb[38].mxu1 }
0x1c5a   :  { %v5510_v23 = vpop.f32.mrb[39].mxu1  ;;  %v2946_v3 = vsel %vm500_vm8, %v2942_v17, -inf }
0x1c5b   :  { %2947 = vmax.xlane.f32.xlu0 %v2946_v3 }
0x1ce8   :  { %v2948_v26 = vpop.xlane.xlu0 %2947 }
0x1ce9   :  { %v2949_v32 = vsub.f32 %v2942_v17, %v2948_v26 }
0x1ceb   :  { %v2950_v44 = vmul.f32 1.442695, %v2949_v32 }
0x1ced   :  { %6080 = vpow2.f32 %v2950_v44 }
0x1cf7   :  { %v6081_v42 = vpop.eup %6080 }
0x1cf8   :  { %v2952_v56 = vsel %vm500_vm8, %v6081_v42, 0.0 }
0x1cf9   :  { %2953 = vadd.xlane.f32.xlu1 %v2952_v56 }
0x1d86   :  { %v2954_v43 = vpop.xlane.xlu1 %2953 }
0x1d87   :  { %6082 = vrcp.f32 %v2954_v43 }
0x1d91   :  { %v6083_v57 = vpop.eup %6082 }
0x1d92   :  { %v2956_v52 = vmul.f32 %v6083_v57, %v6081_v42 }
0x1d94   :  { %5514 = vmatmul.mubr.msk.f32.vlgmr.msra.gmra.mrb[40].mxu1 %vm512_vm9, %v2956_v52 }
0x1d95   :  { %5945 = vmatpush3.bf16.msra.mxu1 %v6462_v27  ;;  %5520 = vmatprep.mubr.msk.f32.mxu1 %vm6116_vm4, %v7319_v28 }
0x1d96   :  { %5946 = vmatprep.subr.bf16.mxu1 %v7320_v16 }
0x1e67   :  { %v3029_v15 = vpop.f32.mrb[40].mxu1 }
0x1e68   :  { %v5515_v21 = vpop.f32.mrb[41].mxu1  ;;  %5521 = vmatmul.mubr.msk.f32.vlgmr.msra.gmra.mrb[42].mxu1 %vm423_vm6, %v3029_v15 }
0x1e69   :  { %5948 = vmatpush3.bf16.msra.mxu1 %v6475_v34  ;;  %5531 = vmatprep.mubr.msk.f32.mxu1 %vm6116_vm4, %v7319_v28 }
0x1e6a   :  { %5949 = vmatprep.subr.bf16.mxu1 %v7320_v16 }
0x1e6d   :  { %5951 = vmatpush3.bf16.msra.mxu1 %v6485_v45 }
0x1e6e   :  { %5958 = vmatprep.subr.bf16.mxu1 %v7320_v16 }
0x1e70   :  { %5532 = vmatmul.mubr.msk.f32.vlgmr.msra.gmra.mrb[44].mxu1 %vm183_vm5, %v7028_v5 }
0x1e71   :  { %5960 = vmatpush3.bf16.msra.mxu1 %v6422_v47  ;;  %5553 = vmatprep.mubr.msk.f32.mxu1 %vm6116_vm4, %v7319_v28 }
0x1e72   :  { %5961 = vmatprep.subr.bf16.mxu1 %v7320_v16 }
0x1e75   :  { %5963 = vmatpush3.bf16.msra.mxu1 %v6436_v55 }
0x1e76   :  { %5964 = vmatprep.subr.bf16.mxu1 %v7320_v16 }
0x1e78   :  { %5554 = vmatmul.mubr.msk.f32.vlgmr.msra.gmra.mrb[46].mxu1 %vm183_vm5, %v7028_v5 }
0x1e79   :  { %5966 = vmatpush3.bf16.msra.mxu1 %v6545_v31  ;;  %5570 = vmatprep.mubr.msk.f32.mxu1 %vm6116_vm4, %v7319_v28  ;;  %v6113_v31 = vld [vmem:[%s7281_s4 + $0x9] ss:$0 sm:$0xff] }
0x1e7a   :  { %5973 = vmatprep.subr.bf16.mxu1 %v7320_v16 }
0x1f3b   :  { %v3102_v47 = vpop.f32.mrb[42].mxu1 }
0x1f3c   :  { %v5522_v27 = vpop.f32.mrb[43].mxu1 }
0x1f43   :  { %v3173_v34 = vpop.f32.mrb[44].mxu1 }
0x1f44   :  { %v3174_v45 = vadd.f32 %v6528_v1, %v3173_v34  ;;  %v5533_v50 = vpop.f32.mrb[45].mxu1 }
0x1f46   :  { %5559 = vmatmul.mubr.msk.f32.vlgmr.msra.gmra.mrb[30].mxu0 %vm423_vm6, %v3174_v45 }
0x1f47   :  { %5563 = vmatprep.mubr.msk.f32.mxu0 %vm6116_vm4, %v7319_v28 }
0x1f4b   :  { %v3313_v55 = vpop.f32.mrb[46].mxu1 }
0x1f4c   :  { %v3314_v5 = vadd.f32 %v6113_v31, %v3313_v55  ;;  %v5555_v25 = vpop.f32.mrb[47].mxu1 }
0x1f4e   :  { %5562 = vmatpush3.msk.msra.mxu0 %vm516_vm7, %v3314_v5 }
0x1f4f   :  { %5967 = vmatprep.subr.bf16.mxu0 %v7320_v16 }
0x2019   :  { %v3389_v40 = vpop.f32.mrb[30].mxu0 }
0x201a   :  { %v5560_v13 = vpop.f32.mrb[31].mxu0  ;;  %v3393_v1 = vsel %vm500_vm8, %v3389_v40, -inf }
0x201b   :  { %3394 = vmax.xlane.f32.xlu0 %v3393_v1 }
0x20a8   :  { %v3395_v30 = vpop.xlane.xlu0 %3394 }
0x20a9   :  { %v3396_v59 = vsub.f32 %v3389_v40, %v3395_v30 }
0x20ab   :  { %v3397_v41 = vmul.f32 1.442695, %v3396_v59 }
0x20ad   :  { %6084 = vpow2.f32 %v3397_v41 }
0x20b7   :  { %v6085_v10 = vpop.eup %6084 }
0x20b8   :  { %v3399_v61 = vsel %vm500_vm8, %v6085_v10, 0.0 }
0x20b9   :  { %3400 = vadd.xlane.f32.xlu1 %v3399_v61 }
0x2146   :  { %v3401_v51 = vpop.xlane.xlu1 %3400 }
0x2147   :  { %6086 = vrcp.f32 %v3401_v51 }
0x2151   :  { %v6087_v4 = vpop.eup %6086 }
0x2152   :  { %v3403_v6 = vmul.f32 %v6087_v4, %v6085_v10 }
0x2154   :  { %5564 = vmatmul.mubr.msk.f32.vlgmr.msra.gmra.mrb[32].mxu0 %vm512_vm9, %v3403_v6 }
0x2155   :  { %5969 = vmatpush3.bf16.msra.mxu0 %v6581_v12  ;;  %5581 = vmatprep.mubr.msk.f32.mxu0 %vm6116_vm4, %v7319_v28  ;;  %v3106_v12 = vadd.f32 %v3102_v47, %v6562_v48 }
0x2156   :  { %5970 = vmatprep.subr.bf16.mxu0 %v7320_v16 }
0x2159   :  { %5972 = vmatpush3.bf16.msra.mxu0 %v6587_v18 }
0x215a   :  { %5985 = vmatprep.subr.bf16.mxu0 %v7320_v16 }
0x2227   :  { %v3476_v14 = vpop.f32.mrb[32].mxu0 }
0x2228   :  { %v5565_v17 = vpop.f32.mrb[33].mxu0  ;;  %5571 = vmatmul.mubr.msk.f32.vlgmr.msra.gmra.mrb[48].mxu1 %vm423_vm6, %v3476_v14  ;;  %v7327_v14 = vld [vmem:[#allocation4_spill] sm:$0xff] }
0x2229   :  { %5975 = vmatpush3.bf16.msra.mxu1 %v6601_v39  ;;  %5600 = vmatprep.mubr.msk.f32.mxu1 %vm6116_vm4, %v7319_v28 }
0x222a   :  { %5976 = vmatprep.subr.bf16.mxu1 %v7320_v16 }
0x222d   :  { %5978 = vmatpush3.bf16.msra.mxu1 %v6611_v53 }
0x222e   :  { %5979 = vmatprep.subr.bf16.mxu1 %v7320_v16 }
0x2231   :  { %5981 = vmatpush3.bf16.msra.mxu1 %v6621_v62 }
0x2232   :  { %5982 = vmatprep.subr.bf16.mxu1 %v7320_v16 }
0x2235   :  { %5984 = vmatpush3.bf16.msra.mxu1 %v6631_v7 }
0x2236   :  { %5997 = vmatprep.subr.bf16.mxu1 %v7320_v16 }
0x22fb   :  { %v3549_v18 = vpop.f32.mrb[48].mxu1 }
0x22fc   :  { %v3553_v39 = vadd.f32 %v3549_v18, %v3106_v12  ;;  %v5572_v23 = vpop.f32.mrb[49].mxu1  ;;  %v7328_v12 = vld [vmem:[#allocation5_spill] sm:$0xff] }
0x22fe   :  { %v3554_v3 = vadd.f32 %v3553_v39, %v7020_v63 }
0x2300   :  { %v3555_v26 = vsel %vm156_vm3, %v3554_v3, 0.0 }
0x2301   :  { %3556 = vadd.xlane.f32.xlu0 %v3555_v26 }
0x238e   :  { %v3557_v53 = vpop.xlane.xlu0 %3556 }
0x238f   :  { %v3558_v32 = vmul.f32 0.03125, %v3557_v53 }
0x2391   :  { %v3559_v44 = vsub.f32 %v3554_v3, %v3558_v32 }
0x2393   :  { %v3560_v62 = vmul.f32 %v3559_v44, %v3559_v44 }
0x2395   :  { %v3561_v42 = vsel %vm156_vm3, %v3560_v62, 0.0 }
0x2396   :  { %3562 = vadd.xlane.f32.xlu1 %v3561_v42 }
0x2423   :  { %v3563_v7 = vpop.xlane.xlu1 %3562 }
0x2424   :  { %v3564_v56 = vmul.f32 0.03125, %v3563_v7  ;;  %v7329_v7 = vld [vmem:[#allocation6_spill] sm:$0xff] }
0x2426   :  { %v3565_v43 = vadd.f32 1e-06, %v3564_v56  ;;  %v7330_v56 = vld [vmem:[#allocation7_spill] sm:$0xff] }
0x2428   :  { %6088 = vrsqrt.f32 %v3565_v43  ;;  %v7331_v43 = vld [vmem:[#allocation8_spill] sm:$0xff] }
0x2432   :  { %v6089_v48 = vpop.eup %6088 }
0x2433   :  { %v3567_v57 = vmul.f32 %v6089_v48, %v3559_v44  ;;  %v7332_v48 = vld [vmem:[#allocation9_spill] sm:$0xff] }
0x2435   :  { %5582 = vmatmul.mubr.msk.f32.vlgmr.msra.gmra.mrb[34].mxu0 %vm183_vm5, %v3567_v57  ;;  %v7333_v57 = vld [vmem:[#allocation15_spill] sm:$0xff] }
0x2436   :  { %5987 = vmatpush3.bf16.msra.mxu0 %v6664_v54  ;;  %5611 = vmatprep.mubr.msk.f32.mxu0 %vm6116_vm4, %v7319_v28 }
0x2437   :  { %5988 = vmatprep.subr.bf16.mxu0 %v7320_v16 }
0x243a   :  { %5990 = vmatpush3.bf16.msra.mxu0 %v6683_v36 }
0x243b   :  { %5991 = vmatprep.subr.bf16.mxu0 %v7320_v16 }
0x2508   :  { %v3637_v63 = vpop.f32.mrb[34].mxu0 }
0x2509   :  { %v3638_v52 = vadd.f32 %v6638_v8, %v3637_v63  ;;  %v5583_v15 = vpop.f32.mrb[35].mxu0 }
0x250a   :  { %v7334_v15 = vld [vmem:[#allocation10_spill] sm:$0xff] }
0x250b   :  { %v3642_v21 = vmul.f32 0.70710677, %v3638_v52  ;;  %v3641_v27 = vmul.f32 0.5, %v3638_v52 }
0x250d   :  { %6090 = verf.f32 %v3642_v21  ;;  %v7335_v21 = vld [vmem:[#allocation11_spill] sm:$0xff] }
0x2517   :  { %v6091_v47 = vpop.eup %6090 }
0x2518   :  { %v3644_v34 = vadd.f32 1.0, %v6091_v47 }
0x251a   :  { %v3645_v45 = vmul.f32 %v3644_v34, %v3641_v27 }
0x251c   :  { %5601 = vmatmul.mubr.msk.f32.vlgmr.msra.gmra.mrb[50].mxu1 %vm68_vm0, %v3645_v45 }
0x251d   :  { %5999 = vmatpush3.bf16.msra.mxu1 %v6672_v19  ;;  %5633 = vmatprep.mubr.msk.f32.mxu1 %vm6116_vm4, %v7319_v28 }
0x251e   :  { %6000 = vmatprep.subr.bf16.mxu1 %v7320_v16 }
0x2521   :  { %6002 = vmatpush3.bf16.msra.mxu1 %v6692_v58 }
0x2522   :  { %5641 = vmatprep.subr.mxu1 %v7319_v28 }
0x25ef   :  { %v3715_v8 = vpop.f32.mrb[50].mxu1 }
0x25f0   :  { %v3716_v54 = vadd.f32 %v3715_v8, %v6648_v33  ;;  %v5602_v36 = vpop.f32.mrb[51].mxu1 }
0x25f2   :  { %v7150_v50 = vadd.f32 %v3716_v54, %v3554_v3 }
0x25f4   :  { %v3720_v55 = vsel %vm156_vm3, %v7150_v50, 0.0 }
0x25f5   :  { %3721 = vadd.xlane.f32.xlu0 %v3720_v55  ;;  %v7336_v55 = vld [vmem:[#allocation12_spill] sm:$0xff] }
0x2682   :  { %v3722_v19 = vpop.xlane.xlu0 %3721 }
0x2683   :  { %v3723_v31 = vmul.f32 0.03125, %v3722_v19 }
0x2685   :  { %v3724_v5 = vsub.f32 %v7150_v50, %v3723_v31 }
0x2687   :  { %v3725_v25 = vmul.f32 %v3724_v5, %v3724_v5 }
0x2689   :  { %v3726_v40 = vsel %vm156_vm3, %v3725_v25, 0.0 }
0x268a   :  { %3727 = vadd.xlane.f32.xlu1 %v3726_v40  ;;  %v7338_v40 = vld [vmem:[#allocation14_spill] sm:$0xff] }
0x2717   :  { %v3728_v58 = vpop.xlane.xlu1 %3727 }
0x2718   :  { %v3729_v13 = vmul.f32 0.03125, %v3728_v58 }
0x271a   :  { %v3730_v1 = vadd.f32 1e-06, %v3729_v13 }
0x271c   :  { %6092 = vrsqrt.f32 %v3730_v1 }
0x2726   :  { %v6093_v33 = vpop.eup %6092 }
0x2727   :  { %v7156_v30 = vmul.f32 %v6093_v33, %v3724_v5  ;;  %v7337_v5 = vld [vmem:[#allocation13_spill] sm:$0xff] }
0x2729   :  { %5612 = vmatmul.mubr.msk.f32.vlgmr.msra.gmra.mrb[36].mxu0 %vm183_vm5, %v7156_v30  ;;  %5634 = vmatmul.mubr.msk.f32.vlgmr.msra.gmra.mrb[52].mxu1 %vm183_vm5, %v7156_v30 }
0x272a   :  { %5993 = vmatpush3.bf16.msra.mxu0 %v6704_v11  ;;  %5622 = vmatprep.mubr.msk.f32.mxu0 %vm6116_vm4, %v7319_v28 }
0x272b   :  { %5994 = vmatprep.subr.bf16.mxu0 %v7320_v16  ;;  %5643 = vmatprep.mubr.msk.f32.mxu1 %vm6116_vm4, %v7319_v28 }
0x272e   :  { %5996 = vmatpush3.bf16.msra.mxu0 %v6719_v37  ;;  %v7326_v37 = vld [vmem:[#allocation3_spill] sm:$0xff] }
0x272f   :  { %5636 = vmatprep.subr.mxu0 %v7319_v28 }
0x2731   :  { %5623 = vmatmul.mubr.msk.f32.vlgmr.msra.gmra.mrb[38].mxu0 %vm183_vm5, %v7156_v30 }
0x2732   :  { %5638 = vmatprep.mubr.msk.f32.mxu0 %vm6116_vm4, %v7319_v28 }
0x27fc   :  { %v3802_v59 = vpop.f32.mrb[36].mxu0  ;;  %v3942_v11 = vpop.f32.mrb[52].mxu1 }
0x27fd   :  { %v3943_v41 = vadd.f32 %v6735_v2, %v3942_v11  ;;  %v5613_v10 = vpop.f32.mrb[37].mxu0  ;;  %v5635_v61 = vpop.f32.mrb[53].mxu1  ;;  %v3803_v17 = vadd.f32 %v7327_v14, %v3802_v59 }
0x27ff   :  { %5642 = vmatpush3.msk.msra.mxu1 %vm516_vm7, %v3943_v41 }
0x2800   :  { %6006 = vmatprep.subr.bf16.mxu1 %v7320_v16 }
0x2804   :  { %v3872_v51 = vpop.f32.mrb[38].mxu0 }
0x2805   :  { %v3873_v4 = vadd.f32 %v7326_v37, %v3872_v51  ;;  %v5624_v6 = vpop.f32.mrb[39].mxu0 }
0x2807   :  { %5637 = vmatpush3.xpose.msk.msra.mxu0 %vm423_vm6, %v3873_v4 }
0x2808   :  { %6003 = vmatprep.subr.bf16.mxu0 %v7320_v16 }
0x280a   :  { %5639 = vmatmul.mubr.msk.f32.vlgmr.msra.gmra.mrb[40].mxu0 %vm423_vm6, %v3803_v17 }
0x280b   :  { %6005 = vmatpush3.bf16.msra.mxu0 %v7328_v12  ;;  %5650 = vmatprep.mubr.msk.f32.mxu0 %vm6116_vm4, %v7319_v28 }
0x280c   :  { %6012 = vmatprep.subr.bf16.mxu0 %v7320_v16 }
0x28dd   :  { %v4018_v2 = vpop.f32.mrb[40].mxu0 }
0x28de   :  { %v5640_v18 = vpop.f32.mrb[41].mxu0  ;;  %v4022_v39 = vsel %vm500_vm8, %v4018_v2, -inf }
0x28df   :  { %4023 = vmax.xlane.f32.xlu0 %v4022_v39 }
0x296c   :  { %v4024_v23 = vpop.xlane.xlu0 %4023 }
0x296d   :  { %v4025_v3 = vsub.f32 %v4018_v2, %v4024_v23 }
0x296f   :  { %v4026_v26 = vmul.f32 1.442695, %v4025_v3 }
0x2971   :  { %6094 = vpow2.f32 %v4026_v26 }
0x297b   :  { %v6095_v53 = vpop.eup %6094 }
0x297c   :  { %v4028_v32 = vsel %vm500_vm8, %v6095_v53, 0.0 }
0x297d   :  { %4029 = vadd.xlane.f32.xlu1 %v4028_v32 }
0x2a0a   :  { %v4030_v44 = vpop.xlane.xlu1 %4029 }
0x2a0b   :  { %6096 = vrcp.f32 %v4030_v44 }
0x2a15   :  { %v6097_v62 = vpop.eup %6096 }
0x2a16   :  { %v4032_v42 = vmul.f32 %v6097_v62, %v6095_v53 }
0x2a18   :  { %5644 = vmatmul.mubr.msk.f32.vlgmr.msra.gmra.mrb[54].mxu1 %vm512_vm9, %v4032_v42 }
0x2a19   :  { %6008 = vmatpush3.bf16.msra.mxu1 %v7329_v7  ;;  %5661 = vmatprep.mubr.msk.f32.mxu1 %vm6116_vm4, %v7319_v28 }
0x2a1a   :  { %6009 = vmatprep.subr.bf16.mxu1 %v7320_v16 }
0x2a1d   :  { %6011 = vmatpush3.bf16.msra.mxu1 %v7330_v56 }
0x2a1e   :  { %6018 = vmatprep.subr.bf16.mxu1 %v7320_v16 }
0x2a20   :  { %5662 = vmatmul.mubr.msk.f32.vlgmr.msra.gmra.mrb[56].mxu1 %vm183_vm5, %v7156_v30 }
0x2a21   :  { %6020 = vmatpush3.bf16.msra.mxu1 %v7331_v43  ;;  %5683 = vmatprep.mubr.msk.f32.mxu1 %vm6116_vm4, %v7319_v28 }
0x2a22   :  { %6021 = vmatprep.subr.bf16.mxu1 %v7320_v16 }
0x2a25   :  { %6023 = vmatpush3.bf16.msra.mxu1 %v7332_v48 }
0x2a26   :  { %6024 = vmatprep.subr.bf16.mxu1 %v7320_v16 }
0x2a28   :  { %5684 = vmatmul.mubr.msk.f32.vlgmr.msra.gmra.mrb[58].mxu1 %vm183_vm5, %v7156_v30 }
0x2a29   :  { %6026 = vmatpush3.bf16.msra.mxu1 %v7333_v57  ;;  %5700 = vmatprep.mubr.msk.f32.mxu1 %vm6116_vm4, %v7319_v28 }
0x2a2a   :  { %6033 = vmatprep.subr.bf16.mxu1 %v7320_v16 }
0x2aeb   :  { %v4105_v63 = vpop.f32.mrb[54].mxu1 }
0x2aec   :  { %v5645_v52 = vpop.f32.mrb[55].mxu1  ;;  %5651 = vmatmul.mubr.msk.f32.vlgmr.msra.gmra.mrb[42].mxu0 %vm423_vm6, %v4105_v63  ;;  %v6114_v63 = vld [vmem:[%s7279_s2] sm:$0xff] }
0x2aed   :  { %6014 = vmatpush3.bf16.msra.mxu0 %v7334_v15  ;;  %5672 = vmatprep.mubr.msk.f32.mxu0 %vm6116_vm4, %v7319_v28 }
0x2aee   :  { %6015 = vmatprep.subr.bf16.mxu0 %v7320_v16 }
0x2af1   :  { %6017 = vmatpush3.bf16.msra.mxu0 %v7335_v21 }
0x2af2   :  { %5686 = vmatprep.subr.mxu0 %v7319_v28 }
0x2af3   :  { %v4249_v47 = vpop.f32.mrb[56].mxu1 }
0x2af4   :  { %v5663_v27 = vpop.f32.mrb[57].mxu1  ;;  %5673 = vmatmul.mubr.msk.f32.vlgmr.msra.gmra.mrb[44].mxu0 %vm183_vm5, %v7156_v30  ;;  %v4250_v25 = vadd.f32 %v7337_v5, %v4249_v47 }
0x2af5   :  { %5688 = vmatprep.mubr.msk.f32.mxu0 %vm6116_vm4, %v7319_v28 }
0x2afb   :  { %v4389_v34 = vpop.f32.mrb[58].mxu1 }
0x2afc   :  { %v5685_v45 = vpop.f32.mrb[59].mxu1  ;;  %v4390_v58 = vadd.f32 %v7338_v40, %v4389_v34 }
0x2bbf   :  { %v4178_v8 = vpop.f32.mrb[42].mxu0 }
0x2bc0   :  { %v5652_v54 = vpop.f32.mrb[43].mxu0 }
0x2bc7   :  { %v4319_v36 = vpop.f32.mrb[44].mxu0 }
0x2bc8   :  { %v4320_v19 = vadd.f32 %v7336_v55, %v4319_v36  ;;  %v5674_v31 = vpop.f32.mrb[45].mxu0 }
0x2bca   :  { %5687 = vmatpush3.xpose.msk.msra.mxu0 %vm423_vm6, %v4320_v19 }
0x2bcb   :  { %5691 = vmatprep.subr.mxu0 %v7319_v28 }
0x2bcd   :  { %5689 = vmatmul.mubr.msk.f32.vlgmr.msra.gmra.mrb[46].mxu0 %vm423_vm6, %v4250_v25 }
0x2bce   :  { %5692 = vmatpush3.msk.msra.mxu0 %vm516_vm7, %v4390_v58  ;;  %5693 = vmatprep.mubr.msk.f32.mxu0 %vm6116_vm4, %v7319_v28 }
0x2bcf   :  { %6027 = vmatprep.subr.bf16.mxu0 %v7320_v16 }
0x2ca0   :  { %v4465_v13 = vpop.f32.mrb[46].mxu0 }
0x2ca1   :  { %v5690_v1 = vpop.f32.mrb[47].mxu0  ;;  %v4469_v33 = vsel %vm500_vm8, %v4465_v13, -inf }
0x2ca2   :  { %4470 = vmax.xlane.f32.xlu0 %v4469_v33 }
0x2d2f   :  { %v4471_v30 = vpop.xlane.xlu0 %4470 }
0x2d30   :  { %v4472_v59 = vsub.f32 %v4465_v13, %v4471_v30 }
0x2d32   :  { %v4473_v11 = vmul.f32 1.442695, %v4472_v59 }
0x2d34   :  { %6098 = vpow2.f32 %v4473_v11 }
0x2d3e   :  { %v6099_v41 = vpop.eup %6098 }
0x2d3f   :  { %v4475_v10 = vsel %vm500_vm8, %v6099_v41, 0.0 }
0x2d40   :  { %4476 = vadd.xlane.f32.xlu1 %v4475_v10 }
0x2dcd   :  { %v4477_v61 = vpop.xlane.xlu1 %4476 }
0x2dce   :  { %6100 = vrcp.f32 %v4477_v61 }
0x2dd8   :  { %v6101_v51 = vpop.eup %6100 }
0x2dd9   :  { %v4479_v37 = vmul.f32 %v6101_v51, %v6099_v41 }
0x2ddb   :  { %5694 = vmatmul.mubr.msk.f32.vlgmr.msra.gmra.mrb[48].mxu0 %vm512_vm9, %v4479_v37 }
0x2ddc   :  { %6029 = vmatpush3.bf16.msra.mxu0 %v6916_v24  ;;  %5711 = vmatprep.mubr.msk.f32.mxu0 %vm6116_vm4, %v7319_v28  ;;  %v7339_v24 = vld [vmem:[#allocation2_spill] sm:$0xff] }
0x2ddd   :  { %6030 = vmatprep.subr.bf16.mxu0 %v7320_v16  ;;  %v2555_v56 = vsub.s32 2, %v7339_v24  ;;  %v2560_v48 = vsub.s32 3, %v7339_v24 }
0x2ddf   :  { %v2556_v52 = vrot.slane %v6114_v63, %v2555_v56  ;;  %v2561_v21 = vrot.slane %v6114_v63, %v2560_v48 }
0x2de0   :  { %6032 = vmatpush3.bf16.msra.mxu0 %v6922_v46  ;;  %v7340_v46 = vsub.s32 1, %v7339_v24 }
0x2de2   :  { %v2465_v14 = vrot.slane %v6893_v0, %v7340_v46 }
0x2eae   :  { %v4552_v4 = vpop.f32.mrb[48].mxu0 }
0x2eaf   :  { %v5695_v6 = vpop.f32.mrb[49].mxu0  ;;  %5701 = vmatmul.mubr.msk.f32.vlgmr.msra.gmra.mrb[60].mxu1 %vm423_vm6, %v4552_v4 }
0x2eb0   :  { %6035 = vmatpush3.bf16.msra.mxu1 %v6968_v9  ;;  %5730 = vmatprep.mubr.msk.f32.mxu1 %vm6116_vm4, %v7319_v28  ;;  %v4182_v9 = vadd.f32 %v4178_v8, %v6897_v22  ;;  %v2536_v28 = vadd.f32 %v7026_v35, %v2465_v14 }
0x2eb1   :  { %6036 = vmatprep.subr.bf16.mxu1 %v7320_v16 }
0x2eb4   :  { %6038 = vmatpush3.bf16.msra.mxu1 %v6978_v20 }
0x2eb5   :  { %6039 = vmatprep.subr.bf16.mxu1 %v7320_v16 }
0x2eb8   :  { %6041 = vmatpush3.bf16.msra.mxu1 %v6988_v29  ;;  %v2539_v29 = vadd.f32 %v2536_v28, %v6901_v60 }
0x2eb9   :  { %6042 = vmatprep.subr.bf16.mxu1 %v7320_v16 }
0x2eba   :  { %v2540_v16 = vsel %vm156_vm3, %v2539_v29, 0.0 }
0x2ebc   :  { %6044 = vmatpush3.bf16.msra.mxu1 %v6998_v38 }
0x2f82   :  { %v4625_v17 = vpop.f32.mrb[60].mxu1 }
0x2f83   :  { %v4629_v12 = vadd.f32 %v4625_v17, %v4182_v9  ;;  %v5702_v2 = vpop.f32.mrb[61].mxu1 }
0x2f85   :  { %v4630_v20 = vadd.f32 %v4629_v12, %v7150_v50 }
0x2f87   :  { %v4631_v18 = vsel %vm156_vm3, %v4630_v20, 0.0 }
0x2f88   :  { %4632 = vadd.xlane.f32.xlu0 %v4631_v18 }
0x2f8c   :  { %2541 = vadd.xlane.f32.xlu0 %v2540_v16 }
0x3015   :  { %v4633_v38 = vpop.xlane.xlu0 %4632 }
0x3016   :  { %v4634_v39 = vmul.f32 0.03125, %v4633_v38 }
0x3018   :  { %v4635_v0 = vsub.f32 %v4630_v20, %v4634_v39 }
0x3019   :  { %v2542_v23 = vpop.xlane.xlu0 %2541 }
0x301a   :  { %v2543_v22 = vmul.f32 0.03125, %v2542_v23  ;;  %v4636_v3 = vmul.f32 %v4635_v0, %v4635_v0 }
0x301c   :  { %v2544_v26 = vsub.f32 %v2539_v29, %v2543_v22  ;;  %v4637_v35 = vsel %vm156_vm3, %v4636_v3, 0.0 }
0x301d   :  { %4638 = vadd.xlane.f32.xlu1 %v4637_v35 }
0x301e   :  { %v2545_v53 = vmul.f32 %v2544_v26, %v2544_v26 }
0x3020   :  { %v2546_v50 = vsel %vm156_vm3, %v2545_v53, 0.0 }
0x3021   :  { %2547 = vadd.xlane.f32.xlu0 %v2546_v50 }
0x30aa   :  { %v4639_v32 = vpop.xlane.xlu1 %4638 }
0x30ab   :  { %v4640_v60 = vmul.f32 0.03125, %v4639_v32 }
0x30ad   :  { %v4641_v44 = vadd.f32 1e-06, %v4640_v60 }
0x30ae   :  { %v2548_v62 = vpop.xlane.xlu0 %2547 }
0x30af   :  { %6102 = vrsqrt.f32 %v4641_v44  ;;  %v2549_v42 = vmul.f32 0.03125, %v2548_v62 }
0x30b1   :  { %v2550_v7 = vadd.f32 1e-06, %v2549_v42 }
0x30b3   :  { %6104 = vrsqrt.f32 %v2550_v7 }
0x30b9   :  { %v6103_v43 = vpop.eup %6102 }
0x30ba   :  { %v4643_v57 = vmul.f32 %v6103_v43, %v4635_v0 }
0x30bc   :  { %5712 = vmatmul.mubr.msk.f32.vlgmr.msra.gmra.mrb[50].mxu0 %vm183_vm5, %v4643_v57 }
0x30bd   :  { %v6105_v15 = vpop.eup %6104 }
0x30be   :  { %v2552_v47 = vmul.f32 %v6105_v15, %v2544_v26 }
0x30c0   :  { %v2557_v27 = vmul.f32 %v2556_v52, %v2552_v47 }
0x30c2   :  { %v2562_v34 = vadd.f32 %v2561_v21, %v2557_v27 }
0x30c4   :  { %4811 = vst.msk [vmem:[%s7287_s10] sm:$0x1f] %vm156_vm3, %v2562_v34 }
0x318f   :  { %v4713_v45 = vpop.f32.mrb[50].mxu0 }
0x3190   :  { %v4714_v8 = vadd.f32 %v7005_v49, %v4713_v45  ;;  %v5713_v54 = vpop.f32.mrb[51].mxu0 }
0x3192   :  { %v4718_v36 = vmul.f32 0.70710677, %v4714_v8  ;;  %v4717_v19 = vmul.f32 0.5, %v4714_v8 }
0x3194   :  { %6106 = verf.f32 %v4718_v36 }
0x319e   :  { %v6107_v55 = vpop.eup %6106 }
0x319f   :  { %v4720_v31 = vadd.f32 1.0, %v6107_v55 }
0x31a1   :  { %v4721_v5 = vmul.f32 %v4720_v31, %v4717_v19 }
0x31a3   :  { %5731 = vmatmul.mubr.msk.f32.vlgmr.msra.gmra.mrb[62].mxu1 %vm68_vm0, %v4721_v5 }
0x3276   :  { %v4791_v25 = vpop.f32.mrb[62].mxu1 }
0x3277   :  { %v4792_v40 = vadd.f32 %v4791_v25, %v2465_v14  ;;  %v5732_v58 = vpop.f32.mrb[63].mxu1 }
0x3279   :  { %v4795_v13 = vadd.f32 %v4792_v40, %v4630_v20 }
0x327b   :  { %v4796_v1 = vsel %vm156_vm3, %v4795_v13, 0.0 }
0x327c   :  { %4797 = vadd.xlane.f32.xlu1 %v4796_v1 }
0x3309   :  { %v4798_v33 = vpop.xlane.xlu1 %4797 }
0x330a   :  { %v4799_v30 = vmul.f32 0.03125, %v4798_v33 }
0x330c   :  { %v4800_v59 = vsub.f32 %v4795_v13, %v4799_v30 }
0x330e   :  { %v4801_v49 = vmul.f32 %v4800_v59, %v4800_v59 }
0x3310   :  { %v4802_v11 = vsel %vm156_vm3, %v4801_v49, 0.0 }
0x3311   :  { %4803 = vadd.xlane.f32.xlu1 %v4802_v11 }
0x339e   :  { %v4804_v41 = vpop.xlane.xlu1 %4803 }
0x339f   :  { %v4805_v10 = vmul.f32 0.03125, %v4804_v41 }
0x33a1   :  { %v4806_v61 = vadd.f32 1e-06, %v4805_v10 }
0x33a3   :  { %6108 = vrsqrt.f32 %v4806_v61 }
0x33ad   :  { %v6109_v51 = vpop.eup %6108 }
0x33ae   :  { %v4808_v37 = vmul.f32 %v6109_v51, %v4800_v59 }
0x33b0   :  { %v4809_v4 = vmul.f32 %v4808_v37, %v2556_v52 }
0x33b2   :  { %v4810_v6 = vadd.f32 %v4809_v4, %v2561_v21 }
0x33b4   :  { %4812 = vst.msk [vmem:[%s7287_s10 + $0x8] sm:$0x1f] %vm156_vm3, %v4810_v6 }

</bundles_post_ra>
